<compile_context>
chip_gen: v7x
topology: tpu7x:2x2x1
jax: 0.10.0
libtpu: 0.0.40
codegen_flags: <defaults>
</compile_context>

<pallas_src>
import math
import jax
import jax.numpy as jnp
from jax.experimental import pallas as pl
from jax.experimental.pallas import tpu as pltpu


# ----------------------------------------------------------------------------
# Kernel
# ----------------------------------------------------------------------------
def _make_encoder_kernel(n_layers, n_head, d_k, d_v, d_model, seq_len,
                         temperature):
    inv_temp = 1.0 / temperature
    hdk = n_head * d_k
    hdv = n_head * d_v

    def kernel(kem_ref, rel_ref, ent_ref,
               wq0_ref, bq0_ref, wkv0_ref, bkv0_ref, hsum_ref, hexp_ref,
               wvr_ref, bvr_ref,
               wfc_ref, bfc_ref, ln1g_ref, ln1b_ref,
               w1_ref, b1_ref, w2_ref, b2_ref, ln2g_ref, ln2b_ref,
               out_ref):
        f32 = jnp.float32
        cdt = wq0_ref.dtype          # matmul input dtype (bf16 fast path / f32)
        bblk = kem_ref.shape[0]

        def ln(x, g, b):
            mu = jnp.mean(x, axis=-1, keepdims=True)
            c = x - mu
            var = jnp.mean(c * c, axis=-1, keepdims=True)
            return c * jax.lax.rsqrt(var + 1e-5) * g + b

        def ffn(x, l):
            h = jnp.maximum(
                jnp.dot(x.astype(cdt), w1_ref[l],
                        preferred_element_type=f32) + b1_ref[l], 0.0)
            y = jnp.dot(h.astype(cdt), w2_ref[l],
                        preferred_element_type=f32) + b2_ref[l]
            return ln(y + x, ln2g_ref[l], ln2b_ref[l])

        qv = kem_ref[...]                                       # (Bblk, D) f32 residual

        # ----------------- layer 0: attention over the path sequence ---------
        # seq_input_em = (R_pos[rel_seq]) * e_features[head_seq]
        kv0 = (rel_ref[...] * ent_ref[...]).reshape(bblk * seq_len, d_model)

        q0 = jnp.dot(qv.astype(cdt), wq0_ref[...],
                     preferred_element_type=f32) + bq0_ref[...]         # (Bblk, hdk)
        kvp = jnp.dot(kv0.astype(cdt), wkv0_ref[...],
                      preferred_element_type=f32) + bkv0_ref[...]       # (Bblk*L, hdk+hdv)
        k0 = kvp[:, :hdk]
        v0 = kvp[:, hdk:]

        # per-head scores without any per-head loop / lane concat:
        # prod[b*L+l, :] = q0[b, :] * k0[b*L+l, :], then segment-sum the d_k
        # lanes of each head with a block matrix (MXU).
        prod = (q0[:, None, :] *
                k0.reshape(bblk, seq_len, hdk)).reshape(bblk * seq_len, hdk)
        scores = jnp.dot(prod.astype(cdt), hsum_ref[...],
                         preferred_element_type=f32) * inv_temp          # (Bblk*L, H)

        s3 = scores.reshape(bblk, seq_len, n_head)
        m = jnp.max(s3, axis=1, keepdims=True)
        p = jnp.exp(s3 - m)
        p = p * pl.reciprocal(jnp.sum(p, axis=1, keepdims=True), approx=True)

        # expand each head's probability over its d_v lanes (MXU), weight V,
        # then sum over the L keys of each instance.
        p_rep = jnp.dot(p.reshape(bblk * seq_len, n_head).astype(cdt),
                        hexp_ref[...], preferred_element_type=f32)       # (Bblk*L, hdv)
        attn = jnp.sum((p_rep * v0).reshape(bblk, seq_len, hdv), axis=1)  # (Bblk, hdv)

        x = jnp.dot(attn.astype(cdt), wfc_ref[0],
                    preferred_element_type=f32) + bfc_ref[0]
        x = ln(x + qv, ln1g_ref[0], ln1b_ref[0])
        x = ffn(x, 0)

        # ----------------- layers >= 1: Lkv == 1 --------------------------
        # softmax over a single key is identically 1, so attention output is
        # exactly the V projection of the previous layer's (1, D) output.
        for l in range(1, n_layers):
            v = jnp.dot(x.astype(cdt), wvr_ref[l - 1],
                        preferred_element_type=f32) + bvr_ref[l - 1]
            x2 = jnp.dot(v.astype(cdt), wfc_ref[l],
                         preferred_element_type=f32) + bfc_ref[l]
            x = ln(x2 + qv, ln1g_ref[l], ln1b_ref[l])
            x = ffn(x, l)

        out_ref[...] = x

    return kernel


# ----------------------------------------------------------------------------
# One-time parameter preparation (hoisted out of the per-call path)
# ----------------------------------------------------------------------------
def prepare_params(params, r_features, *, n_head, d_k, d_v,
                   weight_dtype=jnp.bfloat16):
    wdt = weight_dtype
    n_layers = params["wqs"].shape[0]
    hdk, hdv = n_head * d_k, n_head * d_v

    # block matrices for head segment-sum / expansion (exact 0/1 values)
    hsum = (jnp.arange(hdk)[:, None] // d_k ==
            jnp.arange(n_head)[None, :]).astype(wdt)                 # (hdk, H)
    hexp = (jnp.arange(n_head)[:, None] ==
            jnp.arange(hdv)[None, :] // d_v).astype(wdt)             # (H, hdv)

    if n_layers > 1:
        wv_rest, bv_rest = params["wvs"][1:], params["bvs"][1:]
    else:  # dummy, never read by the kernel
        wv_rest, bv_rest = params["wvs"][:1], params["bvs"][:1]

    return {
        # fold positional_weight into the relation feature table (f32)
        "r_pos": r_features @ params["wpos"],
        "wq0": params["wqs"][0].astype(wdt), "bq0": params["bqs"][0],
        "wkv0": jnp.concatenate([params["wks"][0], params["wvs"][0]],
                                axis=-1).astype(wdt),
        "bkv0": jnp.concatenate([params["bks"][0], params["bvs"][0]], axis=-1),
        "hsum": hsum, "hexp": hexp,
        "wv_rest": wv_rest.astype(wdt), "bv_rest": bv_rest,
        "wfc": params["wfc"].astype(wdt), "bfc": params["bfc"],
        "ln1g": params["ln1g"], "ln1b": params["ln1b"],
        "w1": params["w1"].astype(wdt), "b1": params["b1"],
        "w2": params["w2"].astype(wdt), "b2": params["b2"],
        "ln2g": params["ln2g"], "ln2b": params["ln2b"],
    }


# ----------------------------------------------------------------------------
# Batched forward wrapper
# ----------------------------------------------------------------------------
def encoder_forward_batched(prep, rel_seq, head_seq, kernel_em, e_features,
                            *, n_layers, n_head, d_k, d_v, block_b=16):
    B, L = rel_seq.shape
    D = e_features.shape[-1]
    hdk, hdv = n_head * d_k, n_head * d_v
    d_inner = prep["w1"].shape[-1]
    assert kernel_em.shape == (B, D)
    assert B % block_b == 0, (B, block_b)

    # Embedding row gathers stay in the XLA wrapper (cheap, data-dependent).
    # TODO(synk): move into the kernel via PrefetchScalarGridSpec + pl.Element
    # row indexing if these gathers ever show up in profiles.
    rel_em = jnp.take(prep["r_pos"], rel_seq, axis=0)     # (B, L, D) f32
    ent_em = jnp.take(e_features, head_seq, axis=0)       # (B, L, D) f32

    kernel = _make_encoder_kernel(n_layers, n_head, d_k, d_v, D, L,
                                  float(d_k) ** 0.5)

    def batch_spec(shape):
        nd = len(shape)
        return pl.BlockSpec((block_b,) + tuple(shape[1:]),
                            lambda b, _n=nd: (b,) + (0,) * (_n - 1))

    def const_spec(arr):
        nd = arr.ndim
        return pl.BlockSpec(arr.shape, lambda b, _n=nd: (0,) * _n)

    weight_args = (prep["wq0"], prep["bq0"], prep["wkv0"], prep["bkv0"],
                   prep["hsum"], prep["hexp"], prep["wv_rest"], prep["bv_rest"],
                   prep["wfc"], prep["bfc"], prep["ln1g"], prep["ln1b"],
                   prep["w1"], prep["b1"], prep["w2"], prep["b2"],
                   prep["ln2g"], prep["ln2b"])

    in_specs = ([batch_spec(kernel_em.shape),
                 batch_spec(rel_em.shape),
                 batch_spec(ent_em.shape)]
                + [const_spec(w) for w in weight_args])

    flops = int(
        2 * B * (D * hdk + L * D * (hdk + hdv) + L * hdk * n_head
                 + L * n_head * hdv + hdv * D + D * d_inner + d_inner * D)
        + 2 * B * (n_layers - 1) * (D * hdv + hdv * D + D * d_inner + d_inner * D))
    bytes_accessed = int(
        sum(int(a.size) * a.dtype.itemsize
            for a in (kernel_em, rel_em, ent_em) + weight_args)
        + B * D * 4)
    cost = pl.CostEstimate(flops=flops,
                           transcendentals=int(B * (L * n_head + 2 * n_layers)),
                           bytes_accessed=bytes_accessed)

    out = pl.pallas_call(
        kernel,
        out_shape=jax.ShapeDtypeStruct((B, D), jnp.float32),
        grid=(B // block_b,),
        in_specs=in_specs,
        out_specs=pl.BlockSpec((block_b, D), lambda b: (b, 0)),
        compiler_params=pltpu.CompilerParams(
            dimension_semantics=("parallel",),
            vmem_limit_bytes=32 * 1024 * 1024),
        cost_estimate=cost,
    )(kernel_em, rel_em, ent_em, *weight_args)
    return out


# ----------------------------------------------------------------------------
# Init + pure-JAX reference (mirrors the PyTorch module, eval mode, f32)
# ----------------------------------------------------------------------------
def init_params(key, e_dim, d_inner, n_layers, n_head, d_k, d_v):
    """Deterministic init; weights stored as (in, out) so y = x @ W + b."""
    hdk, hdv = n_head * d_k, n_head * d_v
    ks = jax.random.split(key, 13)

    def u(k, shape, scale):
        return jax.random.uniform(k, shape, jnp.float32, -scale, scale)

    s_in = 1.0 / math.sqrt(e_dim)
    s_fc = 1.0 / math.sqrt(hdv)
    s_w2 = 1.0 / math.sqrt(d_inner)
    return {
        "wpos": u(ks[0], (e_dim, e_dim), math.sqrt(6.0 / (2.0 * e_dim))),
        "wqs": u(ks[1], (n_layers, e_dim, hdk), s_in),
        "bqs": u(ks[2], (n_layers, 1, hdk), s_in),
        "wks": u(ks[3], (n_layers, e_dim, hdk), s_in),
        "bks": u(ks[4], (n_layers, 1, hdk), s_in),
        "wvs": u(ks[5], (n_layers, e_dim, hdv), s_in),
        "bvs": u(ks[6], (n_layers, 1, hdv), s_in),
        "wfc": u(ks[7], (n_layers, hdv, e_dim), s_fc),
        "bfc": u(ks[8], (n_layers, 1, e_dim), s_fc),
        "ln1g": jnp.ones((n_layers, 1, e_dim), jnp.float32),
        "ln1b": jnp.zeros((n_layers, 1, e_dim), jnp.float32),
        "w1": u(ks[9], (n_layers, e_dim, d_inner), s_in),
        "b1": u(ks[10], (n_layers, 1, d_inner), s_in),
        "w2": u(ks[11], (n_layers, d_inner, e_dim), s_w2),
        "b2": u(ks[12], (n_layers, 1, e_dim), s_w2),
        "ln2g": jnp.ones((n_layers, 1, e_dim), jnp.float32),
        "ln2b": jnp.zeros((n_layers, 1, e_dim), jnp.float32),
    }


def _reference_forward_single(params, rel_seq, head_seq, kernel_em,
                              e_features, r_features, *, n_head, d_k, d_v):
    """Pure-JAX f32 mirror of PyTorch Encoder.forward (eval mode)."""
    temp = float(d_k) ** 0.5
    n_layers = params["wqs"].shape[0]

    def ln(x, g, b):
        mu = jnp.mean(x, axis=-1, keepdims=True)
        var = jnp.mean((x - mu) ** 2, axis=-1, keepdims=True)
        return (x - mu) / jnp.sqrt(var + 1e-5) * g + b

    kv = (r_features[rel_seq] @ params["wpos"]) * e_features[head_seq]
    qvec = kernel_em[None, :]
    x = qvec
    for l in range(n_layers):
        q = qvec @ params["wqs"][l] + params["bqs"][l]
        k = kv @ params["wks"][l] + params["bks"][l]
        v = kv @ params["wvs"][l] + params["bvs"][l]
        heads = []
        for h in range(n_head):
            qh = q[:, h * d_k:(h + 1) * d_k]
            kh = k[:, h * d_k:(h + 1) * d_k]
            vh = v[:, h * d_v:(h + 1) * d_v]
            a = jax.nn.softmax((qh @ kh.T) / temp, axis=-1)
            heads.append(a @ vh)
        o = jnp.concatenate(heads, axis=-1) @ params["wfc"][l] + params["bfc"][l]
        x = ln(o + qvec, params["ln1g"][l], params["ln1b"][l])
        hmid = jax.nn.relu(x @ params["w1"][l] + params["b1"][l])
        y = hmid @ params["w2"][l] + params["b2"][l]
        x = ln(y + x, params["ln2g"][l], params["ln2b"][l])
        kv = x
    return x[0]


# ----------------------------------------------------------------------------
if __name__ == "__main__":
    E_DIM = 128                # entity_dim == relation_dim == d_model (lane-dense)
    D_INNER = 128              # module uses d_inner == e_dim
    N_HEAD, D_K, D_V = 4, 32, 32
    N_LAYERS = 2
    SEQ_LEN = 8
    N_ENT, N_REL = 16, 16
    BATCH = 64                 # independent encoder evaluations
    BLOCK_B = 16               # instances per grid step -> layer-0 KV matmul M = 128

    key = jax.random.PRNGKey(0)
    kp, ke, kr, kk, ks1, ks2 = jax.random.split(key, 6)

    params = init_params(kp, E_DIM, D_INNER, N_LAYERS, N_HEAD, D_K, D_V)
    e_features = jax.random.normal(ke, (N_ENT, E_DIM), jnp.float32)
    r_features = jax.random.normal(kr, (N_REL, E_DIM), jnp.float32)
    kernel_em = jax.random.normal(kk, (BATCH, E_DIM), jnp.float32)
    rel_seq = jax.random.randint(ks1, (BATCH, SEQ_LEN), 0, N_REL)
    head_seq = jax.random.randint(ks2, (BATCH, SEQ_LEN), 0, N_ENT)

    common = dict(n_layers=N_LAYERS, n_head=N_HEAD, d_k=D_K, d_v=D_V,
                  block_b=BLOCK_B)

    # f32 weight path: strict validation of the kernel math.
    prep32 = prepare_params(params, r_features, n_head=N_HEAD, d_k=D_K,
                            d_v=D_V, weight_dtype=jnp.float32)
    out32 = jax.block_until_ready(
        encoder_forward_batched(prep32, rel_seq, head_seq, kernel_em,
                                e_features, **common))

    # bf16 weight path: fast path (half weight DMA, bf16 MXU), loose tolerance.
    prep16 = prepare_params(params, r_features, n_head=N_HEAD, d_k=D_K,
                            d_v=D_V, weight_dtype=jnp.bfloat16)
    out16 = jax.block_until_ready(
        encoder_forward_batched(prep16, rel_seq, head_seq, kernel_em,
                                e_features, **common))

    ref_fn = jax.vmap(lambda rs, hs, km: _reference_forward_single(
        params, rs, hs, km, e_features, r_features,
        n_head=N_HEAD, d_k=D_K, d_v=D_V))
    ref = jax.block_until_ready(ref_fn(rel_seq, head_seq, kernel_em))

    assert out32.shape == (BATCH, E_DIM), out32.shape
    assert jnp.allclose(out32, ref, atol=1e-2, rtol=1e-2), \
        float(jnp.max(jnp.abs(out32 - ref)))
    assert jnp.allclose(out16, ref, atol=1e-1, rtol=1e-1), \
        float(jnp.max(jnp.abs(out16 - ref)))

    print("KERNEL_OK")
</pallas_src>

<mosaic_0001>
module attributes {stable_mosaic.version = 11 : i64} {
  func.func @kernel(%arg0: i32, %arg1: memref<16x128xf32, #tpu.memory_space<vmem>>, %arg2: memref<16x8x128xf32, #tpu.memory_space<vmem>>, %arg3: memref<16x8x128xf32, #tpu.memory_space<vmem>>, %arg4: memref<128x128xf32, #tpu.memory_space<vmem>>, %arg5: memref<1x128xf32, #tpu.memory_space<vmem>>, %arg6: memref<128x256xf32, #tpu.memory_space<vmem>>, %arg7: memref<1x256xf32, #tpu.memory_space<vmem>>, %arg8: memref<128x4xf32, #tpu.memory_space<vmem>>, %arg9: memref<4x128xf32, #tpu.memory_space<vmem>>, %arg10: memref<1x128x128xf32, #tpu.memory_space<vmem>>, %arg11: memref<1x1x128xf32, #tpu.memory_space<vmem>>, %arg12: memref<2x128x128xf32, #tpu.memory_space<vmem>>, %arg13: memref<2x1x128xf32, #tpu.memory_space<vmem>>, %arg14: memref<2x1x128xf32, #tpu.memory_space<vmem>>, %arg15: memref<2x1x128xf32, #tpu.memory_space<vmem>>, %arg16: memref<2x128x128xf32, #tpu.memory_space<vmem>>, %arg17: memref<2x1x128xf32, #tpu.memory_space<vmem>>, %arg18: memref<2x128x128xf32, #tpu.memory_space<vmem>>, %arg19: memref<2x1x128xf32, #tpu.memory_space<vmem>>, %arg20: memref<2x1x128xf32, #tpu.memory_space<vmem>>, %arg21: memref<2x1x128xf32, #tpu.memory_space<vmem>>, %arg22: memref<16x128xf32, #tpu.memory_space<vmem>>) attributes {dimension_semantics = [#tpu.dimension_semantics<parallel>], iteration_bounds = array<i64: 4>, scalar_prefetch = 0 : i64, scratch_operands = 0 : i64, tpu.core_type = #tpu.core_type<tc>, window_params = [{transform_indices = @transform_0, window_bounds = array<i64: 16, 128>}, {transform_indices = @transform_1, window_bounds = array<i64: 16, 8, 128>}, {transform_indices = @transform_2, window_bounds = array<i64: 16, 8, 128>}, {pipeline_mode = #tpu.pipeline_mode<synchronous>, transform_indices = @transform_3, window_bounds = array<i64: 128, 128>}, {pipeline_mode = #tpu.pipeline_mode<synchronous>, transform_indices = @transform_4, window_bounds = array<i64: 1, 128>}, {pipeline_mode = #tpu.pipeline_mode<synchronous>, transform_indices = @transform_5, window_bounds = array<i64: 128, 256>}, {pipeline_mode = #tpu.pipeline_mode<synchronous>, transform_indices = @transform_6, window_bounds = array<i64: 1, 256>}, {pipeline_mode = #tpu.pipeline_mode<synchronous>, transform_indices = @transform_7, window_bounds = array<i64: 128, 4>}, {pipeline_mode = #tpu.pipeline_mode<synchronous>, transform_indices = @transform_8, window_bounds = array<i64: 4, 128>}, {pipeline_mode = #tpu.pipeline_mode<synchronous>, transform_indices = @transform_9, window_bounds = array<i64: 1, 128, 128>}, {pipeline_mode = #tpu.pipeline_mode<synchronous>, transform_indices = @transform_10, window_bounds = array<i64: 1, 1, 128>}, {pipeline_mode = #tpu.pipeline_mode<synchronous>, transform_indices = @transform_11, window_bounds = array<i64: 2, 128, 128>}, {pipeline_mode = #tpu.pipeline_mode<synchronous>, transform_indices = @transform_12, window_bounds = array<i64: 2, 1, 128>}, {pipeline_mode = #tpu.pipeline_mode<synchronous>, transform_indices = @transform_13, window_bounds = array<i64: 2, 1, 128>}, {pipeline_mode = #tpu.pipeline_mode<synchronous>, transform_indices = @transform_14, window_bounds = array<i64: 2, 1, 128>}, {pipeline_mode = #tpu.pipeline_mode<synchronous>, transform_indices = @transform_15, window_bounds = array<i64: 2, 128, 128>}, {pipeline_mode = #tpu.pipeline_mode<synchronous>, transform_indices = @transform_16, window_bounds = array<i64: 2, 1, 128>}, {pipeline_mode = #tpu.pipeline_mode<synchronous>, transform_indices = @transform_17, window_bounds = array<i64: 2, 128, 128>}, {pipeline_mode = #tpu.pipeline_mode<synchronous>, transform_indices = @transform_18, window_bounds = array<i64: 2, 1, 128>}, {pipeline_mode = #tpu.pipeline_mode<synchronous>, transform_indices = @transform_19, window_bounds = array<i64: 2, 1, 128>}, {pipeline_mode = #tpu.pipeline_mode<synchronous>, transform_indices = @transform_20, window_bounds = array<i64: 2, 1, 128>}, {transform_indices = @transform_21, window_bounds = array<i64: 16, 128>}]} {
    %c0 = arith.constant 0 : index
    %c0_0 = arith.constant 0 : index
    %0 = vector.load %arg1[%c0, %c0_0] : memref<16x128xf32, #tpu.memory_space<vmem>>, vector<16x128xf32>
    %c0_1 = arith.constant 0 : index
    %c0_2 = arith.constant 0 : index
    %c0_3 = arith.constant 0 : index
    %1 = vector.load %arg2[%c0_1, %c0_2, %c0_3] : memref<16x8x128xf32, #tpu.memory_space<vmem>>, vector<16x8x128xf32>
    %c0_4 = arith.constant 0 : index
    %c0_5 = arith.constant 0 : index
    %c0_6 = arith.constant 0 : index
    %2 = vector.load %arg3[%c0_4, %c0_5, %c0_6] : memref<16x8x128xf32, #tpu.memory_space<vmem>>, vector<16x8x128xf32>
    %3 = arith.mulf %1, %2 : vector<16x8x128xf32>
    %4 = vector.shape_cast %3 : vector<16x8x128xf32> to vector<128x128xf32>
    %c0_7 = arith.constant 0 : index
    %c0_8 = arith.constant 0 : index
    %5 = vector.load %arg4[%c0_7, %c0_8] : memref<128x128xf32, #tpu.memory_space<vmem>>, vector<128x128xf32>
    %cst = arith.constant dense<0.000000e+00> : vector<16x128xf32>
    %6 = tpu.matmul %0, %5, %cst {dimension_numbers = #tpu.dot_dimension_numbers<[1], [0], [0], [1], [0, 0, 1, 1], [], []>} : vector<16x128xf32>, vector<128x128xf32>, vector<16x128xf32> -> vector<16x128xf32>
    %c0_9 = arith.constant 0 : index
    %c0_10 = arith.constant 0 : index
    %7 = vector.load %arg5[%c0_9, %c0_10] : memref<1x128xf32, #tpu.memory_space<vmem>>, vector<1x128xf32>
    %8 = vector.broadcast %7 : vector<1x128xf32> to vector<16x128xf32>
    %9 = arith.addf %6, %8 : vector<16x128xf32>
    %c0_11 = arith.constant 0 : index
    %c0_12 = arith.constant 0 : index
    %10 = vector.load %arg6[%c0_11, %c0_12] : memref<128x256xf32, #tpu.memory_space<vmem>>, vector<128x256xf32>
    %cst_13 = arith.constant dense<0.000000e+00> : vector<128x256xf32>
    %11 = tpu.matmul %4, %10, %cst_13 {dimension_numbers = #tpu.dot_dimension_numbers<[1], [0], [0], [1], [0, 0, 1, 1], [], []>} : vector<128x128xf32>, vector<128x256xf32>, vector<128x256xf32> -> vector<128x256xf32>
    %c0_14 = arith.constant 0 : index
    %c0_15 = arith.constant 0 : index
    %12 = vector.load %arg7[%c0_14, %c0_15] : memref<1x256xf32, #tpu.memory_space<vmem>>, vector<1x256xf32>
    %13 = vector.broadcast %12 : vector<1x256xf32> to vector<128x256xf32>
    %14 = arith.addf %11, %13 : vector<128x256xf32>
    %15 = vector.extract_strided_slice %14 {offsets = [0, 0], sizes = [128, 128], strides = [1, 1]} : vector<128x256xf32> to vector<128x128xf32>
    %16 = vector.extract_strided_slice %14 {offsets = [0, 128], sizes = [128, 128], strides = [1, 1]} : vector<128x256xf32> to vector<128x128xf32>
    %17 = vector.shape_cast %9 : vector<16x128xf32> to vector<16x1x128xf32>
    %18 = vector.shape_cast %15 : vector<128x128xf32> to vector<16x8x128xf32>
    %19 = vector.broadcast %17 : vector<16x1x128xf32> to vector<16x8x128xf32>
    %20 = arith.mulf %19, %18 : vector<16x8x128xf32>
    %21 = vector.shape_cast %20 : vector<16x8x128xf32> to vector<128x128xf32>
    %c0_16 = arith.constant 0 : index
    %c0_17 = arith.constant 0 : index
    %22 = vector.load %arg8[%c0_16, %c0_17] : memref<128x4xf32, #tpu.memory_space<vmem>>, vector<128x4xf32>
    %cst_18 = arith.constant dense<0.000000e+00> : vector<128x4xf32>
    %23 = tpu.matmul %21, %22, %cst_18 {dimension_numbers = #tpu.dot_dimension_numbers<[1], [0], [0], [1], [0, 0, 1, 1], [], []>} : vector<128x128xf32>, vector<128x4xf32>, vector<128x4xf32> -> vector<128x4xf32>
    %cst_19 = arith.constant 0.176776692 : f32
    %24 = vector.broadcast %cst_19 : f32 to vector<128x4xf32>
    %25 = arith.mulf %23, %24 : vector<128x4xf32>
    %26 = vector.shape_cast %25 : vector<128x4xf32> to vector<16x8x4xf32>
    %cst_20 = arith.constant dense<0xFF800000> : vector<16x4xf32>
    %27 = vector.multi_reduction <maximumf>, %26, %cst_20 [1] : vector<16x8x4xf32> to vector<16x4xf32>
    %28 = vector.shape_cast %27 : vector<16x4xf32> to vector<16x1x4xf32>
    %29 = vector.broadcast %28 : vector<16x1x4xf32> to vector<16x8x4xf32>
    %30 = arith.subf %26, %29 : vector<16x8x4xf32>
    %31 = math.exp %30 : vector<16x8x4xf32>
    %cst_21 = arith.constant dense<0.000000e+00> : vector<16x4xf32>
    %32 = vector.multi_reduction <add>, %31, %cst_21 [1] : vector<16x8x4xf32> to vector<16x4xf32>
    %33 = vector.shape_cast %32 : vector<16x4xf32> to vector<16x1x4xf32>
    %34 = tpu.reciprocal %33 {approx = true} : vector<16x1x4xf32> -> vector<16x1x4xf32>
    %35 = vector.broadcast %34 : vector<16x1x4xf32> to vector<16x8x4xf32>
    %36 = arith.mulf %31, %35 : vector<16x8x4xf32>
    %37 = vector.shape_cast %36 : vector<16x8x4xf32> to vector<128x4xf32>
    %c0_22 = arith.constant 0 : index
    %c0_23 = arith.constant 0 : index
    %38 = vector.load %arg9[%c0_22, %c0_23] : memref<4x128xf32, #tpu.memory_space<vmem>>, vector<4x128xf32>
    %cst_24 = arith.constant dense<0.000000e+00> : vector<128x128xf32>
    %39 = tpu.matmul %37, %38, %cst_24 {dimension_numbers = #tpu.dot_dimension_numbers<[1], [0], [0], [1], [0, 0, 1, 1], [], []>} : vector<128x4xf32>, vector<4x128xf32>, vector<128x128xf32> -> vector<128x128xf32>
    %40 = arith.mulf %39, %16 : vector<128x128xf32>
    %41 = vector.shape_cast %40 : vector<128x128xf32> to vector<16x8x128xf32>
    %cst_25 = arith.constant dense<0.000000e+00> : vector<16x128xf32>
    %42 = vector.multi_reduction <add>, %41, %cst_25 [1] : vector<16x8x128xf32> to vector<16x128xf32>
    %c0_26 = arith.constant 0 : index
    %c0_27 = arith.constant 0 : index
    %c0_28 = arith.constant 0 : index
    %43 = vector.load %arg12[%c0_26, %c0_27, %c0_28] : memref<2x128x128xf32, #tpu.memory_space<vmem>>, vector<1x128x128xf32>
    %44 = vector.shape_cast %43 : vector<1x128x128xf32> to vector<128x128xf32>
    %cst_29 = arith.constant dense<0.000000e+00> : vector<16x128xf32>
    %45 = tpu.matmul %42, %44, %cst_29 {dimension_numbers = #tpu.dot_dimension_numbers<[1], [0], [0], [1], [0, 0, 1, 1], [], []>} : vector<16x128xf32>, vector<128x128xf32>, vector<16x128xf32> -> vector<16x128xf32>
    %c0_30 = arith.constant 0 : index
    %c0_31 = arith.constant 0 : index
    %c0_32 = arith.constant 0 : index
    %46 = vector.load %arg13[%c0_30, %c0_31, %c0_32] : memref<2x1x128xf32, #tpu.memory_space<vmem>>, vector<1x1x128xf32>
    %47 = vector.shape_cast %46 : vector<1x1x128xf32> to vector<1x128xf32>
    %48 = vector.broadcast %47 : vector<1x128xf32> to vector<16x128xf32>
    %49 = arith.addf %45, %48 : vector<16x128xf32>
    %50 = arith.addf %49, %0 : vector<16x128xf32>
    %c0_33 = arith.constant 0 : index
    %c0_34 = arith.constant 0 : index
    %c0_35 = arith.constant 0 : index
    %51 = vector.load %arg14[%c0_33, %c0_34, %c0_35] : memref<2x1x128xf32, #tpu.memory_space<vmem>>, vector<1x1x128xf32>
    %52 = vector.shape_cast %51 : vector<1x1x128xf32> to vector<1x128xf32>
    %c0_36 = arith.constant 0 : index
    %c0_37 = arith.constant 0 : index
    %c0_38 = arith.constant 0 : index
    %53 = vector.load %arg15[%c0_36, %c0_37, %c0_38] : memref<2x1x128xf32, #tpu.memory_space<vmem>>, vector<1x1x128xf32>
    %54 = vector.shape_cast %53 : vector<1x1x128xf32> to vector<1x128xf32>
    %cst_39 = arith.constant dense<0.000000e+00> : vector<16xf32>
    %55 = vector.multi_reduction <add>, %50, %cst_39 [1] : vector<16x128xf32> to vector<16xf32>
    %56 = vector.shape_cast %55 : vector<16xf32> to vector<16x1xf32>
    %cst_40 = arith.constant 1.280000e+02 : f32
    %57 = vector.broadcast %cst_40 : f32 to vector<16x1xf32>
    %58 = arith.divf %56, %57 : vector<16x1xf32>
    %59 = vector.broadcast %58 : vector<16x1xf32> to vector<16x128xf32>
    %60 = arith.subf %50, %59 : vector<16x128xf32>
    %61 = arith.mulf %60, %60 : vector<16x128xf32>
    %cst_41 = arith.constant dense<0.000000e+00> : vector<16xf32>
    %62 = vector.multi_reduction <add>, %61, %cst_41 [1] : vector<16x128xf32> to vector<16xf32>
    %63 = vector.shape_cast %62 : vector<16xf32> to vector<16x1xf32>
    %cst_42 = arith.constant 1.280000e+02 : f32
    %64 = vector.broadcast %cst_42 : f32 to vector<16x1xf32>
    %65 = arith.divf %63, %64 : vector<16x1xf32>
    %cst_43 = arith.constant 9.99999974E-6 : f32
    %66 = vector.broadcast %cst_43 : f32 to vector<16x1xf32>
    %67 = arith.addf %65, %66 : vector<16x1xf32>
    %68 = math.rsqrt %67 : vector<16x1xf32>
    %69 = vector.broadcast %68 : vector<16x1xf32> to vector<16x128xf32>
    %70 = arith.mulf %60, %69 : vector<16x128xf32>
    %71 = vector.broadcast %52 : vector<1x128xf32> to vector<16x128xf32>
    %72 = arith.mulf %70, %71 : vector<16x128xf32>
    %73 = vector.broadcast %54 : vector<1x128xf32> to vector<16x128xf32>
    %74 = arith.addf %72, %73 : vector<16x128xf32>
    %c0_44 = arith.constant 0 : index
    %c0_45 = arith.constant 0 : index
    %c0_46 = arith.constant 0 : index
    %75 = vector.load %arg16[%c0_44, %c0_45, %c0_46] : memref<2x128x128xf32, #tpu.memory_space<vmem>>, vector<1x128x128xf32>
    %76 = vector.shape_cast %75 : vector<1x128x128xf32> to vector<128x128xf32>
    %cst_47 = arith.constant dense<0.000000e+00> : vector<16x128xf32>
    %77 = tpu.matmul %74, %76, %cst_47 {dimension_numbers = #tpu.dot_dimension_numbers<[1], [0], [0], [1], [0, 0, 1, 1], [], []>} : vector<16x128xf32>, vector<128x128xf32>, vector<16x128xf32> -> vector<16x128xf32>
    %c0_48 = arith.constant 0 : index
    %c0_49 = arith.constant 0 : index
    %c0_50 = arith.constant 0 : index
    %78 = vector.load %arg17[%c0_48, %c0_49, %c0_50] : memref<2x1x128xf32, #tpu.memory_space<vmem>>, vector<1x1x128xf32>
    %79 = vector.shape_cast %78 : vector<1x1x128xf32> to vector<1x128xf32>
    %80 = vector.broadcast %79 : vector<1x128xf32> to vector<16x128xf32>
    %81 = arith.addf %77, %80 : vector<16x128xf32>
    %cst_51 = arith.constant 0.000000e+00 : f32
    %82 = vector.broadcast %cst_51 : f32 to vector<16x128xf32>
    %83 = arith.maximumf %81, %82 : vector<16x128xf32>
    %c0_52 = arith.constant 0 : index
    %c0_53 = arith.constant 0 : index
    %c0_54 = arith.constant 0 : index
    %84 = vector.load %arg18[%c0_52, %c0_53, %c0_54] : memref<2x128x128xf32, #tpu.memory_space<vmem>>, vector<1x128x128xf32>
    %85 = vector.shape_cast %84 : vector<1x128x128xf32> to vector<128x128xf32>
    %cst_55 = arith.constant dense<0.000000e+00> : vector<16x128xf32>
    %86 = tpu.matmul %83, %85, %cst_55 {dimension_numbers = #tpu.dot_dimension_numbers<[1], [0], [0], [1], [0, 0, 1, 1], [], []>} : vector<16x128xf32>, vector<128x128xf32>, vector<16x128xf32> -> vector<16x128xf32>
    %c0_56 = arith.constant 0 : index
    %c0_57 = arith.constant 0 : index
    %c0_58 = arith.constant 0 : index
    %87 = vector.load %arg19[%c0_56, %c0_57, %c0_58] : memref<2x1x128xf32, #tpu.memory_space<vmem>>, vector<1x1x128xf32>
    %88 = vector.shape_cast %87 : vector<1x1x128xf32> to vector<1x128xf32>
    %89 = vector.broadcast %88 : vector<1x128xf32> to vector<16x128xf32>
    %90 = arith.addf %86, %89 : vector<16x128xf32>
    %91 = arith.addf %90, %74 : vector<16x128xf32>
    %c0_59 = arith.constant 0 : index
    %c0_60 = arith.constant 0 : index
    %c0_61 = arith.constant 0 : index
    %92 = vector.load %arg20[%c0_59, %c0_60, %c0_61] : memref<2x1x128xf32, #tpu.memory_space<vmem>>, vector<1x1x128xf32>
    %93 = vector.shape_cast %92 : vector<1x1x128xf32> to vector<1x128xf32>
    %c0_62 = arith.constant 0 : index
    %c0_63 = arith.constant 0 : index
    %c0_64 = arith.constant 0 : index
    %94 = vector.load %arg21[%c0_62, %c0_63, %c0_64] : memref<2x1x128xf32, #tpu.memory_space<vmem>>, vector<1x1x128xf32>
    %95 = vector.shape_cast %94 : vector<1x1x128xf32> to vector<1x128xf32>
    %cst_65 = arith.constant dense<0.000000e+00> : vector<16xf32>
    %96 = vector.multi_reduction <add>, %91, %cst_65 [1] : vector<16x128xf32> to vector<16xf32>
    %97 = vector.shape_cast %96 : vector<16xf32> to vector<16x1xf32>
    %cst_66 = arith.constant 1.280000e+02 : f32
    %98 = vector.broadcast %cst_66 : f32 to vector<16x1xf32>
    %99 = arith.divf %97, %98 : vector<16x1xf32>
    %100 = vector.broadcast %99 : vector<16x1xf32> to vector<16x128xf32>
    %101 = arith.subf %91, %100 : vector<16x128xf32>
    %102 = arith.mulf %101, %101 : vector<16x128xf32>
    %cst_67 = arith.constant dense<0.000000e+00> : vector<16xf32>
    %103 = vector.multi_reduction <add>, %102, %cst_67 [1] : vector<16x128xf32> to vector<16xf32>
    %104 = vector.shape_cast %103 : vector<16xf32> to vector<16x1xf32>
    %cst_68 = arith.constant 1.280000e+02 : f32
    %105 = vector.broadcast %cst_68 : f32 to vector<16x1xf32>
    %106 = arith.divf %104, %105 : vector<16x1xf32>
    %cst_69 = arith.constant 9.99999974E-6 : f32
    %107 = vector.broadcast %cst_69 : f32 to vector<16x1xf32>
    %108 = arith.addf %106, %107 : vector<16x1xf32>
    %109 = math.rsqrt %108 : vector<16x1xf32>
    %110 = vector.broadcast %109 : vector<16x1xf32> to vector<16x128xf32>
    %111 = arith.mulf %101, %110 : vector<16x128xf32>
    %112 = vector.broadcast %93 : vector<1x128xf32> to vector<16x128xf32>
    %113 = arith.mulf %111, %112 : vector<16x128xf32>
    %114 = vector.broadcast %95 : vector<1x128xf32> to vector<16x128xf32>
    %115 = arith.addf %113, %114 : vector<16x128xf32>
    %c0_70 = arith.constant 0 : index
    %c0_71 = arith.constant 0 : index
    %c0_72 = arith.constant 0 : index
    %116 = vector.load %arg10[%c0_70, %c0_71, %c0_72] : memref<1x128x128xf32, #tpu.memory_space<vmem>>, vector<1x128x128xf32>
    %117 = vector.shape_cast %116 : vector<1x128x128xf32> to vector<128x128xf32>
    %cst_73 = arith.constant dense<0.000000e+00> : vector<16x128xf32>
    %118 = tpu.matmul %115, %117, %cst_73 {dimension_numbers = #tpu.dot_dimension_numbers<[1], [0], [0], [1], [0, 0, 1, 1], [], []>} : vector<16x128xf32>, vector<128x128xf32>, vector<16x128xf32> -> vector<16x128xf32>
    %c0_74 = arith.constant 0 : index
    %c0_75 = arith.constant 0 : index
    %c0_76 = arith.constant 0 : index
    %119 = vector.load %arg11[%c0_74, %c0_75, %c0_76] : memref<1x1x128xf32, #tpu.memory_space<vmem>>, vector<1x1x128xf32>
    %120 = vector.shape_cast %119 : vector<1x1x128xf32> to vector<1x128xf32>
    %121 = vector.broadcast %120 : vector<1x128xf32> to vector<16x128xf32>
    %122 = arith.addf %118, %121 : vector<16x128xf32>
    %c1 = arith.constant 1 : index
    %c0_77 = arith.constant 0 : index
    %c0_78 = arith.constant 0 : index
    %123 = vector.load %arg12[%c1, %c0_77, %c0_78] : memref<2x128x128xf32, #tpu.memory_space<vmem>>, vector<1x128x128xf32>
    %124 = vector.shape_cast %123 : vector<1x128x128xf32> to vector<128x128xf32>
    %cst_79 = arith.constant dense<0.000000e+00> : vector<16x128xf32>
    %125 = tpu.matmul %122, %124, %cst_79 {dimension_numbers = #tpu.dot_dimension_numbers<[1], [0], [0], [1], [0, 0, 1, 1], [], []>} : vector<16x128xf32>, vector<128x128xf32>, vector<16x128xf32> -> vector<16x128xf32>
    %c1_80 = arith.constant 1 : index
    %c0_81 = arith.constant 0 : index
    %c0_82 = arith.constant 0 : index
    %126 = vector.load %arg13[%c1_80, %c0_81, %c0_82] : memref<2x1x128xf32, #tpu.memory_space<vmem>>, vector<1x1x128xf32>
    %127 = vector.shape_cast %126 : vector<1x1x128xf32> to vector<1x128xf32>
    %128 = vector.broadcast %127 : vector<1x128xf32> to vector<16x128xf32>
    %129 = arith.addf %125, %128 : vector<16x128xf32>
    %130 = arith.addf %129, %0 : vector<16x128xf32>
    %c1_83 = arith.constant 1 : index
    %c0_84 = arith.constant 0 : index
    %c0_85 = arith.constant 0 : index
    %131 = vector.load %arg14[%c1_83, %c0_84, %c0_85] : memref<2x1x128xf32, #tpu.memory_space<vmem>>, vector<1x1x128xf32>
    %132 = vector.shape_cast %131 : vector<1x1x128xf32> to vector<1x128xf32>
    %c1_86 = arith.constant 1 : index
    %c0_87 = arith.constant 0 : index
    %c0_88 = arith.constant 0 : index
    %133 = vector.load %arg15[%c1_86, %c0_87, %c0_88] : memref<2x1x128xf32, #tpu.memory_space<vmem>>, vector<1x1x128xf32>
    %134 = vector.shape_cast %133 : vector<1x1x128xf32> to vector<1x128xf32>
    %cst_89 = arith.constant dense<0.000000e+00> : vector<16xf32>
    %135 = vector.multi_reduction <add>, %130, %cst_89 [1] : vector<16x128xf32> to vector<16xf32>
    %136 = vector.shape_cast %135 : vector<16xf32> to vector<16x1xf32>
    %cst_90 = arith.constant 1.280000e+02 : f32
    %137 = vector.broadcast %cst_90 : f32 to vector<16x1xf32>
    %138 = arith.divf %136, %137 : vector<16x1xf32>
    %139 = vector.broadcast %138 : vector<16x1xf32> to vector<16x128xf32>
    %140 = arith.subf %130, %139 : vector<16x128xf32>
    %141 = arith.mulf %140, %140 : vector<16x128xf32>
    %cst_91 = arith.constant dense<0.000000e+00> : vector<16xf32>
    %142 = vector.multi_reduction <add>, %141, %cst_91 [1] : vector<16x128xf32> to vector<16xf32>
    %143 = vector.shape_cast %142 : vector<16xf32> to vector<16x1xf32>
    %cst_92 = arith.constant 1.280000e+02 : f32
    %144 = vector.broadcast %cst_92 : f32 to vector<16x1xf32>
    %145 = arith.divf %143, %144 : vector<16x1xf32>
    %cst_93 = arith.constant 9.99999974E-6 : f32
    %146 = vector.broadcast %cst_93 : f32 to vector<16x1xf32>
    %147 = arith.addf %145, %146 : vector<16x1xf32>
    %148 = math.rsqrt %147 : vector<16x1xf32>
    %149 = vector.broadcast %148 : vector<16x1xf32> to vector<16x128xf32>
    %150 = arith.mulf %140, %149 : vector<16x128xf32>
    %151 = vector.broadcast %132 : vector<1x128xf32> to vector<16x128xf32>
    %152 = arith.mulf %150, %151 : vector<16x128xf32>
    %153 = vector.broadcast %134 : vector<1x128xf32> to vector<16x128xf32>
    %154 = arith.addf %152, %153 : vector<16x128xf32>
    %c1_94 = arith.constant 1 : index
    %c0_95 = arith.constant 0 : index
    %c0_96 = arith.constant 0 : index
    %155 = vector.load %arg16[%c1_94, %c0_95, %c0_96] : memref<2x128x128xf32, #tpu.memory_space<vmem>>, vector<1x128x128xf32>
    %156 = vector.shape_cast %155 : vector<1x128x128xf32> to vector<128x128xf32>
    %cst_97 = arith.constant dense<0.000000e+00> : vector<16x128xf32>
    %157 = tpu.matmul %154, %156, %cst_97 {dimension_numbers = #tpu.dot_dimension_numbers<[1], [0], [0], [1], [0, 0, 1, 1], [], []>} : vector<16x128xf32>, vector<128x128xf32>, vector<16x128xf32> -> vector<16x128xf32>
    %c1_98 = arith.constant 1 : index
    %c0_99 = arith.constant 0 : index
    %c0_100 = arith.constant 0 : index
    %158 = vector.load %arg17[%c1_98, %c0_99, %c0_100] : memref<2x1x128xf32, #tpu.memory_space<vmem>>, vector<1x1x128xf32>
    %159 = vector.shape_cast %158 : vector<1x1x128xf32> to vector<1x128xf32>
    %160 = vector.broadcast %159 : vector<1x128xf32> to vector<16x128xf32>
    %161 = arith.addf %157, %160 : vector<16x128xf32>
    %cst_101 = arith.constant 0.000000e+00 : f32
    %162 = vector.broadcast %cst_101 : f32 to vector<16x128xf32>
    %163 = arith.maximumf %161, %162 : vector<16x128xf32>
    %c1_102 = arith.constant 1 : index
    %c0_103 = arith.constant 0 : index
    %c0_104 = arith.constant 0 : index
    %164 = vector.load %arg18[%c1_102, %c0_103, %c0_104] : memref<2x128x128xf32, #tpu.memory_space<vmem>>, vector<1x128x128xf32>
    %165 = vector.shape_cast %164 : vector<1x128x128xf32> to vector<128x128xf32>
    %cst_105 = arith.constant dense<0.000000e+00> : vector<16x128xf32>
    %166 = tpu.matmul %163, %165, %cst_105 {dimension_numbers = #tpu.dot_dimension_numbers<[1], [0], [0], [1], [0, 0, 1, 1], [], []>} : vector<16x128xf32>, vector<128x128xf32>, vector<16x128xf32> -> vector<16x128xf32>
    %c1_106 = arith.constant 1 : index
    %c0_107 = arith.constant 0 : index
    %c0_108 = arith.constant 0 : index
    %167 = vector.load %arg19[%c1_106, %c0_107, %c0_108] : memref<2x1x128xf32, #tpu.memory_space<vmem>>, vector<1x1x128xf32>
    %168 = vector.shape_cast %167 : vector<1x1x128xf32> to vector<1x128xf32>
    %169 = vector.broadcast %168 : vector<1x128xf32> to vector<16x128xf32>
    %170 = arith.addf %166, %169 : vector<16x128xf32>
    %171 = arith.addf %170, %154 : vector<16x128xf32>
    %c1_109 = arith.constant 1 : index
    %c0_110 = arith.constant 0 : index
    %c0_111 = arith.constant 0 : index
    %172 = vector.load %arg20[%c1_109, %c0_110, %c0_111] : memref<2x1x128xf32, #tpu.memory_space<vmem>>, vector<1x1x128xf32>
    %173 = vector.shape_cast %172 : vector<1x1x128xf32> to vector<1x128xf32>
    %c1_112 = arith.constant 1 : index
    %c0_113 = arith.constant 0 : index
    %c0_114 = arith.constant 0 : index
    %174 = vector.load %arg21[%c1_112, %c0_113, %c0_114] : memref<2x1x128xf32, #tpu.memory_space<vmem>>, vector<1x1x128xf32>
    %175 = vector.shape_cast %174 : vector<1x1x128xf32> to vector<1x128xf32>
    %cst_115 = arith.constant dense<0.000000e+00> : vector<16xf32>
    %176 = vector.multi_reduction <add>, %171, %cst_115 [1] : vector<16x128xf32> to vector<16xf32>
    %177 = vector.shape_cast %176 : vector<16xf32> to vector<16x1xf32>
    %cst_116 = arith.constant 1.280000e+02 : f32
    %178 = vector.broadcast %cst_116 : f32 to vector<16x1xf32>
    %179 = arith.divf %177, %178 : vector<16x1xf32>
    %180 = vector.broadcast %179 : vector<16x1xf32> to vector<16x128xf32>
    %181 = arith.subf %171, %180 : vector<16x128xf32>
    %182 = arith.mulf %181, %181 : vector<16x128xf32>
    %cst_117 = arith.constant dense<0.000000e+00> : vector<16xf32>
    %183 = vector.multi_reduction <add>, %182, %cst_117 [1] : vector<16x128xf32> to vector<16xf32>
    %184 = vector.shape_cast %183 : vector<16xf32> to vector<16x1xf32>
    %cst_118 = arith.constant 1.280000e+02 : f32
    %185 = vector.broadcast %cst_118 : f32 to vector<16x1xf32>
    %186 = arith.divf %184, %185 : vector<16x1xf32>
    %cst_119 = arith.constant 9.99999974E-6 : f32
    %187 = vector.broadcast %cst_119 : f32 to vector<16x1xf32>
    %188 = arith.addf %186, %187 : vector<16x1xf32>
    %189 = math.rsqrt %188 : vector<16x1xf32>
    %190 = vector.broadcast %189 : vector<16x1xf32> to vector<16x128xf32>
    %191 = arith.mulf %181, %190 : vector<16x128xf32>
    %192 = vector.broadcast %173 : vector<1x128xf32> to vector<16x128xf32>
    %193 = arith.mulf %191, %192 : vector<16x128xf32>
    %194 = vector.broadcast %175 : vector<1x128xf32> to vector<16x128xf32>
    %195 = arith.addf %193, %194 : vector<16x128xf32>
    %c0_120 = arith.constant 0 : index
    %c0_121 = arith.constant 0 : index
    %196 = vector.load %arg22[%c0_120, %c0_121] : memref<16x128xf32, #tpu.memory_space<vmem>>, vector<16x128xf32>
    tpu.vector_store %arg22[%c0_120, %c0_121], %195 {strides = array<i32>} : memref<16x128xf32, #tpu.memory_space<vmem>>, vector<16x128xf32>,
    return
  }
  func.func @transform_0(%arg0: i32) -> (i32, i32) {
    %c0_i32 = arith.constant 0 : i32
    %c0_i32_0 = arith.constant 0 : i32
    return %arg0, %c0_i32 : i32, i32
  }
  func.func @transform_1(%arg0: i32) -> (i32, i32, i32) {
    %c0_i32 = arith.constant 0 : i32
    %c0_i32_0 = arith.constant 0 : i32
    %c0_i32_1 = arith.constant 0 : i32
    return %arg0, %c0_i32, %c0_i32_0 : i32, i32, i32
  }
  func.func @transform_2(%arg0: i32) -> (i32, i32, i32) {
    %c0_i32 = arith.constant 0 : i32
    %c0_i32_0 = arith.constant 0 : i32
    %c0_i32_1 = arith.constant 0 : i32
    return %arg0, %c0_i32, %c0_i32_0 : i32, i32, i32
  }
  func.func @transform_3(%arg0: i32) -> (i32, i32) {
    %c0_i32 = arith.constant 0 : i32
    %c0_i32_0 = arith.constant 0 : i32
    %c0_i32_1 = arith.constant 0 : i32
    return %c0_i32, %c0_i32_0 : i32, i32
  }
  func.func @transform_4(%arg0: i32) -> (i32, i32) {
    %c0_i32 = arith.constant 0 : i32
    %c0_i32_0 = arith.constant 0 : i32
    %c0_i32_1 = arith.constant 0 : i32
    return %c0_i32, %c0_i32_0 : i32, i32
  }
  func.func @transform_5(%arg0: i32) -> (i32, i32) {
    %c0_i32 = arith.constant 0 : i32
    %c0_i32_0 = arith.constant 0 : i32
    %c0_i32_1 = arith.constant 0 : i32
    return %c0_i32, %c0_i32_0 : i32, i32
  }
  func.func @transform_6(%arg0: i32) -> (i32, i32) {
    %c0_i32 = arith.constant 0 : i32
    %c0_i32_0 = arith.constant 0 : i32
    %c0_i32_1 = arith.constant 0 : i32
    return %c0_i32, %c0_i32_0 : i32, i32
  }
  func.func @transform_7(%arg0: i32) -> (i32, i32) {
    %c0_i32 = arith.constant 0 : i32
    %c0_i32_0 = arith.constant 0 : i32
    %c0_i32_1 = arith.constant 0 : i32
    return %c0_i32, %c0_i32_0 : i32, i32
  }
  func.func @transform_8(%arg0: i32) -> (i32, i32) {
    %c0_i32 = arith.constant 0 : i32
    %c0_i32_0 = arith.constant 0 : i32
    %c0_i32_1 = arith.constant 0 : i32
    return %c0_i32, %c0_i32_0 : i32, i32
  }
  func.func @transform_9(%arg0: i32) -> (i32, i32, i32) {
    %c0_i32 = arith.constant 0 : i32
    %c0_i32_0 = arith.constant 0 : i32
    %c0_i32_1 = arith.constant 0 : i32
    %c0_i32_2 = arith.constant 0 : i32
    return %c0_i32, %c0_i32_0, %c0_i32_1 : i32, i32, i32
  }
  func.func @transform_10(%arg0: i32) -> (i32, i32, i32) {
    %c0_i32 = arith.constant 0 : i32
    %c0_i32_0 = arith.constant 0 : i32
    %c0_i32_1 = arith.constant 0 : i32
    %c0_i32_2 = arith.constant 0 : i32
    return %c0_i32, %c0_i32_0, %c0_i32_1 : i32, i32, i32
  }
  func.func @transform_11(%arg0: i32) -> (i32, i32, i32) {
    %c0_i32 = arith.constant 0 : i32
    %c0_i32_0 = arith.constant 0 : i32
    %c0_i32_1 = arith.constant 0 : i32
    %c0_i32_2 = arith.constant 0 : i32
    return %c0_i32, %c0_i32_0, %c0_i32_1 : i32, i32, i32
  }
  func.func @transform_12(%arg0: i32) -> (i32, i32, i32) {
    %c0_i32 = arith.constant 0 : i32
    %c0_i32_0 = arith.constant 0 : i32
    %c0_i32_1 = arith.constant 0 : i32
    %c0_i32_2 = arith.constant 0 : i32
    return %c0_i32, %c0_i32_0, %c0_i32_1 : i32, i32, i32
  }
  func.func @transform_13(%arg0: i32) -> (i32, i32, i32) {
    %c0_i32 = arith.constant 0 : i32
    %c0_i32_0 = arith.constant 0 : i32
    %c0_i32_1 = arith.constant 0 : i32
    %c0_i32_2 = arith.constant 0 : i32
    return %c0_i32, %c0_i32_0, %c0_i32_1 : i32, i32, i32
  }
  func.func @transform_14(%arg0: i32) -> (i32, i32, i32) {
    %c0_i32 = arith.constant 0 : i32
    %c0_i32_0 = arith.constant 0 : i32
    %c0_i32_1 = arith.constant 0 : i32
    %c0_i32_2 = arith.constant 0 : i32
    return %c0_i32, %c0_i32_0, %c0_i32_1 : i32, i32, i32
  }
  func.func @transform_15(%arg0: i32) -> (i32, i32, i32) {
    %c0_i32 = arith.constant 0 : i32
    %c0_i32_0 = arith.constant 0 : i32
    %c0_i32_1 = arith.constant 0 : i32
    %c0_i32_2 = arith.constant 0 : i32
    return %c0_i32, %c0_i32_0, %c0_i32_1 : i32, i32, i32
  }
  func.func @transform_16(%arg0: i32) -> (i32, i32, i32) {
    %c0_i32 = arith.constant 0 : i32
    %c0_i32_0 = arith.constant 0 : i32
    %c0_i32_1 = arith.constant 0 : i32
    %c0_i32_2 = arith.constant 0 : i32
    return %c0_i32, %c0_i32_0, %c0_i32_1 : i32, i32, i32
  }
  func.func @transform_17(%arg0: i32) -> (i32, i32, i32) {
    %c0_i32 = arith.constant 0 : i32
    %c0_i32_0 = arith.constant 0 : i32
    %c0_i32_1 = arith.constant 0 : i32
    %c0_i32_2 = arith.constant 0 : i32
    return %c0_i32, %c0_i32_0, %c0_i32_1 : i32, i32, i32
  }
  func.func @transform_18(%arg0: i32) -> (i32, i32, i32) {
    %c0_i32 = arith.constant 0 : i32
    %c0_i32_0 = arith.constant 0 : i32
    %c0_i32_1 = arith.constant 0 : i32
    %c0_i32_2 = arith.constant 0 : i32
    return %c0_i32, %c0_i32_0, %c0_i32_1 : i32, i32, i32
  }
  func.func @transform_19(%arg0: i32) -> (i32, i32, i32) {
    %c0_i32 = arith.constant 0 : i32
    %c0_i32_0 = arith.constant 0 : i32
    %c0_i32_1 = arith.constant 0 : i32
    %c0_i32_2 = arith.constant 0 : i32
    return %c0_i32, %c0_i32_0, %c0_i32_1 : i32, i32, i32
  }
  func.func @transform_20(%arg0: i32) -> (i32, i32, i32) {
    %c0_i32 = arith.constant 0 : i32
    %c0_i32_0 = arith.constant 0 : i32
    %c0_i32_1 = arith.constant 0 : i32
    %c0_i32_2 = arith.constant 0 : i32
    return %c0_i32, %c0_i32_0, %c0_i32_1 : i32, i32, i32
  }
  func.func @transform_21(%arg0: i32) -> (i32, i32) {
    %c0_i32 = arith.constant 0 : i32
    %c0_i32_0 = arith.constant 0 : i32
    return %arg0, %c0_i32 : i32, i32
  }
}

</mosaic_0001>

<bundles_post_ra>
// kernel: tpu_custom_call.1
= control target key start
LH: loop header
LB: loop body
LE: loop exit
PB: predicated region body
PF: predicated region fallthrough
CT: control target
= control target key end

     0   :  { %s5880_s0 = inlined_call_operand.hbm [shape: f32[64,128], index: 0, kind: input, shape index: {}]   ;;  %s5881_s1 = inlined_call_operand.hbm [shape: f32[64,8,128], index: 1, kind: input, shape index: {}]   ;;  %s5882_s2 = inlined_call_operand.hbm [shape: f32[64,8,128], index: 2, kind: input, shape index: {}]   ;;  %s5883_s3 = inlined_call_operand.vmem [shape: f32[128,128], index: 3, kind: input, shape index: {}]   ;;  %s5884_s4 = inlined_call_operand.hbm [shape: f32[1,128], index: 4, kind: input, shape index: {}]   ;;  %s5885_s5 = inlined_call_operand.hbm [shape: f32[128,256], index: 5, kind: input, shape index: {}]   ;;  %s5886_s6 = inlined_call_operand.vmem [shape: f32[1,256], index: 6, kind: input, shape index: {}]   ;;  %s5887_s7 = inlined_call_operand.vmem [shape: f32[128,4], index: 7, kind: input, shape index: {}]   ;;  %s5888_s8 = inlined_call_operand.vmem [shape: f32[4,128], index: 8, kind: input, shape index: {}]   ;;  %s5889_s9 = inlined_call_operand.hbm [shape: f32[1,128,128], index: 9, kind: input, shape index: {}]   ;;  %s5890_s10 = inlined_call_operand.vmem [shape: f32[1,1,128], index: 10, kind: input, shape index: {}]   ;;  %s5891_s11 = inlined_call_operand.hbm [shape: f32[2,128,128], index: 11, kind: input, shape index: {}]   ;;  %s5892_s12 = inlined_call_operand.vmem [shape: f32[2,1,128], index: 12, kind: input, shape index: {}]   ;;  %s5893_s13 = inlined_call_operand.vmem [shape: f32[2,1,128], index: 13, kind: input, shape index: {}]   ;;  %s5894_s14 = inlined_call_operand.vmem [shape: f32[2,1,128], index: 14, kind: input, shape index: {}]   ;;  %s5895_s15 = inlined_call_operand.hbm [shape: f32[2,128,128], index: 15, kind: input, shape index: {}]   ;;  %s5896_s16 = inlined_call_operand.vmem [shape: f32[2,1,128], index: 16, kind: input, shape index: {}]   ;;  %s5897_s17 = inlined_call_operand.hbm [shape: f32[2,128,128], index: 17, kind: input, shape index: {}]   ;;  %s5898_s18 = inlined_call_operand.vmem [shape: f32[2,1,128], index: 18, kind: input, shape index: {}]   ;;  %s5899_s19 = inlined_call_operand.vmem [shape: f32[2,1,128], index: 19, kind: input, shape index: {}]   ;;  %s5900_s20 = inlined_call_operand.vmem [shape: f32[2,1,128], index: 20, kind: input, shape index: {}]   ;;  %s5901_s21 = inlined_call_operand.hbm [shape: f32[64,128], index: 21, kind: output, shape index: {}]  }
   0x1   :  { %5948 = sst [smem:[#allocation33_spill]] %s5880_s0 }
   0x2   :  { %5949 = sst [smem:[#allocation34_spill]] %s5881_s1 }
   0x3   :  { %5950 = sst [smem:[#allocation35_spill]] %s5882_s2 }
   0x4   :  { %5951 = sst [smem:[#allocation36_spill]] %s5883_s3 }
   0x5   :  { %5952 = sst [smem:[#allocation37_spill]] %s5884_s4 }
   0x6   :  { %5953 = sst [smem:[#allocation38_spill]] %s5885_s5 }
   0x7   :  { %5954 = sst [smem:[#allocation39_spill]] %s5886_s6 }
   0x8   :  { %5955 = sst [smem:[#allocation40_spill]] %s5887_s7 }
   0x9   :  { %5956 = sst [smem:[#allocation41_spill]] %s5888_s8 }
   0xa   :  { %5957 = sst [smem:[#allocation42_spill]] %s5889_s9 }
   0xb   :  { %5958 = sst [smem:[#allocation43_spill]] %s5890_s10 }
   0xc   :  { %5959 = sst [smem:[#allocation44_spill]] %s5892_s12 }
   0xd   :  { %5960 = sst [smem:[#allocation45_spill]] %s5893_s13 }
   0xe   :  { %5961 = sst [smem:[#allocation46_spill]] %s5894_s14 }
   0xf   :  { %5962 = sst [smem:[#allocation47_spill]] %s5895_s15 }
  0x10   :  { %5963 = sst [smem:[#allocation48_spill]] %s5896_s16 }
  0x11   :  { %5964 = sst [smem:[#allocation49_spill]] %s5898_s18 }
  0x12   :  { %5965 = sst [smem:[#allocation50_spill]] %s5899_s19 }
  0x13   :  { %5966 = sst [smem:[#allocation51_spill]] %s5900_s20 }
  0x14   :  { %5967 = sst [smem:[#allocation52_spill]] %s5901_s21 }
  0x15   :  { %26 = vsyncpa [#allocation3], 0 }
  0x16   :  { %28 = vsyncpa [#allocation3 + $0x1], 0 }
  0x17   :  { %29 = vsyncpa [#allocation6], 0 }
  0x18   :  { %31 = vsyncpa [#allocation6 + $0x1], 0 }
  0x19   :  { %32 = vsyncpa [#allocation9], 0 }
  0x1a   :  { %33 = vsyncpa [#allocation12], 0 }
  0x1b   :  { %34 = vsyncpa [#allocation15], 0 }
  0x1c   :  { %35 = vsyncpa [#allocation4], 0 }
  0x1d   :  { %37 = vsyncpa [#allocation4 + $0x1], 0  ;;  %s4909_s2 = smov 0   ;;  %s4911_s25 = smov 0  }
  0x1e   :  { %s4913_s26 = smov 0   ;;  %s4915_s27 = smov 0  }
  0x1f LB: > { %5968 = sst [smem:[#allocation24_spill]] %s4767_s2  ;;  %s4781_s3 = smov [#allocation8]   ;;  %s4779_s27 = sphi %s4915_s27, %s6034_s27   ;;  %s4775_s26 = sphi %s4913_s26, %s6036_s26   ;;  %s4771_s25 = sphi %s4911_s25, %s6038_s25   ;;  %s4767_s2 = sphi %s4909_s2, %s6037_s2  }
  0x20   : > { %5969 = sst [smem:[#allocation25_spill]] %s4775_s26  ;;  %s546_s28 = sshll.u32 %s4781_s3, 4  ;;  %s547_s28 = int_to_ptr.vmem [resolvable:$true] %s546_s28 }
  0x21   : > { %s4930_s29 = sadd.s32 4294967295, %s4779_s27   ;;  %p3280_p0 = scmp.ge.s32.totalorder %s4779_s27, 1 }
  0x22   : > { %5970 = sst [smem:[#allocation26_spill]] %s4930_s29  ;;  %p5911_p1 = scmp.eq.s32.totalorder %s4930_s29, 0 }
  0x23   : > { %p530_p2 = scmp.lt.s32.totalorder %s4779_s27, 5  ;;  %s4782_s4 = smov [#allocation11]  }
  0x24   : > { %s578_s30 = sshll.u32 %s4782_s4, 4  ;;  %s4783_s22 = smov [#allocation14]   ;;  %s4941_s30 = int_to_ptr.vmem [resolvable:$true] %s578_s30 }
  0x25   : > { %p4935_p3 = pnand %p3280_p0, %p530_p2  ;;  %s616_s23 = sshll.u32 %s4783_s22, 4  ;;  %s4949_s23 = int_to_ptr.vmem [resolvable:$true] %s616_s23 }
  0x26   : > { %s5973_s3 = sld [smem:[#allocation37_spill]] }
  0x27   : > { %s5971_s0 = scalar_select %p4935_p3, 1, 0 }
  0x28   : > { %p4264_p4 = pneg %p4935_p3 }
  0x2a   : > { %p4945_p5 = pnand %p4264_p4, %p5911_p1 }
  0x2c   : > { %s5972_s5 = scalar_select %p4945_p5, 1, 0 }
  0x2d   : > { %s4439_s21 = scalar_lea.hbm %s5973_s3, 16  ;;  %p4959_p7 = pneg %p4945_p5 }
  0x2e   : > { %p4440_p6 = scmp.ne.s32.totalorder %s5973_s3, %s4439_s21  ;;  %p4446_p10 = scmp.lt.u32.totalorder %s4439_s21, %s5973_s3 }
  0x2f   : > { %s5974_s4 = scalar_select %p4959_p7, 1, 0 }
  0x30   : > { %p4442_p8 = pnand %p4959_p7, %p4440_p6 }
  0x32   : > { %p4443_p9 = pneg %p4442_p8 }
  0x34   : > { %p4448_p11 = pnand %p4446_p10, %p4443_p9 }
  0x36   : > { %4451 = shalt.err (!%p4448_p11)
}
  0x37   : > { %s4452_s1 = scalar_lea.vmem %s547_s28, 16  ;;  %s4459_s10 = scalar_lea.vmem %s547_s28, 32 }
  0x38   : > { %p4453_p12 = scmp.ne.s32.totalorder %s547_s28, %s4452_s1  ;;  %p4460_p2 = scmp.lt.s32.totalorder %s547_s28, %s547_s28 }
  0x39   : > { %p4461_p4 = scmp.lt.s32.totalorder %s4459_s10, %s4452_s1 }
  0x3a   : > { %p4455_p13 = pnand %p4453_p12, %p4959_p7 }
  0x3b   : > { %p4462_p1 = por %p4461_p4, %p4460_p2 }
  0x3c   : > { %p4456_p0 = pneg %p4455_p13 }
  0x3e   : > { %p4463_p3 = pnand %p4462_p1, %p4456_p0 }
  0x40   : > { %4466 = shalt.err (!%p4463_p3)
}
  0x41   : > { %4267 = dma.hbm_to_vmem [thread:$0]  (!%p4945_p5), %s5973_s3, 16, %s547_s28, [#allocation9]  }
  0x42   : > { %s5975_s9 = sld [smem:[#allocation42_spill]] }
  0x48   : > { %s4467_s22 = scalar_lea.hbm %s5975_s9, 2048 }
  0x49   : > { %p4468_p6 = scmp.ne.s32.totalorder %s5975_s9, %s4467_s22  ;;  %p4474_p1 = scmp.lt.u32.totalorder %s4467_s22, %s5975_s9 }
  0x4b   : > { %p4470_p8 = pnand %p4468_p6, %p4959_p7 }
  0x4d   : > { %p4471_p9 = pneg %p4470_p8 }
  0x4f   : > { %p4476_p3 = pnand %p4474_p1, %p4471_p9 }
  0x51   : > { %4479 = shalt.err (!%p4476_p3)
}
  0x52   : > { %s4480_s28 = scalar_lea.vmem %s4941_s30, 2048  ;;  %p4488_p13 = scmp.lt.s32.totalorder %s4941_s30, %s4941_s30 }
  0x53   : > { %p4481_p10 = scmp.ne.s32.totalorder %s4941_s30, %s4480_s28  ;;  %p4489_p0 = scmp.lt.s32.totalorder %s4480_s28, %s4480_s28 }
  0x55   : > { %p4483_p11 = pnand %p4481_p10, %p4959_p7  ;;  %p4490_p2 = por %p4489_p0, %p4488_p13 }
  0x57   : > { %p4484_p12 = pneg %p4483_p11 }
  0x59   : > { %p4491_p4 = pnand %p4490_p2, %p4484_p12 }
  0x5b   : > { %4494 = shalt.err (!%p4491_p4)
}
  0x5c   : > { %s5916_s16 = smov 128   ;;  %s5918_s18 = smov 8  }
  0x5d   : > { %4273 = dma.hbm_to_vmem [thread:$0]  (!%p4945_p5), %s5975_s9, 2048, %s4941_s30, [#allocation12], %s5916_s16, %s5916_s16, %s5918_s18  }
  0x5e   : > { %s5976_s15 = sld [smem:[#allocation47_spill]] }
  0x64   : > { %s4495_s22 = scalar_lea.hbm %s5976_s15, 4096 }
  0x65   : > { %p4496_p6 = scmp.ne.s32.totalorder %s5976_s15, %s4495_s22  ;;  %p4502_p1 = scmp.lt.u32.totalorder %s4495_s22, %s5976_s15 }
  0x67   : > { %p4498_p8 = pnand %p4496_p6, %p4959_p7 }
  0x69   : > { %p4499_p9 = pneg %p4498_p8 }
  0x6b   : > { %p4504_p3 = pnand %p4502_p1, %p4499_p9 }
  0x6d   : > { %4507 = shalt.err (!%p4504_p3)
}
  0x6e   : > { %s4508_s30 = scalar_lea.vmem %s4949_s23, 4096  ;;  %p4516_p13 = scmp.lt.s32.totalorder %s4949_s23, %s4949_s23 }
  0x6f   : > { %p4509_p10 = scmp.ne.s32.totalorder %s4949_s23, %s4508_s30  ;;  %p4517_p0 = scmp.lt.s32.totalorder %s4508_s30, %s4508_s30 }
  0x71   : > { %p4511_p11 = pnand %p4509_p10, %p4959_p7  ;;  %p4518_p2 = por %p4517_p0, %p4516_p13 }
  0x73   : > { %p4512_p12 = pneg %p4511_p11 }
  0x75   : > { %p4519_p4 = pnand %p4518_p2, %p4512_p12 }
  0x77   : > { %4522 = shalt.err (!%p4519_p4)
}
  0x78   : > { %4279 = dma.hbm_to_vmem [thread:$0]  (!%p4945_p5), %s5976_s15, 4096, %s4949_s23, [#allocation15], %s5916_s16, %s5916_s16, %s5918_s18  }
  0x79   : > { %s3279_s24 = sadd.s32 4294967294, %s4779_s27   ;;  %s5029_s19 = sadd.s32 1, %s4779_s27  }
  0x7a   : > { %5977 = sst [smem:[#allocation27_spill]] %s5029_s19  ;;  %s50_s21 = sadd.s32 1, %s4775_s26 }
  0x7b   : > { %s47_s22 = ssub.s32 %s4779_s27, %s5029_s19  ;;  %p57_p6 = scmp.ne.s32.totalorder %s4775_s26, %s4771_s25 }
  0x7c   : > { %p48_p8 = scmp.eq.s32.totalorder %s47_s22, 0  ;;  %p58_p9 = scmp.eq.s32.totalorder %s4779_s27, 0 }
  0x7d   : > { %p63_p1 = scmp.ne.s32.totalorder %s4771_s25, %s4767_s2  ;;  %p517_p3 = scmp.eq.s32.totalorder %s4930_s29, 3 }
  0x7e   : > { %s5041_s1 = scalar_select %p48_p8, %s4775_s26, %s50_s21  }
  0x7f   : > { %p59_p10 = por %p58_p9, %p57_p6  ;;  %p5979_p11 = scmp.eq.s32.totalorder %s4930_s29, 0 }
  0x80   : > { %5978 = sst [smem:[#allocation28_spill]] %s5041_s1  ;;  %p5049_p13 = por %p517_p3, %p57_p6 }
  0x81   : > { %p5045_p12 = por %p5979_p11, %p63_p1  ;;  %p523_p0 = scmp.eq.s32.totalorder %s3279_s24, 3 }
  0x82   : > { %s5982_s10 = scalar_select %p5049_p13, 1, 0 }
  0x83   : > { %s5980_s23 = scalar_select %p5045_p12, 1, 0 }
  0x84   : > { %5983 = sst [smem:[#allocation30_spill]] %s5982_s10  ;;  %p4303_p2 = scmp.lt.s32.totalorder %s4779_s27, 4 }
  0x85   : > { %5981 = sst [smem:[#allocation29_spill]] %s5980_s23  ;;  %s5055_s28 = sand.u32 1, %s4775_s26  }
  0x86   : > { %p5057_p4 = por %p523_p0, %p63_p1  ;;  %s676_s3 = sand.u32 1, %s4779_s27  }
  0x87   : > { %p5062_p8 = pnand %p4303_p2, %p59_p10  ;;  %s5924_s21 = sshll.u32 %s5055_s28, 7 }
  0x88   : > { %s5984_s30 = scalar_select %p5057_p4, 1, 0 }
  0x89   : > { %s5986_s20 = scalar_select %p5062_p8, 1, 0 }
  0x8a   : > { %5985 = sst [smem:[#allocation31_spill]] %s5984_s30  ;;  %s5925_s22 = sshll.u32 %s4779_s27, 11 }
  0x8b   : > { %s5987_s18 = sld [smem:[#allocation34_spill]]  ;;  %s680_s15 = scalar_lea.vmem [#allocation5], %s5924_s21 }
  0x8c   : > { %s687_s1 = sshll.u32 %s680_s15, 4  ;;  %s5079_s26 = scalar_lea.sflag [#allocation6], %s676_s3  ;;  %s5077_s1 = int_to_ptr.vmem [resolvable:$true] %s687_s1 }
  0x8d   : > { %p5085_p9 = pneg %p5062_p8 }
  0x8f   : > { %s5988_s30 = scalar_select %p5085_p9, 1, 0 }
  0x91   : > { %s5073_s9 = scalar_lea.hbm %s5987_s18, %s5925_s22  ;;  %s4528_s21 = scalar_lea.hbm %s5987_s18, 8192 }
  0x92   : > { %s4523_s19 = scalar_lea.hbm %s5073_s9, 2048  ;;  %p4529_p10 = scmp.lt.u32.totalorder %s5073_s9, %s5987_s18 }
  0x93   : > { %p4524_p6 = scmp.ne.s32.totalorder %s5073_s9, %s4523_s19  ;;  %p4530_p11 = scmp.lt.u32.totalorder %s4528_s21, %s4523_s19 }
  0x94   : > { %p4532_p2 = scmp.lt.u32.totalorder %s4523_s19, %s5073_s9 }
  0x95   : > { %p4526_p1 = pnand %p5085_p9, %p4524_p6  ;;  %p4531_p0 = por %p4530_p11, %p4529_p10 }
  0x97   : > { %p4527_p3 = pneg %p4526_p1  ;;  %p4533_p4 = por %p4532_p2, %p4531_p0 }
  0x99   : > { %p4534_p13 = pnand %p4533_p4, %p4527_p3 }
  0x9b   : > { %4537 = shalt.err (!%p4534_p13)
}
  0x9c   : > { %s4538_s3 = scalar_lea.vmem %s5077_s1, 2048  ;;  %s4786_s16 = smov [#allocation5]  }
  0x9d   : > { %p4539_p6 = scmp.ne.s32.totalorder %s5077_s1, %s4538_s3  ;;  %s4543_s24 = sshll.u32 %s4786_s16, 4  ;;  %s4544_s24 = int_to_ptr.vmem [resolvable:$false] %s4543_s24 }
  0x9e   : > { %s4545_s22 = scalar_lea.vmem %s4544_s24, 4096  ;;  %p4546_p5 = scmp.lt.s32.totalorder %s5077_s1, %s4544_s24 }
  0x9f   : > { %p4541_p1 = pnand %p4539_p6, %p5085_p9  ;;  %p4547_p7 = scmp.lt.s32.totalorder %s4545_s22, %s4538_s3 }
  0xa1   : > { %p4542_p12 = pneg %p4541_p1  ;;  %p4548_p10 = por %p4547_p7, %p4546_p5 }
  0xa3   : > { %p4549_p11 = pnand %p4548_p10, %p4542_p12 }
  0xa5   : > { %4552 = shalt.err (!%p4549_p11)
}
  0xa6   : > { %s5989_s19 = smov 8   ;;  %s5990_s21 = smov 128  }
  0xa7   : > { %4289 = dma.hbm_to_vmem [thread:$0]  (!%p5062_p8), %s5073_s9, 2048, %s5077_s1, %s5079_s26, %s5990_s21, %s5990_s21, %s5989_s19  }
  0xa8   : > { %s5991_s15 = sshll.u32 %s4779_s27, 11  ;;  %s5992_s24 = sld [smem:[#allocation35_spill]] }
  0xa9   : > { %s5993_s22 = sshll.u32 %s5055_s28, 7  ;;  %s4787_s14 = smov [#allocation10]  }
  0xaa   : > { %s701_s2 = scalar_lea.vmem [#allocation7], %s5993_s22  ;;  %s556_s13 = sshll.u32 %s4787_s14, 4  ;;  %s557_s13 = int_to_ptr.vmem [resolvable:$true] %s556_s13 }
  0xab   : > { %s708_s10 = sshll.u32 %s701_s2, 4  ;;  %s5994_s6 = sld [smem:[#allocation38_spill]]  ;;  %s5121_s10 = int_to_ptr.vmem [resolvable:$true] %s708_s10 }
  0xac   : > { %p5995_p7 = scmp.ne.s32.totalorder %s5974_s4, 0 }
  0xae   : > { %s5117_s3 = scalar_lea.hbm %s5992_s24, %s5991_s15 }
  0xb1   : > { %s4553_s7 = scalar_lea.hbm %s5994_s6, 4096 }
  0xb2   : > { %p4554_p5 = scmp.ne.s32.totalorder %s5994_s6, %s4553_s7  ;;  %p4560_p4 = scmp.lt.u32.totalorder %s4553_s7, %s5994_s6 }
  0xb4   : > { %p4556_p12 = pnand %p4554_p5, %p5995_p7 }
  0xb6   : > { %p4557_p13 = pneg %p4556_p12 }
  0xb8   : > { %p4562_p3 = pnand %p4560_p4, %p4557_p13 }
  0xba   : > { %4565 = shalt.err (!%p4562_p3)
}
  0xbb   : > { %s4566_s2 = scalar_lea.vmem %s557_s13, 4096  ;;  %p4574_p1 = scmp.lt.s32.totalorder %s557_s13, %s557_s13 }
  0xbc   : > { %p4567_p0 = scmp.ne.s32.totalorder %s557_s13, %s4566_s2  ;;  %p4575_p10 = scmp.lt.s32.totalorder %s4566_s2, %s4566_s2 }
  0xbe   : > { %p4569_p2 = pnand %p4567_p0, %p5995_p7  ;;  %p4576_p11 = por %p4575_p10, %p4574_p1 }
  0xc0   : > { %p4570_p6 = pneg %p4569_p2 }
  0xc2   : > { %p4577_p8 = pnand %p4576_p11, %p4570_p6 }
  0xc4   : > { %4580 = shalt.err (!%p4577_p8)
}
  0xc5   : > { %s4788_s8 = smov 256   ;;  %s4789_s12 = smov 16  }
  0xc6   : > { %p5996_p5 = scmp.ne.s32.totalorder %s5972_s5, 0  ;;  %s4790_s29 = smov [#allocation13]  }
  0xc7   : > { %s594_s15 = sshll.u32 %s4790_s29, 4  ;;  %s4791_s16 = smov [#allocation16]   ;;  %s595_s15 = int_to_ptr.vmem [resolvable:$true] %s594_s15 }
  0xc8   : > { %4270 = dma.hbm_to_vmem [thread:$0]  (!%p5996_p5), %s5994_s6, 4096, %s557_s13, [#allocation9], %s4788_s8, %s4788_s8, %s4789_s12  }
  0xc9   : > { %s632_s22 = sshll.u32 %s4791_s16, 4  ;;  %s4581_s1 = scalar_lea.hbm %s5891_s11, 4096  ;;  %s5141_s22 = int_to_ptr.vmem [resolvable:$true] %s632_s22 }
  0xca   : > { %p4582_p8 = scmp.ne.s32.totalorder %s5891_s11, %s4581_s1  ;;  %p4588_p4 = scmp.lt.u32.totalorder %s4581_s1, %s5891_s11 }
  0xcc   : > { %p4584_p12 = pnand %p4582_p8, %p5995_p7 }
  0xce   : > { %p4585_p13 = pneg %p4584_p12 }
  0xd0   : > { %p4590_p3 = pnand %p4588_p4, %p4585_p13 }
  0xd2   : > { %4593 = shalt.err (!%p4590_p3)
}
  0xd3   : > { %s4594_s8 = scalar_lea.vmem %s595_s15, 4096  ;;  %p4602_p1 = scmp.lt.s32.totalorder %s595_s15, %s595_s15 }
  0xd4   : > { %p4595_p0 = scmp.ne.s32.totalorder %s595_s15, %s4594_s8  ;;  %p4603_p10 = scmp.lt.s32.totalorder %s4594_s8, %s4594_s8 }
  0xd6   : > { %p4597_p2 = pnand %p4595_p0, %p5995_p7  ;;  %p4604_p11 = por %p4603_p10, %p4602_p1 }
  0xd8   : > { %p4598_p6 = pneg %p4597_p2 }
  0xda   : > { %p4605_p9 = pnand %p4604_p11, %p4598_p6 }
  0xdc   : > { %4608 = shalt.err (!%p4605_p9)
}
  0xdd   : > { %4276 = dma.hbm_to_vmem [thread:$0]  (!%p5996_p5), %s5891_s11, 4096, %s595_s15, [#allocation12], %s5990_s21, %s5990_s21, %s5989_s19  }
  0xde   : > { %s4609_s16 = scalar_lea.hbm %s5897_s17, 4096 }
  0xdf   : > { %p4610_p8 = scmp.ne.s32.totalorder %s5897_s17, %s4609_s16  ;;  %p4616_p13 = scmp.lt.u32.totalorder %s4609_s16, %s5897_s17 }
  0xe1   : > { %p4612_p9 = pnand %p4610_p8, %p5995_p7 }
  0xe3   : > { %p4613_p12 = pneg %p4612_p9 }
  0xe5   : > { %p4618_p4 = pnand %p4616_p13, %p4613_p12 }
  0xe7   : > { %4621 = shalt.err (!%p4618_p4)
}
  0xe8   : > { %s4622_s15 = scalar_lea.vmem %s5141_s22, 4096  ;;  %p4630_p6 = scmp.lt.s32.totalorder %s5141_s22, %s5141_s22 }
  0xe9   : > { %p4623_p3 = scmp.ne.s32.totalorder %s5141_s22, %s4622_s15  ;;  %p4631_p1 = scmp.lt.s32.totalorder %s4622_s15, %s4622_s15 }
  0xeb   : > { %p4625_p0 = pnand %p4623_p3, %p5995_p7  ;;  %p4632_p10 = por %p4631_p1, %p4630_p6 }
  0xed   : > { %p4626_p2 = pneg %p4625_p0 }
  0xef   : > { %p4633_p11 = pnand %p4632_p10, %p4626_p2 }
  0xf1   : > { %4636 = shalt.err (!%p4633_p11)
}
  0xf2   : > { %4282 = dma.hbm_to_vmem [thread:$0]  (!%p5996_p5), %s5897_s17, 4096, %s5141_s22, [#allocation15], %s5990_s21, %s5990_s21, %s5989_s19  }
  0xf3   : > { %s3288_s4 = sshll.u32 %s5055_s28, 4  ;;  %s3353_s8 = sshll.u32 %s4779_s27, 8 }
  0xf4   : > { %s5997_s7 = sld [smem:[#allocation33_spill]]  ;;  %s659_s5 = scalar_lea.vmem [#allocation2], %s3288_s4 }
  0xf5   : > { %s666_s16 = sshll.u32 %s659_s5, 4  ;;  %s656_s9 = scalar_lea.sflag [#allocation3], %s5055_s28  ;;  %s5197_s16 = int_to_ptr.vmem [resolvable:$true] %s666_s16 }
  0xf6   : > { %p5998_p8 = scmp.ne.s32.totalorder %s5988_s30, 0 }
  0xfa   : > { %s5195_s29 = scalar_lea.hbm %s5997_s7, %s3353_s8  ;;  %s4642_s2 = scalar_lea.hbm %s5997_s7, 1024 }
  0xfb   : > { %s4637_s18 = scalar_lea.hbm %s5195_s29, 256  ;;  %p4643_p12 = scmp.lt.u32.totalorder %s5195_s29, %s5997_s7 }
  0xfc   : > { %p4638_p7 = scmp.ne.s32.totalorder %s5195_s29, %s4637_s18  ;;  %p4644_p13 = scmp.lt.u32.totalorder %s4642_s2, %s4637_s18 }
  0xfd   : > { %p4646_p3 = scmp.lt.u32.totalorder %s4637_s18, %s5195_s29 }
  0xfe   : > { %p4640_p5 = pnand %p4638_p7, %p5998_p8  ;;  %p4645_p4 = por %p4644_p13, %p4643_p12 }
 0x100   : > { %p4641_p9 = pneg %p4640_p5  ;;  %p4647_p0 = por %p4646_p3, %p4645_p4 }
 0x102   : > { %p4648_p2 = pnand %p4647_p0, %p4641_p9 }
 0x104   : > { %4651 = shalt.err (!%p4648_p2)
}
 0x105   : > { %s4652_s13 = scalar_lea.vmem %s5197_s16, 256  ;;  %s4792_s4 = smov [#allocation2]  }
 0x106   : > { %p4653_p6 = scmp.ne.s32.totalorder %s5197_s16, %s4652_s13  ;;  %s4657_s8 = sshll.u32 %s4792_s4, 4  ;;  %s4658_s8 = int_to_ptr.vmem [resolvable:$false] %s4657_s8 }
 0x107   : > { %s4659_s23 = scalar_lea.vmem %s4658_s8, 512  ;;  %p4660_p11 = scmp.lt.s32.totalorder %s5197_s16, %s4658_s8 }
 0x108   : > { %p4655_p1 = pnand %p4653_p6, %p5998_p8  ;;  %p4661_p7 = scmp.lt.s32.totalorder %s4659_s23, %s4652_s13 }
 0x10a   : > { %p4656_p10 = pneg %p4655_p1  ;;  %p4662_p5 = por %p4661_p7, %p4660_p11 }
 0x10c   : > { %p4663_p12 = pnand %p4662_p5, %p4656_p10 }
 0x10e   : > { %4666 = shalt.err (!%p4663_p12)
}
 0x10f   : > { %p5999_p9 = scmp.ne.s32.totalorder %s5986_s20, 0  ;;  %s4667_s12 = scalar_lea.hbm %s5117_s3, 2048 }
 0x110   : > { %p4668_p13 = scmp.ne.s32.totalorder %s5117_s3, %s4667_s12  ;;  %s4672_s22 = scalar_lea.hbm %s5992_s24, 8192 }
 0x111   : > { %4286 = dma.hbm_to_vmem [thread:$0]  (!%p5999_p9), %s5195_s29, 256, %s5197_s16, %s656_s9, %s5990_s21, %s5990_s21, %s5989_s19  }
 0x112   : > { %p4670_p4 = pnand %p4668_p13, %p5998_p8  ;;  %p4673_p0 = scmp.lt.u32.totalorder %s5117_s3, %s5992_s24 }
 0x113   : > { %p4674_p2 = scmp.lt.u32.totalorder %s4672_s22, %s4667_s12  ;;  %p4676_p1 = scmp.lt.u32.totalorder %s4667_s12, %s5117_s3 }
 0x114   : > { %p4671_p3 = pneg %p4670_p4 }
 0x115   : > { %p4675_p6 = por %p4674_p2, %p4673_p0 }
 0x117   : > { %p4677_p10 = por %p4676_p1, %p4675_p6 }
 0x119   : > { %p4678_p11 = pnand %p4677_p10, %p4671_p3 }
 0x11b   : > { %4681 = shalt.err (!%p4678_p11)
}
 0x11c   : > { %s4682_s28 = scalar_lea.vmem %s5121_s10, 2048  ;;  %s4793_s29 = smov [#allocation7]  }
 0x11d   : > { %p4683_p7 = scmp.ne.s32.totalorder %s5121_s10, %s4682_s28  ;;  %s4687_s16 = sshll.u32 %s4793_s29, 4  ;;  %s4688_s16 = int_to_ptr.vmem [resolvable:$false] %s4687_s16 }
 0x11e   : > { %s4689_s9 = scalar_lea.vmem %s4688_s16, 4096  ;;  %p4690_p13 = scmp.lt.s32.totalorder %s5121_s10, %s4688_s16 }
 0x11f   : > { %p4685_p5 = pnand %p4683_p7, %p5998_p8  ;;  %p4691_p4 = scmp.lt.s32.totalorder %s4689_s9, %s4682_s28 }
 0x121   : > { %p4686_p12 = pneg %p4685_p5  ;;  %p4692_p0 = por %p4691_p4, %p4690_p13 }
 0x123   : > { %p4693_p2 = pnand %p4692_p0, %p4686_p12 }
 0x125   : > { %4696 = shalt.err (!%p4693_p2)
}
 0x126   : > { %4292 = dma.hbm_to_vmem [thread:$0]  (!%p5999_p9), %s5117_s3, 2048, %s5121_s10, %s5079_s26, %s5990_s21, %s5990_s21, %s5989_s19  }
 0x127   : > { %p6000_p8 = scmp.ne.s32.totalorder %s5971_s0, 0 }
 0x129   : > { %720 = sbr.rel (%p6000_p8) target bundleno = 3937 (0xf61), region = 104 }
 0x130   : > { %s6001_s30 = sld [smem:[#allocation29_spill]]  ;;  %s5254_s15 = sand.u32 1, %s4771_s25  }
 0x131   : > { %s3298_s14 = sshll.u32 %s5254_s15, 4  ;;  %s723_s13 = scalar_lea.sflag [#allocation3], %s5254_s15 }
 0x132   : > { %s5260_s20 = scalar_lea.vmem [#allocation2], %s3298_s14 }
 0x136   : > { %p6002_p3 = scmp.ne.s32.totalorder %s6001_s30, 0 }
 0x138   : > { %4742 = dma.done.wait (%p6002_p3), %s723_s13, 256  }
 0x139   : > { %4744 = vsyncadd (%p6002_p3), %s723_s13, 4294967040  ;;  %s6003_s26 = sld [smem:[#allocation26_spill]]  ;;  %s3299_s10 = sshll.u32 %s5254_s15, 7 }
 0x13a   : > { %s5268_s21 = scalar_lea.vmem [#allocation5], %s3299_s10 }
 0x13f   : > { %s731_s0 = sand.u32 1, %s6003_s26  }
 0x140   : > { %s732_s19 = scalar_lea.sflag [#allocation6], %s731_s0 }
 0x141   : > { %4746 = dma.done.wait (%p6002_p3), %s732_s19, 4096  }
 0x142   : > { %4748 = vsyncadd (%p6002_p3), %s732_s19, 4294963200  ;;  %s5274_s3 = scalar_lea.vmem [#allocation7], %s3299_s10  ;;  %p6004_p9 = scmp.eq.s32.totalorder %s6003_s26, 0 }
 0x144   : > { %4750 = dma.done.wait (%p6004_p9), [#allocation9], 4112   ;;  %p6005_p6 = pmov %p6004_p9 }
 0x146   : > { %4752 = vsyncadd (%p6005_p6), [#allocation9], 4294963184  ;;  %p6006_p1 = pmov %p6005_p6 }
 0x148   : > { %4754 = dma.done.wait (%p6006_p1), [#allocation12], 6144   ;;  %p6007_p10 = pmov %p6006_p1 }
 0x149   : > { %p6008_p11 = pmov %p6006_p1 }
 0x14a   : > { %4756 = vsyncadd (%p6007_p10), [#allocation12], 4294961152 }
 0x14b   : > { %4758 = dma.done.wait (%p6008_p11), [#allocation15], 8192   ;;  %p6009_p7 = pmov %p6006_p1 }
 0x14c   : > { %v4794_v0 = vmov 0.0   ;;  %s6010_s23 = sld [smem:[#allocation36_spill]]  ;;  %v990_v3 = vld [vmem:[#allocation10 + $0x8] sm:$0xff]  ;;  %v992_v5 = vld [vmem:[#allocation10 + $0x18] sm:$0xff]  ;;  %v989_v6 = vld [vmem:[#allocation10] sm:$0xff]  ;;  %s6011_s4 = sld [smem:[#allocation40_spill]] }
 0x14d   : > { %4760 = vsyncadd (%p6009_p7), [#allocation15], 4294959104  ;;  %1097 = vmatprep.mubr.f32.mxu1 %v4794_v0  ;;  %v991_v7 = vld [vmem:[#allocation10 + $0x10] sm:$0xff]  ;;  %v3944_v8 = vpack.c.bf16 %v992_v5, %v990_v3  ;;  %v994_v12 = vld [vmem:[#allocation10 + $0x28] sm:$0xff]  ;;  %s6012_s22 = sld [smem:[#allocation39_spill]]  ;;  %s6014_s12 = sld [smem:[#allocation41_spill]] }
 0x14e   : > { %v3946_v9 = vpack.c.bf16 %v991_v7, %v989_v6  ;;  %v996_v14 = vld [vmem:[#allocation10 + $0x38] sm:$0xff]  ;;  %v993_v15 = vld [vmem:[#allocation10 + $0x20] sm:$0xff]  ;;  %v995_v16 = vld [vmem:[#allocation10 + $0x30] sm:$0xff]  ;;  %vm1921_vm0 = vcmask 1043456   ;;  %vm1567_vm1 = vcmask 31744   ;;  %vm2221_vm2 = vcmask 1041409  }
 0x14f   : > { %3945 = vmatprep.subr.bf16.mxu1 %v3944_v8  ;;  %v3948_v17 = vpack.c.bf16 %v996_v14, %v994_v12  ;;  %v998_v20 = vld [vmem:[#allocation10 + $0x48] sm:$0xff]  ;;  %v3950_v21 = vpack.c.bf16 %v995_v16, %v993_v15  ;;  %v1000_v23 = vld [vmem:[#allocation10 + $0x58] sm:$0xff]  ;;  %v997_v24 = vld [vmem:[#allocation10 + $0x40] sm:$0xff]  ;;  %vm2223_vm3 = vcmask 1042434   ;;  %vm2225_vm4 = vcmask 1043459   ;;  %s6020_s2 = sld [smem:[#allocation45_spill]] }
 0x150   : > { %3947 = vmatpush1.bf16.msra.mxu1 %v3946_v9  ;;  %v3952_v25 = vpack.c.bf16 %v1000_v23, %v998_v20  ;;  %v999_v26 = vld [vmem:[#allocation10 + $0x50] sm:$0xff]  ;;  %v1002_v29 = vld [vmem:[#allocation10 + $0x68] sm:$0xff]  ;;  %v1004_v30 = vld [vmem:[#allocation10 + $0x78] sm:$0xff]  ;;  %vm2227_vm5 = vcmask 1044484   ;;  %vm2229_vm6 = vcmask 1045509   ;;  %vm2231_vm7 = vcmask 1046534  }
 0x151   : > { %3949 = vmatprep.subr.bf16.mxu1 %v3948_v17  ;;  %v3954_v31 = vpack.c.bf16 %v999_v26, %v997_v24  ;;  %v1001_v33 = vld [vmem:[#allocation10 + $0x60] sm:$0xff]  ;;  %v3956_v34 = vpack.c.bf16 %v1004_v30, %v1002_v29  ;;  %v1003_v35 = vld [vmem:[#allocation10 + $0x70] sm:$0xff]  ;;  %v1006_v38 = vld [vmem:[#allocation10 + $0x88] sm:$0xff]  ;;  %vm2233_vm8 = vcmask 1047559   ;;  %s6023_s30 = sld [smem:[#allocation48_spill]]  ;;  %s6024_s10 = sld [smem:[#allocation49_spill]] }
 0x152   : > { %v891_v1 = vld [vmem:[%s6010_s23] sm:$0xff]  ;;  %v892_v2 = vld [vmem:[%s6010_s23 + $0x8] sm:$0xff]  ;;  %v893_v10 = vld [vmem:[%s6010_s23 + $0x10] sm:$0xff]  ;;  %v3958_v40 = vpack.c.bf16 %v1003_v35, %v1001_v33  ;;  %s6027_s29 = sld [smem:[#allocation43_spill]]  ;;  %s3356_s13 = sshll.u32 %s6003_s26, 8 }
 0x153   : > { %v3912_v4 = vpack.c.bf16 %v892_v2, %v891_v1  ;;  %v894_v11 = vld [vmem:[%s6010_s23 + $0x18] sm:$0xff]  ;;  %v895_v18 = vld [vmem:[%s6010_s23 + $0x20] sm:$0xff]  ;;  %v896_v19 = vld [vmem:[%s6010_s23 + $0x28] sm:$0xff]  ;;  %s6028_s9 = sld [smem:[#allocation30_spill]]  ;;  %s836_s0 = scalar_lea.vmem [#allocation17], %s3298_s14 }
 0x154   : > { %v3916_v13 = vpack.c.bf16 %v894_v11, %v893_v10  ;;  %v3920_v22 = vpack.c.bf16 %v896_v19, %v895_v18  ;;  %v897_v27 = vld [vmem:[%s6010_s23 + $0x30] sm:$0xff]  ;;  %v898_v28 = vld [vmem:[%s6010_s23 + $0x38] sm:$0xff]  ;;  %3951 = vmatpush1.bf16.msra.mxu1 %v3950_v21  ;;  %v899_v36 = vld [vmem:[%s6010_s23 + $0x40] sm:$0xff]  ;;  %s3106_s19 = sshll.u32 %s836_s0, 4  ;;  %s6029_s18 = sld [smem:[#allocation52_spill]]  ;;  %s5837_s19 = int_to_ptr.vmem [resolvable:$true] %s3106_s19 }
 0x155   : > { %3913 = vmatprep.subr.bf16.mxu0 %v3912_v4  ;;  %v3924_v32 = vpack.c.bf16 %v898_v28, %v897_v27  ;;  %3953 = vmatprep.subr.bf16.mxu1 %v3952_v25  ;;  %v900_v37 = vld [vmem:[%s6010_s23 + $0x48] sm:$0xff]  ;;  %v1008_v39 = vld [vmem:[#allocation10 + $0x98] sm:$0xff]  ;;  %v1007_v44 = vld [vmem:[#allocation10 + $0x90] sm:$0xff]  ;;  %s6021_s28 = smov %s6020_s2  ;;  %s3093_s26 = scalar_lea.sflag [#allocation4], %s5254_s15 }
 0x156   : > { %3915 = vmatpush3.bf16.msra.mxu0 %v3912_v4  ;;  %v3928_v41 = vpack.c.bf16 %v900_v37, %v899_v36  ;;  %v1005_v42 = vld [vmem:[#allocation10 + $0x80] sm:$0xff]  ;;  %v3960_v43 = vpack.c.bf16 %v1008_v39, %v1006_v38  ;;  %v901_v45 = vld [vmem:[%s6010_s23 + $0x50] sm:$0xff]  ;;  %v902_v46 = vld [vmem:[%s6010_s23 + $0x58] sm:$0xff]  ;;  %s4796_s14 = smov [#allocation17]  }
 0x157   : > { %3917 = vmatprep.subr.bf16.mxu0 %v3916_v13  ;;  %v1010_v47 = vld [vmem:[#allocation10 + $0xa8] sm:$0xff]  ;;  %v1012_v48 = vld [vmem:[#allocation10 + $0xb8] sm:$0xff]  ;;  %v3962_v50 = vpack.c.bf16 %v1007_v44, %v1005_v42  ;;  %v3932_v51 = vpack.c.bf16 %v902_v46, %v901_v45  ;;  %v1009_v52 = vld [vmem:[#allocation10 + $0xa0] sm:$0xff] }
 0x158   : > { %3955 = vmatpush1.bf16.msra.mxu1 %v3954_v31  ;;  %v841_v49 = vld [vmem:[%s5260_s20] sm:$0xff]  ;;  %v3964_v53 = vpack.c.bf16 %v1012_v48, %v1010_v47  ;;  %v904_v56 = vld [vmem:[%s6010_s23 + $0x68] sm:$0xff]  ;;  %v906_v2 = vld [vmem:[%s6010_s23 + $0x78] sm:$0xff] }
 0x159   : > { %3957 = vmatprep.subr.bf16.mxu1 %v3956_v34  ;;  %v1011_v54 = vld [vmem:[#allocation10 + $0xb0] sm:$0xff]  ;;  %v903_v55 = vld [vmem:[%s6010_s23 + $0x60] sm:$0xff]  ;;  %3582 = vmatprep.mubr.f32.mxu0 %v841_v49  ;;  %v1014_v57 = vld [vmem:[#allocation10 + $0xc8] sm:$0xff]  ;;  %p6030_p12 = scmp.ne.s32.totalorder %s6028_s9, 0 }
 0x15a   : > { %3919 = vmatpush3.bf16.msra.mxu0 %v3916_v13  ;;  %v1016_v58 = vld [vmem:[#allocation10 + $0xd8] sm:$0xff]  ;;  %v3966_v59 = vpack.c.bf16 %v1011_v54, %v1009_v52  ;;  %v3936_v60 = vpack.c.bf16 %v904_v56, %v903_v55  ;;  %v1013_v61 = vld [vmem:[#allocation10 + $0xc0] sm:$0xff]  ;;  %v1015_v63 = vld [vmem:[#allocation10 + $0xd0] sm:$0xff]  ;;  %s5835_s1 = scalar_lea.hbm %s6029_s18, %s3356_s13 }
 0x15b   : > { %3921 = vmatprep.subr.bf16.mxu0 %v3920_v22  ;;  %v3968_v62 = vpack.c.bf16 %v1016_v58, %v1014_v57  ;;  %v905_v1 = vld [vmem:[%s6010_s23 + $0x70] sm:$0xff]  ;;  %v1020_v4 = vld [vmem:[#allocation10 + $0xf8] sm:$0xff]  ;;  %v3970_v5 = vpack.c.bf16 %v1015_v63, %v1013_v61  ;;  %v1017_v8 = vld [vmem:[#allocation10 + $0xe0] sm:$0xff] }
 0x15c   : > { %3959 = vmatpush1.bf16.msra.mxu1 %v3958_v40  ;;  %v1018_v3 = vld [vmem:[#allocation10 + $0xe8] sm:$0xff]  ;;  %v3940_v6 = vpack.c.bf16 %v906_v2, %v905_v1  ;;  %v1019_v9 = vld [vmem:[#allocation10 + $0xf0] sm:$0xff]  ;;  %v1390_v10 = vld [vmem:[%s6011_s4] sm:$0xff] }
 0x15d   : > { %3961 = vmatprep.subr.bf16.mxu1 %v3960_v43  ;;  %v3972_v7 = vpack.c.bf16 %v1020_v4, %v1018_v3  ;;  %v1391_v11 = vld [vmem:[%s6011_s4 + $0x8] sm:$0xff]  ;;  %v3974_v12 = vpack.c.bf16 %v1019_v9, %v1017_v8  ;;  %v843_v13 = vld [vmem:[%s5268_s21] sm:$0xff]  ;;  %v1392_v16 = vld [vmem:[%s6011_s4 + $0x10] sm:$0xff] }
 0x15e   : > { %3923 = vmatpush3.bf16.msra.mxu0 %v3920_v22  ;;  %v859_v14 = vld [vmem:[%s5274_s3] sm:$0xff]  ;;  %v3976_v15 = vpack.c.bf16 %v1391_v11, %v1390_v10  ;;  %v1393_v17 = vld [vmem:[%s6011_s4 + $0x18] sm:$0xff]  ;;  %v844_v20 = vld [vmem:[%s5268_s21 + $0x8] sm:$0xff] }
 0x15f   : > { %3925 = vmatprep.subr.bf16.mxu0 %v3924_v32  ;;  %v842_v18 = vld [vmem:[%s5260_s20 + $0x8] sm:$0xff]  ;;  %v875_v19 = vmul.f32 %v859_v14, %v843_v13  ;;  %v3980_v22 = vpack.c.bf16 %v1393_v17, %v1392_v16  ;;  %v1394_v23 = vld [vmem:[%s6011_s4 + $0x20] sm:$0xff]  ;;  %v845_v26 = vld [vmem:[%s5268_s21 + $0x10] sm:$0xff] }
 0x160   : > { %3963 = vmatpush1.bf16.msra.mxu1 %v3962_v50  ;;  %v860_v21 = vld [vmem:[%s5274_s3 + $0x8] sm:$0xff]  ;;  %v861_v27 = vld [vmem:[%s5274_s3 + $0x10] sm:$0xff]  ;;  %v1397_v30 = vld [vmem:[%s6011_s4 + $0x38] sm:$0xff] }
 0x161   : > { %3965 = vmatprep.subr.bf16.mxu1 %v3964_v53  ;;  %v1395_v24 = vld [vmem:[%s6011_s4 + $0x28] sm:$0xff]  ;;  %v876_v25 = vmul.f32 %v860_v21, %v844_v20  ;;  %v1396_v29 = vld [vmem:[%s6011_s4 + $0x30] sm:$0xff]  ;;  %v877_v31 = vmul.f32 %v861_v27, %v845_v26  ;;  %v862_v33 = vld [vmem:[%s5274_s3 + $0x18] sm:$0xff] }
 0x162   : > { %3927 = vmatpush3.bf16.msra.mxu0 %v3924_v32  ;;  %v3984_v28 = vpack.c.bf16 %v1395_v24, %v1394_v23  ;;  %v846_v32 = vld [vmem:[%s5268_s21 + $0x18] sm:$0xff]  ;;  %v3988_v34 = vpack.c.bf16 %v1397_v30, %v1396_v29  ;;  %v1398_v35 = vld [vmem:[%s6011_s4 + $0x40] sm:$0xff]  ;;  %v1399_v36 = vld [vmem:[%s6011_s4 + $0x48] sm:$0xff] }
 0x163   : > { %3929 = vmatprep.subr.bf16.mxu0 %v3928_v41  ;;  %v878_v37 = vmul.f32 %v862_v33, %v846_v32  ;;  %v847_v38 = vld [vmem:[%s5268_s21 + $0x20] sm:$0xff]  ;;  %v3992_v40 = vpack.c.bf16 %v1399_v36, %v1398_v35  ;;  %v848_v42 = vld [vmem:[%s5268_s21 + $0x28] sm:$0xff]  ;;  %v849_v45 = vld [vmem:[%s5268_s21 + $0x30] sm:$0xff] }
 0x164   : > { %3967 = vmatpush1.bf16.msra.mxu1 %v3966_v59  ;;  %v863_v39 = vld [vmem:[%s5274_s3 + $0x20] sm:$0xff]  ;;  %v864_v43 = vld [vmem:[%s5274_s3 + $0x28] sm:$0xff]  ;;  %v865_v46 = vld [vmem:[%s5274_s3 + $0x30] sm:$0xff] }
 0x165   : > { %3969 = vmatprep.subr.bf16.mxu1 %v3968_v62  ;;  %v880_v44 = vmul.f32 %v864_v43, %v848_v42  ;;  %v881_v47 = vmul.f32 %v865_v46, %v849_v45  ;;  %v850_v48 = vld [vmem:[%s5268_s21 + $0x38] sm:$0xff]  ;;  %v867_v52 = vld [vmem:[%s5274_s3 + $0x40] sm:$0xff]  ;;  %v852_v54 = vld [vmem:[%s5268_s21 + $0x48] sm:$0xff] }
 0x166   : > { %3931 = vmatpush3.bf16.msra.mxu0 %v3928_v41  ;;  %v879_v41 = vmul.f32 %v863_v39, %v847_v38  ;;  %v866_v49 = vld [vmem:[%s5274_s3 + $0x38] sm:$0xff]  ;;  %v868_v55 = vld [vmem:[%s5274_s3 + $0x48] sm:$0xff]  ;;  %v853_v57 = vld [vmem:[%s5268_s21 + $0x50] sm:$0xff] }
 0x167   : > { %3933 = vmatprep.subr.bf16.mxu0 %v3932_v51  ;;  %v882_v50 = vmul.f32 %v866_v49, %v850_v48  ;;  %v884_v56 = vmul.f32 %v868_v55, %v852_v54  ;;  %v869_v58 = vld [vmem:[%s5274_s3 + $0x50] sm:$0xff]  ;;  %v870_v61 = vld [vmem:[%s5274_s3 + $0x58] sm:$0xff]  ;;  %v855_v63 = vld [vmem:[%s5268_s21 + $0x60] sm:$0xff] }
 0x168   : > { %3971 = vmatpush1.bf16.msra.mxu1 %v3970_v5  ;;  %v885_v59 = vmul.f32 %v869_v58, %v853_v57  ;;  %v871_v1 = vld [vmem:[%s5274_s3 + $0x60] sm:$0xff]  ;;  %v856_v3 = vld [vmem:[%s5268_s21 + $0x68] sm:$0xff]  ;;  %v858_v9 = vld [vmem:[%s5268_s21 + $0x78] sm:$0xff] }
 0x169   : > { %3973 = vmatprep.subr.bf16.mxu1 %v3972_v7  ;;  %v887_v2 = vmul.f32 %v871_v1, %v855_v63  ;;  %v872_v4 = vld [vmem:[%s5274_s3 + $0x68] sm:$0xff]  ;;  %v873_v7 = vld [vmem:[%s5274_s3 + $0x70] sm:$0xff]  ;;  %v874_v10 = vld [vmem:[%s5274_s3 + $0x78] sm:$0xff]  ;;  %s6022_s3 = sld [smem:[#allocation46_spill]] }
 0x16a   : > { %3935 = vmatpush3.bf16.msra.mxu0 %v3932_v51  ;;  %v851_v51 = vld [vmem:[%s5268_s21 + $0x40] sm:$0xff]  ;;  %v888_v5 = vmul.f32 %v872_v4, %v856_v3  ;;  %v890_v11 = vmul.f32 %v874_v10, %v858_v9  ;;  %v1400_v16 = vld [vmem:[%s6011_s4 + $0x50] sm:$0xff]  ;;  %v1401_v17 = vld [vmem:[%s6011_s4 + $0x58] sm:$0xff] }
 0x16b   : > { %3937 = vmatprep.subr.bf16.mxu0 %v3936_v60  ;;  %v883_v53 = vmul.f32 %v867_v52, %v851_v51  ;;  %v1021_v14 = vld [vmem:[%s6012_s22] sm:$0x3]  ;;  %v1403_v20 = vld [vmem:[%s6011_s4 + $0x68] sm:$0xff]  ;;  %v1405_v23 = vld [vmem:[%s6011_s4 + $0x78] sm:$0xff]  ;;  %s6019_s22 = sld [smem:[#allocation44_spill]] }
 0x16c   : > { %3975 = vmatpush1.bf16.msra.mxu1 %v3974_v12  ;;  %v1023_v12 = vlaneseq }
 0x16e   : > { %3939 = vmatpush3.bf16.msra.mxu0 %v3936_v60  ;;  %v854_v60 = vld [vmem:[%s5268_s21 + $0x58] sm:$0xff]  ;;  %v1024_v13 = vshrl.u32 %v1023_v12, 7 }
 0x16f   : > { %3941 = vmatprep.subr.bf16.mxu0 %v3940_v6  ;;  %1098 = vmatmul.mubr.f32.vlgmr.msra.gmra.mrb[0].mxu1 %v875_v19  ;;  %v886_v62 = vmul.f32 %v870_v61, %v854_v60  ;;  %v3996_v19 = vpack.c.bf16 %v1401_v17, %v1400_v16 }
 0x170   : > { %1103 = vmatprep.mubr.f32.mxu1 %v4794_v0 }
 0x172   : > { %3943 = vmatpush3.bf16.msra.mxu0 %v3940_v6  ;;  %v857_v6 = vld [vmem:[%s5268_s21 + $0x70] sm:$0xff] }
 0x173   : > { %3977 = vmatprep.subr.bf16.mxu0 %v3976_v15  ;;  %1104 = vmatmul.mubr.f32.gmra.mrb[2].mxu1 %v876_v25  ;;  %v889_v8 = vmul.f32 %v873_v7, %v857_v6  ;;  %v4795_v25 = vmov 1966171168  }
 0x174   : > { %1109 = vmatprep.mubr.f32.mxu1 %v4794_v0  ;;  %v1198_v26 = vunpack.c.l.s4 %v4795_v25 }
 0x175   : > { %3583 = vmatmul.mubr.f32.vlgmr.msra.gmra.mrb[0].mxu0 %v842_v18 }
 0x176   : > { %3979 = vmatpush3.bf16.msra.mxu0 %v3976_v15  ;;  %v1029_v15 = vsub.s32 1, %v1024_v13  ;;  %v1199_v27 = vunpack.c.0.s8 %v1198_v26 }
 0x177   : > { %3981 = vmatprep.subr.bf16.mxu0 %v3980_v22  ;;  %1110 = vmatmul.mubr.f32.gmra.mrb[4].mxu1 %v877_v31  ;;  %v5441_v31 = vsub.s32 0, %v1024_v13 }
 0x178   : > { %1115 = vmatprep.mubr.f32.mxu1 %v4794_v0  ;;  %v5425_v18 = vrot.slane %v1021_v14, %v1029_v15  ;;  %v5439_v30 = vsub.s32 %v1199_v27, %v1024_v13 }
 0x179   : > { %v5448_v39 = vrot.slane %v1021_v14, %v5441_v31 }
 0x17a   : > { %3983 = vmatpush3.bf16.msra.mxu0 %v3980_v22  ;;  %v1404_v22 = vld [vmem:[%s6011_s4 + $0x70] sm:$0xff] }
 0x17b   : > { %3985 = vmatprep.subr.bf16.mxu0 %v3984_v28  ;;  %1116 = vmatmul.mubr.f32.gmra.mrb[6].mxu1 %v878_v37  ;;  %v4004_v24 = vpack.c.bf16 %v1405_v23, %v1404_v22 }
 0x17c   : > { %1121 = vmatprep.mubr.f32.mxu1 %v4794_v0 }
 0x17e   : > { %3987 = vmatpush3.bf16.msra.mxu0 %v3984_v28  ;;  %v3308_v28 = vld [vmem:[#allocation8] ss:$0 sm:$0xff] }
 0x17f   : > { %3989 = vmatprep.subr.bf16.mxu0 %v3988_v34  ;;  %1122 = vmatmul.mubr.f32.gmra.mrb[8].mxu1 %v879_v41 }
 0x180   : > { %1127 = vmatprep.mubr.f32.mxu1 %v4794_v0 }
 0x182   : > { %3991 = vmatpush3.bf16.msra.mxu0 %v3988_v34 }
 0x183   : > { %3993 = vmatprep.subr.bf16.mxu0 %v3992_v40  ;;  %1128 = vmatmul.mubr.f32.gmra.mrb[10].mxu1 %v880_v44 }
 0x184   : > { %1133 = vmatprep.mubr.f32.mxu1 %v4794_v0 }
 0x186   : > { %3995 = vmatpush3.bf16.msra.mxu0 %v3992_v40 }
 0x187   : > { %1134 = vmatmul.mubr.f32.gmra.mrb[12].mxu1 %v881_v47  ;;  %3997 = vmatprep.subr.bf16.mxu0 %v3996_v19 }
 0x188   : > { %1139 = vmatprep.mubr.f32.mxu1 %v4794_v0 }
 0x18a   : > { %3999 = vmatpush3.bf16.msra.mxu0 %v3996_v19 }
 0x18b   : > { %1140 = vmatmul.mubr.f32.gmra.mrb[14].mxu1 %v882_v50 }
 0x18c   : > { %1145 = vmatprep.mubr.f32.mxu1 %v4794_v0 }
 0x18f   : > { %1146 = vmatmul.mubr.f32.gmra.mrb[16].mxu1 %v883_v53 }
 0x190   : > { %1151 = vmatprep.mubr.f32.mxu1 %v4794_v0 }
 0x193   : > { %1152 = vmatmul.mubr.f32.gmra.mrb[18].mxu1 %v884_v56 }
 0x194   : > { %1157 = vmatprep.mubr.f32.mxu1 %v4794_v0 }
 0x197   : > { %1158 = vmatmul.mubr.f32.gmra.mrb[20].mxu1 %v885_v59 }
 0x198   : > { %1163 = vmatprep.mubr.f32.mxu1 %v4794_v0 }
 0x19b   : > { %1164 = vmatmul.mubr.f32.gmra.mrb[22].mxu1 %v886_v62 }
 0x19c   : > { %1169 = vmatprep.mubr.f32.mxu1 %v4794_v0 }
 0x19f   : > { %1170 = vmatmul.mubr.f32.gmra.mrb[24].mxu1 %v887_v2 }
 0x1a0   : > { %1175 = vmatprep.mubr.f32.mxu1 %v4794_v0 }
 0x1a3   : > { %1176 = vmatmul.mubr.f32.gmra.mrb[26].mxu1 %v888_v5 }
 0x1a4   : > { %1181 = vmatprep.mubr.f32.mxu1 %v4794_v0 }
 0x1a7   : > { %1182 = vmatmul.mubr.f32.gmra.mrb[28].mxu1 %v889_v8 }
 0x1a8   : > { %1187 = vmatprep.mubr.f32.mxu1 %v4794_v0  ;;  %v1402_v0 = vld [vmem:[%s6011_s4 + $0x60] sm:$0xff] }
 0x1a9   : > { %v4000_v21 = vpack.c.bf16 %v1403_v20, %v1402_v0 }
 0x1ab   : > { %1188 = vmatmul.mubr.f32.gmra.mrb[30].mxu1 %v890_v11  ;;  %4001 = vmatprep.subr.bf16.mxu0 %v4000_v21 }
 0x1ac   : > { %4003 = vmatpush3.bf16.msra.mxu0 %v4000_v21 }
 0x1ad   : > { %4005 = vmatprep.subr.bf16.mxu0 %v4004_v24 }
 0x1b0   : > { %4007 = vmatpush3.bf16.msra.mxu0 %v4004_v24 }
 0x242   : > { %v1099_v32 = vpop.f32.mrb[0].mxu1 }
 0x243   : > { %v1101_v35 = vpop.f32.mrb[1].mxu1  ;;  %v1100_v49 = vadd.f32 %v1099_v32, %v5448_v39 }
 0x244   : > { %v5444_v36 = vadd.f32 %v1101_v35, %v5425_v18 }
 0x246   : > { %v1105_v40 = vpop.f32.mrb[2].mxu1 }
 0x247   : > { %v1107_v43 = vpop.f32.mrb[3].mxu1  ;;  %v1106_v50 = vadd.f32 %v1105_v40, %v5448_v39 }
 0x248   : > { %v3584_v29 = vpop.f32.mrb[0].mxu0  ;;  %v5452_v44 = vadd.f32 %v1107_v43, %v5425_v18 }
 0x249   : > { %v980_v33 = vpop.f32.mrb[1].mxu0  ;;  %v986_v16 = vadd.f32 %v3584_v29, %v3308_v28 }
 0x24a   : > { %v981_v34 = vadd.f32 %v3308_v28, %v980_v33  ;;  %v1111_v51 = vpop.f32.mrb[4].mxu1 }
 0x24b   : > { %v1112_v53 = vadd.f32 %v1111_v51, %v5448_v39  ;;  %v1113_v55 = vpop.f32.mrb[5].mxu1  ;;  %v1252_v24 = vrot.slane %v986_v16, %v5439_v30 }
 0x24c   : > { %v1196_v37 = vcombine.high %v981_v34, %v981_v34  ;;  %v1203_v38 = vrot.slane %v981_v34, %v5439_v30  ;;  %v5463_v58 = vadd.f32 %v1113_v55, %v5425_v18 }
 0x24d   : > { %v1260_v33 = vcombine.high %v1252_v24, %v1252_v24  ;;  %v1268_v34 = vrot.slane %v1252_v24, %v5439_v30 }
 0x24e   : > { %v1211_v41 = vcombine.high %v1203_v38, %v1203_v38  ;;  %v1219_v42 = vrot.slane %v1203_v38, %v5439_v30  ;;  %v1210_v45 = vrot.slane %v1196_v37, %v5439_v30  ;;  %v1117_v1 = vpop.f32.mrb[6].mxu1 }
 0x24f   : > { %v1118_v2 = vadd.f32 %v1117_v1, %v5448_v39  ;;  %v1119_v3 = vpop.f32.mrb[7].mxu1  ;;  %v1329_v43 = vrot.slane %v1268_v34, %v5441_v31 }
 0x250   : > { %v1233_v46 = vrot.slane %v1211_v41, %v5439_v30  ;;  %v1241_v47 = vcombine.high %v1219_v42, %v1219_v42  ;;  %v1297_v48 = vrot.slane %v1219_v42, %v5441_v31  ;;  %v1212_v57 = vcombine.high %v1210_v45, %v1210_v45 }
 0x251   : > { %v1226_v63 = vrot.slane %v1210_v45, %v5439_v30  ;;  %v5469_v4 = vadd.f32 %v1119_v3, %v5425_v18 }
 0x252   : > { %v1301_v52 = vrot.slane %v1233_v46, %v5441_v31  ;;  %v1305_v54 = vrot.slane %v1241_v47, %v5441_v31  ;;  %v1243_v56 = vcombine.high %v1233_v46, %v1233_v46  ;;  %v1374_v59 = vmul.f32 %v1297_v48, %v1100_v49  ;;  %v1123_v8 = vpop.f32.mrb[8].mxu1 }
 0x253   : > { %v1313_v6 = vrot.slane %v1226_v63, %v5441_v31  ;;  %v1240_v7 = vrot.slane %v1212_v57, %v5439_v30  ;;  %v1124_v9 = vadd.f32 %v1123_v8, %v5448_v39  ;;  %v1125_v10 = vpop.f32.mrb[9].mxu1  ;;  %v1242_v14 = vcombine.high %v1226_v63, %v1226_v63 }
 0x254   : > { %v1375_v60 = vmul.f32 %v1301_v52, %v1106_v50  ;;  %v1376_v61 = vmul.f32 %v1305_v54, %v1112_v53  ;;  %v1309_v62 = vrot.slane %v1243_v56, %v5441_v31  ;;  %3617 = vmatprep.mubr.f32.mxu0 %v1374_v59  ;;  %v5475_v11 = vadd.f32 %v1125_v10, %v5425_v18 }
 0x255   : > { %v1378_v12 = vmul.f32 %v1313_v6, %v1124_v9  ;;  %v1317_v13 = vrot.slane %v1240_v7, %v5441_v31  ;;  %v1321_v21 = vrot.slane %v1242_v14, %v5441_v31  ;;  %v1244_v22 = vcombine.high %v1240_v7, %v1240_v7 }
 0x256   : > { %3618 = vmatmul.mubr.f32.vlgmr.msra.gmra.mrb[2].mxu0 %v1375_v60  ;;  %v1377_v5 = vmul.f32 %v1309_v62, %v1118_v2  ;;  %v1129_v15 = vpop.f32.mrb[10].mxu1  ;;  %v1282_v46 = vrot.slane %v1260_v33, %v5439_v30  ;;  %v1245_v50 = vcombine.high %v986_v16, %v986_v16  ;;  %v1290_v54 = vcombine.high %v1268_v34, %v1268_v34 }
 0x257   : > { %3620 = vmatprep.mubr.f32.mxu0 %v1376_v61  ;;  %v1130_v17 = vadd.f32 %v1129_v15, %v5448_v39  ;;  %v1131_v19 = vpop.f32.mrb[11].mxu1  ;;  %v1325_v29 = vrot.slane %v1244_v22, %v5441_v31 }
 0x258   : > { %v5480_v0 = vadd.f32 %v1131_v19, %v5425_v18  ;;  %v1333_v52 = vrot.slane %v1282_v46, %v5441_v31  ;;  %v1259_v59 = vrot.slane %v1245_v50, %v5439_v30  ;;  %v1337_v61 = vrot.slane %v1290_v54, %v5441_v31 }
 0x259   : > { %v1379_v20 = vmul.f32 %v1317_v13, %v1130_v17  ;;  %v1292_v63 = vcombine.high %v1282_v46, %v1282_v46 }
 0x25a   : > { %3621 = vmatmul.mubr.f32.gmra.mrb[4].mxu0 %v1377_v5  ;;  %v1135_v23 = vpop.f32.mrb[12].mxu1  ;;  %v1261_v5 = vcombine.high %v1259_v59, %v1259_v59  ;;  %v1275_v9 = vrot.slane %v1259_v59, %v5439_v30 }
 0x25b   : > { %3623 = vmatprep.mubr.f32.mxu0 %v1378_v12  ;;  %v1136_v25 = vadd.f32 %v1135_v23, %v5448_v39  ;;  %v1137_v26 = vpop.f32.mrb[13].mxu1  ;;  %v1341_v7 = vrot.slane %v1292_v63, %v5441_v31 }
 0x25c   : > { %v5486_v27 = vadd.f32 %v1137_v26, %v5425_v18  ;;  %v1345_v15 = vrot.slane %v1275_v9, %v5441_v31  ;;  %v1289_v17 = vrot.slane %v1261_v5, %v5439_v30 }
 0x25d   : > { %v1380_v28 = vmul.f32 %v1321_v21, %v1136_v25  ;;  %v1291_v25 = vcombine.high %v1275_v9, %v1275_v9 }
 0x25e   : > { %3624 = vmatmul.mubr.f32.gmra.mrb[6].mxu0 %v1379_v20  ;;  %v1141_v32 = vpop.f32.mrb[14].mxu1  ;;  %v1349_v23 = vrot.slane %v1289_v17, %v5441_v31  ;;  %v1293_v34 = vcombine.high %v1289_v17, %v1289_v17 }
 0x25f   : > { %v1142_v35 = vadd.f32 %v1141_v32, %v5448_v39  ;;  %v1143_v37 = vpop.f32.mrb[15].mxu1  ;;  %3626 = vmatprep.mubr.f32.mxu0 %v1380_v28  ;;  %v1353_v30 = vrot.slane %v1291_v25, %v5441_v31 }
 0x260   : > { %v5492_v38 = vadd.f32 %v1143_v37, %v5425_v18 }
 0x261   : > { %v1381_v40 = vmul.f32 %v1325_v29, %v1142_v35 }
 0x262   : > { %v1147_v41 = vpop.f32.mrb[16].mxu1 }
 0x263   : > { %v1148_v42 = vadd.f32 %v1147_v41, %v5448_v39  ;;  %v1149_v45 = vpop.f32.mrb[17].mxu1  ;;  %3627 = vmatmul.mubr.f32.gmra.mrb[8].mxu0 %v1381_v40 }
 0x264   : > { %v5498_v47 = vadd.f32 %v1149_v45, %v5425_v18 }
 0x265   : > { %v1382_v48 = vmul.f32 %v1329_v43, %v1148_v42  ;;  %v1357_v42 = vrot.slane %v1293_v34, %v5441_v31 }
 0x266   : > { %v1153_v49 = vpop.f32.mrb[18].mxu1 }
 0x267   : > { %v1154_v51 = vadd.f32 %v1153_v49, %v5448_v39  ;;  %v1155_v53 = vpop.f32.mrb[19].mxu1  ;;  %3629 = vmatprep.mubr.f32.mxu0 %v1382_v48  ;;  %v1872_v48 = vld [vmem:[%s6014_s12] sm:$0xf]  ;;  %s6025_s12 = sld [smem:[#allocation50_spill]] }
 0x268   : > { %v5503_v55 = vadd.f32 %v1155_v53, %v5425_v18  ;;  %3641 = vmatprep.subr.msk.mxu0 %vm1921_vm0, %v1872_v48 }
 0x269   : > { %v1383_v56 = vmul.f32 %v1333_v52, %v1154_v51  ;;  %3642 = vmatpush3.msk.msra.mxu0 %vm1921_vm0, %v1872_v48 }
 0x26a   : > { %v1159_v57 = vpop.f32.mrb[20].mxu1 }
 0x26b   : > { %v1160_v60 = vadd.f32 %v1159_v57, %v5448_v39  ;;  %v1161_v62 = vpop.f32.mrb[21].mxu1  ;;  %3630 = vmatmul.mubr.f32.gmra.mrb[10].mxu0 %v1383_v56 }
 0x26c   : > { %v5509_v1 = vadd.f32 %v1161_v62, %v5425_v18 }
 0x26d   : > { %v1384_v2 = vmul.f32 %v1337_v61, %v1160_v60 }
 0x26e   : > { %v1165_v3 = vpop.f32.mrb[22].mxu1 }
 0x26f   : > { %v1166_v6 = vadd.f32 %v1165_v3, %v5448_v39  ;;  %v1167_v8 = vpop.f32.mrb[23].mxu1  ;;  %3632 = vmatprep.mubr.f32.mxu0 %v1384_v2 }
 0x270   : > { %v5515_v10 = vadd.f32 %v1167_v8, %v5425_v18 }
 0x271   : > { %v1385_v12 = vmul.f32 %v1341_v7, %v1166_v6 }
 0x272   : > { %v1171_v13 = vpop.f32.mrb[24].mxu1 }
 0x273   : > { %v1172_v14 = vadd.f32 %v1171_v13, %v5448_v39  ;;  %v1173_v16 = vpop.f32.mrb[25].mxu1  ;;  %3633 = vmatmul.mubr.f32.gmra.mrb[12].mxu0 %v1385_v12 }
 0x274   : > { %v5521_v19 = vadd.f32 %v1173_v16, %v5425_v18 }
 0x275   : > { %v1386_v20 = vmul.f32 %v1345_v15, %v1172_v14 }
 0x276   : > { %v1177_v21 = vpop.f32.mrb[26].mxu1 }
 0x277   : > { %v1178_v22 = vadd.f32 %v1177_v21, %v5448_v39  ;;  %v1179_v24 = vpop.f32.mrb[27].mxu1  ;;  %3635 = vmatprep.mubr.f32.mxu0 %v1386_v20 }
 0x278   : > { %v5526_v26 = vadd.f32 %v1179_v24, %v5425_v18 }
 0x279   : > { %v1387_v28 = vmul.f32 %v1349_v23, %v1178_v22 }
 0x27a   : > { %v1183_v29 = vpop.f32.mrb[28].mxu1 }
 0x27b   : > { %v1184_v32 = vadd.f32 %v1183_v29, %v5448_v39  ;;  %v1185_v33 = vpop.f32.mrb[29].mxu1  ;;  %3636 = vmatmul.mubr.f32.gmra.mrb[14].mxu0 %v1387_v28 }
 0x27c   : > { %v5531_v35 = vadd.f32 %v1185_v33, %v5425_v18 }
 0x27d   : > { %v1388_v37 = vmul.f32 %v1353_v30, %v1184_v32 }
 0x27e   : > { %6013 = vst [vmem:[#allocation32_spill] sm:$0xff] %v5531_v35  ;;  %v1189_v40 = vpop.f32.mrb[30].mxu1 }
 0x27f   : > { %v1190_v41 = vadd.f32 %v1189_v40, %v5448_v39  ;;  %v1191_v43 = vpop.f32.mrb[31].mxu1  ;;  %3638 = vmatprep.mubr.f32.mxu0 %v1388_v37 }
 0x280   : > { %v5536_v45 = vadd.f32 %v1191_v43, %v5425_v18 }
 0x281   : > { %v1389_v46 = vmul.f32 %v1357_v42, %v1190_v41 }
 0x283   : > { %3639 = vmatmul.mubr.f32.gmra.mrb[16].mxu0 %v1389_v46 }
 0x329   : > { %v3619_v49 = vpop.f32.mrb[2].mxu0 }
 0x32a   : > { %v1552_v50 = vmul.f32 0.17677669, %v3619_v49  ;;  %v1472_v39 = vpop.f32.mrb[3].mxu0 }
 0x32b   : > { %v1551_v51 = vmul.f32 0.17677669, %v1472_v39 }
 0x32c   : > { %v1575_v31 = vsel %vm1567_vm1, %v1552_v50, -inf }
 0x32d   : > { %v1576_v52 = vrot.slane %v1575_v31, 4  ;;  %v1568_v18 = vsel %vm1567_vm1, %v1551_v51, -inf  ;;  %v3622_v53 = vpop.f32.mrb[4].mxu0 }
 0x32e   : > { %v1569_v54 = vrot.slane %v1568_v18, 4  ;;  %v1554_v56 = vmul.f32 0.17677669, %v3622_v53  ;;  %v1482_v57 = vpop.f32.mrb[5].mxu0 }
 0x32f   : > { %v1577_v59 = vmax.f32 %v1575_v31, %v1576_v52  ;;  %v1553_v60 = vmul.f32 0.17677669, %v1482_v57 }
 0x330   : > { %v1570_v61 = vmax.f32 %v1568_v18, %v1569_v54  ;;  %v1589_v62 = vsel %vm1567_vm1, %v1554_v56, -inf }
 0x331   : > { %v1578_v63 = vrot.slane %v1577_v59, 2  ;;  %v1590_v2 = vrot.slane %v1589_v62, 4  ;;  %v1582_v3 = vsel %vm1567_vm1, %v1553_v60, -inf  ;;  %v3625_v15 = vpop.f32.mrb[6].mxu0 }
 0x332   : > { %v1571_v5 = vrot.slane %v1570_v61, 2  ;;  %v1583_v6 = vrot.slane %v1582_v3, 4  ;;  %v1556_v20 = vmul.f32 0.17677669, %v3625_v15  ;;  %v1492_v21 = vpop.f32.mrb[7].mxu0 }
 0x333   : > { %v1579_v7 = vmax.f32 %v1577_v59, %v1578_v63  ;;  %v1591_v8 = vmax.f32 %v1589_v62, %v1590_v2  ;;  %v1555_v24 = vmul.f32 0.17677669, %v1492_v21 }
 0x334   : > { %v1572_v9 = vmax.f32 %v1570_v61, %v1571_v5  ;;  %v1584_v12 = vmax.f32 %v1582_v3, %v1583_v6  ;;  %v1603_v29 = vsel %vm1567_vm1, %v1556_v20, -inf }
 0x335   : > { %v1580_v13 = vrot.slane %v1579_v7, 1  ;;  %v1592_v14 = vrot.slane %v1591_v8, 2  ;;  %v1604_v33 = vrot.slane %v1603_v29, 4  ;;  %v1596_v34 = vsel %vm1567_vm1, %v1555_v24, -inf }
 0x336   : > { %v1573_v16 = vrot.slane %v1572_v9, 1  ;;  %v1585_v17 = vrot.slane %v1584_v12, 2  ;;  %v1597_v41 = vrot.slane %v1596_v34, 4  ;;  %v3628_v18 = vpop.f32.mrb[8].mxu0 }
 0x337   : > { %v1581_v22 = vmax.f32 %v1579_v7, %v1580_v13  ;;  %v1593_v23 = vmax.f32 %v1591_v8, %v1592_v14  ;;  %v1605_v46 = vmax.f32 %v1603_v29, %v1604_v33  ;;  %v5547_v54 = vmul.f32 0.17677669, %v3628_v18  ;;  %v1502_v57 = vpop.f32.mrb[9].mxu0 }
 0x338   : > { %v1574_v25 = vmax.f32 %v1572_v9, %v1573_v16  ;;  %v1586_v28 = vmax.f32 %v1584_v12, %v1585_v17  ;;  %v1598_v39 = vmax.f32 %v1596_v34, %v1597_v41  ;;  %v5549_v61 = vmul.f32 0.17677669, %v1502_v57 }
 0x339   : > { %v1681_v32 = vsub.f32 %v1552_v50, %v1581_v22  ;;  %v1594_v30 = vrot.slane %v1593_v23, 1  ;;  %v1606_v52 = vrot.slane %v1605_v46, 2  ;;  %v1617_v2 = vsel %vm1567_vm1, %v5547_v54, -inf }
 0x33a   : > { %v1680_v37 = vsub.f32 %v1551_v51, %v1574_v25  ;;  %v1587_v40 = vrot.slane %v1586_v28, 1  ;;  %v1599_v50 = vrot.slane %v1598_v39, 2  ;;  %v1610_v5 = vsel %vm1567_vm1, %v5549_v61, -inf }
 0x33b   : > { %v1698_v42 = vmul.f32 1.442695, %v1681_v32  ;;  %v1595_v43 = vmax.f32 %v1593_v23, %v1594_v30  ;;  %v1607_v51 = vmax.f32 %v1605_v46, %v1606_v52  ;;  %v1611_v6 = vrot.slane %v1610_v5, 4 }
 0x33c   : > { %v1696_v48 = vmul.f32 1.442695, %v1680_v37  ;;  %v1588_v49 = vmax.f32 %v1586_v28, %v1587_v40  ;;  %v1600_v63 = vmax.f32 %v1598_v39, %v1599_v50 }
 0x33d   : > { %4357 = vpow2.f32 %v1698_v42  ;;  %v1683_v31 = vsub.f32 %v1554_v56, %v1595_v43  ;;  %v1608_v3 = vrot.slane %v1607_v51, 1  ;;  %v1618_v56 = vrot.slane %v1617_v2, 4 }
 0x33e   : > { %4359 = vpow2.f32 %v1696_v48  ;;  %v1682_v53 = vsub.f32 %v1553_v60, %v1588_v49  ;;  %v1601_v60 = vrot.slane %v1600_v63, 1  ;;  %v1612_v12 = vmax.f32 %v1610_v5, %v1611_v6  ;;  %v3631_v15 = vpop.f32.mrb[10].mxu0 }
 0x33f   : > { %v1702_v59 = vmul.f32 1.442695, %v1683_v31  ;;  %v1609_v7 = vmax.f32 %v1607_v51, %v1608_v3  ;;  %v1619_v8 = vmax.f32 %v1617_v2, %v1618_v56  ;;  %v5555_v21 = vmul.f32 0.17677669, %v3631_v15  ;;  %v1512_v22 = vpop.f32.mrb[11].mxu0 }
 0x340   : > { %v1700_v62 = vmul.f32 1.442695, %v1682_v53  ;;  %v1602_v9 = vmax.f32 %v1600_v63, %v1601_v60  ;;  %v1613_v17 = vrot.slane %v1612_v12, 2  ;;  %v5559_v29 = vmul.f32 0.17677669, %v1512_v22 }
 0x341   : > { %4361 = vpow2.f32 %v1702_v59  ;;  %v1685_v13 = vsub.f32 %v1556_v20, %v1609_v7  ;;  %v1620_v14 = vrot.slane %v1619_v8, 2 }
 0x342   : > { %4363 = vpow2.f32 %v1700_v62  ;;  %v1684_v16 = vsub.f32 %v1555_v24, %v1602_v9  ;;  %v1614_v20 = vmax.f32 %v1612_v12, %v1613_v17  ;;  %v1631_v24 = vsel %vm1567_vm1, %v5555_v21, -inf }
 0x343   : > { %v1706_v25 = vmul.f32 1.442695, %v1685_v13  ;;  %v1621_v28 = vmax.f32 %v1619_v8, %v1620_v14  ;;  %v1632_v43 = vrot.slane %v1631_v24, 4  ;;  %v1624_v39 = vsel %vm1567_vm1, %v5559_v29, -inf }
 0x344   : > { %v1704_v33 = vmul.f32 1.442695, %v1684_v16  ;;  %v1615_v42 = vrot.slane %v1614_v20, 1  ;;  %v1625_v9 = vrot.slane %v1624_v39, 4 }
 0x345   : > { %4365 = vpow2.f32 %v1706_v25  ;;  %v1622_v40 = vrot.slane %v1621_v28, 1  ;;  %v1633_v50 = vmax.f32 %v1631_v24, %v1632_v43 }
 0x346   : > { %4367 = vpow2.f32 %v1704_v33  ;;  %v1616_v53 = vmax.f32 %v1614_v20, %v1615_v42  ;;  %v3634_v63 = vpop.f32.mrb[12].mxu0 }
 0x347   : > { %v5557_v23 = vpop.eup %4357  ;;  %v1623_v49 = vmax.f32 %v1621_v28, %v1622_v40  ;;  %v1634_v5 = vrot.slane %v1633_v50, 2  ;;  %v1522_v60 = vpop.f32.mrb[13].mxu0  ;;  %v5587_v20 = vmul.f32 0.17677669, %v3634_v63 }
 0x348   : > { %v5561_v32 = vpop.eup %4359  ;;  %v1735_v30 = vsel %vm1567_vm1, %v5557_v23, 0.0  ;;  %v1686_v56 = vsub.f32 %v5549_v61, %v1616_v53 }
 0x349   : > { %v1736_v34 = vrot.slane %v1735_v30, 4  ;;  %v1728_v37 = vsel %vm1567_vm1, %v5561_v32, 0.0  ;;  %v1687_v62 = vsub.f32 %v5547_v54, %v1623_v49  ;;  %v1635_v15 = vmax.f32 %v1633_v50, %v1634_v5 }
 0x34a   : > { %v1729_v41 = vrot.slane %v1728_v37, 4  ;;  %v1708_v14 = vmul.f32 1.442695, %v1686_v56  ;;  %v1626_v54 = vmax.f32 %v1624_v39, %v1625_v9 }
 0x34b   : > { %v5569_v46 = vpop.eup %4361  ;;  %v1737_v48 = vadd.f32 %v1736_v34, %v1735_v30  ;;  %v1710_v8 = vmul.f32 1.442695, %v1687_v62  ;;  %v1636_v25 = vrot.slane %v1635_v15, 1 }
 0x34c   : > { %v5573_v31 = vpop.eup %4363  ;;  %v1730_v52 = vadd.f32 %v1729_v41, %v1728_v37  ;;  %v1749_v18 = vsel %vm1567_vm1, %v5569_v46, 0.0  ;;  %v1627_v33 = vrot.slane %v1626_v54, 2  ;;  %v5594_v41 = vmul.f32 0.17677669, %v1522_v60 }
 0x34d   : > { %v1738_v57 = vrot.slane %v1737_v48, 2  ;;  %v1750_v59 = vrot.slane %v1749_v18, 4  ;;  %v1742_v51 = vsel %vm1567_vm1, %v5573_v31, 0.0  ;;  %4369 = vpow2.f32 %v1710_v8 }
 0x34e   : > { %v1731_v2 = vrot.slane %v1730_v52, 2  ;;  %v1743_v3 = vrot.slane %v1742_v51, 4  ;;  %4371 = vpow2.f32 %v1708_v14  ;;  %v1637_v40 = vmax.f32 %v1635_v15, %v1636_v25  ;;  %v3637_v49 = vpop.f32.mrb[14].mxu0 }
 0x34f   : > { %v1739_v6 = vadd.f32 %v1738_v57, %v1737_v48  ;;  %v1751_v7 = vadd.f32 %v1750_v59, %v1749_v18  ;;  %v5583_v28 = vpop.eup %4365  ;;  %v1628_v53 = vmax.f32 %v1626_v54, %v1627_v33  ;;  %v1532_v50 = vpop.f32.mrb[15].mxu0  ;;  %v1645_v59 = vsel %vm1567_vm1, %v5587_v20, -inf }
 0x350   : > { %v5581_v12 = vadd.f32 %v1731_v2, %v1730_v52  ;;  %v1744_v13 = vadd.f32 %v1743_v3, %v1742_v51  ;;  %v5589_v24 = vpop.eup %4367  ;;  %v1763_v37 = vsel %vm1567_vm1, %v5583_v28, 0.0  ;;  %v1689_v18 = vsub.f32 %v5555_v21, %v1637_v40 }
 0x351   : > { %v1740_v16 = vrot.slane %v1739_v6, 1  ;;  %v1752_v17 = vrot.slane %v1751_v7, 2  ;;  %v1764_v43 = vrot.slane %v1763_v37, 4  ;;  %v1756_v48 = vsel %vm1567_vm1, %v5589_v24, 0.0 }
 0x352   : > { %v1745_v22 = vrot.slane %v1744_v13, 2  ;;  %v1757_v52 = vrot.slane %v1756_v48, 4  ;;  %v1638_v51 = vsel %vm1567_vm1, %v5594_v41, -inf  ;;  %v5606_v62 = vmul.f32 0.17677669, %v3637_v49 }
 0x353   : > { %v1741_v61 = vadd.f32 %v1740_v16, %v1739_v6  ;;  %v5585_v30 = vadd.f32 %v1752_v17, %v1751_v7  ;;  %v1765_v57 = vadd.f32 %v1764_v43, %v1763_v37  ;;  %v1714_v2 = vmul.f32 1.442695, %v1689_v18 }
 0x354   : > { %v5596_v42 = vadd.f32 %v1745_v22, %v1744_v13  ;;  %v1758_v63 = vadd.f32 %v1757_v52, %v1756_v48  ;;  %v1629_v3 = vrot.slane %v1628_v53, 1  ;;  %v1646_v56 = vrot.slane %v1645_v59, 4 }
 0x355   : > { %4373 = vrcp.f32 %v1741_v61  ;;  %v1766_v5 = vrot.slane %v1765_v57, 2  ;;  %v1639_v60 = vrot.slane %v1638_v51, 4  ;;  %v1659_v21 = vsel %vm1567_vm1, %v5606_v62, -inf }
 0x356   : > { %v5610_v6 = vmul.f32 0.17677669, %v1532_v50  ;;  %v1759_v7 = vrot.slane %v1758_v63, 2  ;;  %4375 = vpow2.f32 %v1714_v2  ;;  %v1630_v8 = vmax.f32 %v1628_v53, %v1629_v3  ;;  %v3640_v49 = vpop.f32.mrb[16].mxu0 }
 0x357   : > { %v1647_v9 = vmax.f32 %v1645_v59, %v1646_v56  ;;  %v5612_v13 = vpop.eup %4369  ;;  %v5614_v14 = vadd.f32 %v1766_v5, %v1765_v57  ;;  %v1640_v15 = vmax.f32 %v1638_v51, %v1639_v60  ;;  %v1660_v16 = vrot.slane %v1659_v21, 4  ;;  %v1542_v57 = vpop.f32.mrb[17].mxu0 }
 0x358   : > { %v1652_v17 = vsel %vm1567_vm1, %v5610_v6, -inf  ;;  %v5618_v54 = vpop.eup %4371  ;;  %v5620_v22 = vadd.f32 %v1759_v7, %v1758_v63  ;;  %v1777_v25 = vsel %vm1567_vm1, %v5612_v13, 0.0  ;;  %v1688_v61 = vsub.f32 %v5559_v29, %v1630_v8 }
 0x359   : > { %v1648_v33 = vrot.slane %v1647_v9, 2  ;;  %v1747_v37 = vrot.slane %v5596_v42, 1  ;;  %v1778_v40 = vrot.slane %v1777_v25, 4  ;;  %v1770_v43 = vsel %vm1567_vm1, %v5618_v54, 0.0 }
 0x35a   : > { %v1641_v48 = vrot.slane %v1640_v15, 2  ;;  %v1771_v18 = vrot.slane %v1770_v43, 4  ;;  %v1712_v53 = vmul.f32 1.442695, %v1688_v61  ;;  %v1661_v29 = vmax.f32 %v1659_v21, %v1660_v16 }
 0x35b   : > { %v1649_v50 = vmax.f32 %v1647_v9, %v1648_v33  ;;  %v1779_v51 = vadd.f32 %v1778_v40, %v1777_v25  ;;  %v1653_v2 = vrot.slane %v1652_v17, 4  ;;  %v1761_v3 = vrot.slane %v5620_v22, 1 }
 0x35c   : > { %v1642_v63 = vmax.f32 %v1640_v15, %v1641_v48  ;;  %v1772_v56 = vadd.f32 %v1771_v18, %v1770_v43  ;;  %4377 = vpow2.f32 %v1712_v53  ;;  %v1662_v8 = vrot.slane %v1661_v29, 2 }
 0x35d   : > { %v1650_v5 = vrot.slane %v1649_v50, 1  ;;  %v1780_v60 = vrot.slane %v1779_v51, 2  ;;  %v1654_v39 = vmax.f32 %v1652_v17, %v1653_v2  ;;  %v5632_v61 = vmul.f32 0.17677669, %v3640_v49 }
 0x35e   : > { %v1643_v7 = vrot.slane %v1642_v63, 1  ;;  %v1773_v52 = vrot.slane %v1772_v56, 2  ;;  %v5634_v9 = vmul.f32 0.17677669, %v1542_v57  ;;  %v1663_v15 = vmax.f32 %v1661_v29, %v1662_v8 }
 0x35f   : > { %v5629_v59 = vpop.eup %4373  ;;  %v1651_v34 = vmax.f32 %v1649_v50, %v1650_v5  ;;  %v1781_v33 = vadd.f32 %v1780_v60, %v1779_v51  ;;  %v1655_v21 = vrot.slane %v1654_v39, 2  ;;  %v1673_v48 = vsel %vm1567_vm1, %v5632_v61, -inf }
 0x360   : > { %v1644_v25 = vmax.f32 %v1642_v63, %v1643_v7  ;;  %v5636_v16 = vpop.eup %4375  ;;  %v1774_v40 = vadd.f32 %v1773_v52, %v1772_v56  ;;  %v1666_v17 = vsel %vm1567_vm1, %v5634_v9, -inf  ;;  %v1664_v50 = vrot.slane %v1663_v15, 1 }
 0x361   : > { %v1691_v43 = vsub.f32 %v5587_v20, %v1651_v34  ;;  %v1782_v18 = vrot.slane %v1781_v33, 1  ;;  %v1791_v49 = vsel %vm1567_vm1, %v5636_v16, 0.0  ;;  %v1656_v29 = vmax.f32 %v1654_v39, %v1655_v21 }
 0x362   : > { %v1690_v53 = vsub.f32 %v5594_v41, %v1644_v25  ;;  %v1775_v57 = vrot.slane %v1774_v40, 1  ;;  %v1792_v51 = vrot.slane %v1791_v49, 4  ;;  %v1665_v2 = vmax.f32 %v1663_v15, %v1664_v50 }
 0x363   : > { %v1718_v63 = vmul.f32 1.442695, %v1691_v43  ;;  %v1674_v20 = vrot.slane %v1673_v48, 4  ;;  %v1667_v34 = vrot.slane %v1666_v17, 4  ;;  %v1657_v5 = vrot.slane %v1656_v29, 1 }
 0x364   : > { %v1716_v52 = vmul.f32 1.442695, %v1690_v53  ;;  %v1793_v56 = vadd.f32 %v1792_v51, %v1791_v49  ;;  %v6015_v60 = vrot.slane %v5581_v12, 1  ;;  %v1693_v8 = vsub.f32 %v5606_v62, %v1665_v2 }
 0x365   : > { %4379 = vpow2.f32 %v1718_v63  ;;  %v1675_v41 = vmax.f32 %v1673_v48, %v1674_v20  ;;  %v1668_v25 = vmax.f32 %v1666_v17, %v1667_v34  ;;  %v1658_v39 = vmax.f32 %v1656_v29, %v1657_v5 }
 0x366   : > { %v1734_v7 = vadd.f32 %v6015_v60, %v5581_v12  ;;  %4381 = vpow2.f32 %v1716_v52  ;;  %v5650_v35 = vpop.eup %4377  ;;  %v1794_v43 = vrot.slane %v1793_v56, 2  ;;  %v1748_v15 = vadd.f32 %v1747_v37, %v5596_v42 }
 0x367   : > { %v1784_v21 = vsel %vm1567_vm1, %v5650_v35, 0.0  ;;  %v1722_v49 = vmul.f32 1.442695, %v1693_v8  ;;  %v1676_v53 = vrot.slane %v1675_v41, 2  ;;  %v1669_v50 = vrot.slane %v1668_v25, 2 }
 0x368   : > { %4383 = vrcp.f32 %v1734_v7  ;;  %v1795_v51 = vadd.f32 %v1794_v43, %v1793_v56  ;;  %v1785_v12 = vrot.slane %v1784_v21, 4  ;;  %v1692_v63 = vsub.f32 %v5610_v6, %v1658_v39 }
 0x369   : > { %4385 = vrcp.f32 %v1748_v15  ;;  %v1677_v62 = vmax.f32 %v1675_v41, %v1676_v53  ;;  %v1670_v48 = vmax.f32 %v1668_v25, %v1669_v50  ;;  %v6016_v17 = vrot.slane %v5585_v30, 1 }
 0x36a   : > { %4387 = vpow2.f32 %v1722_v49  ;;  %v1796_v52 = vrot.slane %v1795_v51, 1  ;;  %v1786_v42 = vadd.f32 %v1785_v12, %v1784_v21  ;;  %v1720_v37 = vmul.f32 1.442695, %v1692_v63 }
 0x36b   : > { %v1755_v29 = vadd.f32 %v6016_v17, %v5585_v30  ;;  %v1762_v2 = vadd.f32 %v1761_v3, %v5620_v22  ;;  %v1678_v20 = vrot.slane %v1677_v62, 1  ;;  %v1671_v34 = vrot.slane %v1670_v48, 1 }
 0x36c   : > { %v6017_v56 = vrot.slane %v5614_v14, 1  ;;  %v1787_v5 = vrot.slane %v1786_v42, 2  ;;  %v1776_v60 = vadd.f32 %v1775_v57, %v1774_v40  ;;  %v1783_v7 = vadd.f32 %v1782_v18, %v1781_v33 }
 0x36d   : > { %4389 = vrcp.f32 %v1755_v29  ;;  %v1679_v8 = vmax.f32 %v1677_v62, %v1678_v20  ;;  %v1672_v41 = vmax.f32 %v1670_v48, %v1671_v34  ;;  %v1797_v43 = vadd.f32 %v1796_v52, %v1795_v51 }
 0x36e   : > { %v1769_v6 = vadd.f32 %v6017_v56, %v5614_v14  ;;  %4391 = vpow2.f32 %v1720_v37  ;;  %v1788_v25 = vadd.f32 %v1787_v5, %v1786_v42  ;;  %v1857_v51 = vmul.f32 %v5629_v59, %v5557_v23 }
 0x36f   : > { %4393 = vrcp.f32 %v1762_v2  ;;  %v5663_v30 = vpop.eup %4379  ;;  %v1695_v39 = vsub.f32 %v5632_v61, %v1679_v8  ;;  %v1694_v14 = vsub.f32 %v5634_v9, %v1672_v41 }
 0x370   : > { %4395 = vrcp.f32 %v1769_v6  ;;  %v5665_v22 = vpop.eup %4381  ;;  %v1805_v3 = vsel %vm1567_vm1, %v5663_v30, 0.0  ;;  %v1789_v33 = vrot.slane %v1788_v25, 1 }
 0x371   : > { %4397 = vrcp.f32 %v1776_v60  ;;  %v1806_v18 = vrot.slane %v1805_v3, 4  ;;  %v1798_v57 = vsel %vm1567_vm1, %v5665_v22, 0.0  ;;  %v1726_v21 = vmul.f32 1.442695, %v1695_v39 }
 0x372   : > { %v4384_v40 = vpop.eup %4383  ;;  %4399 = vrcp.f32 %v1783_v7  ;;  %v1799_v15 = vrot.slane %v1798_v57, 4  ;;  %v1724_v49 = vmul.f32 1.442695, %v1694_v14  ;;  %v1790_v12 = vadd.f32 %v1789_v33, %v1788_v25 }
 0x373   : > { %v1856_v53 = vmul.f32 %v4384_v40, %v5561_v32  ;;  %v4386_v50 = vpop.eup %4385  ;;  %v1807_v61 = vadd.f32 %v1806_v18, %v1805_v3  ;;  %4401 = vrcp.f32 %v1797_v43 }
 0x374   : > { %v5676_v9 = vpop.eup %4387  ;;  %v1800_v63 = vadd.f32 %v1799_v15, %v1798_v57  ;;  %4403 = vpow2.f32 %v1726_v21  ;;  %v1858_v62 = vmul.f32 %v4386_v50, %v5573_v31 }
 0x375   : > { %3643 = vmatprep.mubr.msk.f32.mxu0 %vm1567_vm1, %v1856_v53  ;;  %v1808_v48 = vrot.slane %v1807_v61, 2  ;;  %v1819_v17 = vsel %vm1567_vm1, %v5676_v9, 0.0  ;;  %4405 = vpow2.f32 %v1724_v49 }
 0x376   : > { %3644 = vmatmul.mubr.msk.f32.vlgmr.msra.gmra.mrb[18].mxu0 %vm1567_vm1, %v1857_v51  ;;  %v1801_v23 = vrot.slane %v1800_v63, 2  ;;  %v1820_v59 = vrot.slane %v1819_v17, 4  ;;  %4407 = vrcp.f32 %v1790_v12 }
 0x377   : > { %v4390_v32 = vpop.eup %4389  ;;  %3646 = vmatprep.mubr.msk.f32.mxu0 %vm1567_vm1, %v1858_v62  ;;  %v1809_v52 = vadd.f32 %v1808_v48, %v1807_v61 }
 0x378   : > { %v5684_v29 = vpop.eup %4391  ;;  %v1859_v42 = vmul.f32 %v4390_v32, %v5569_v46  ;;  %v1802_v31 = vadd.f32 %v1801_v23, %v1800_v63  ;;  %v1821_v2 = vadd.f32 %v1820_v59, %v1819_v17 }
 0x379   : > { %v4394_v37 = vpop.eup %4393  ;;  %v1812_v20 = vsel %vm1567_vm1, %v5684_v29, 0.0  ;;  %v1810_v56 = vrot.slane %v1809_v52, 1 }
 0x37a   : > { %v4396_v34 = vpop.eup %4395  ;;  %v1813_v6 = vrot.slane %v1812_v20, 4  ;;  %3647 = vmatmul.mubr.msk.f32.gmra.mrb[20].mxu0 %vm1567_vm1, %v1859_v42  ;;  %v1860_v5 = vmul.f32 %v4394_v37, %v5589_v24  ;;  %v1803_v7 = vrot.slane %v1802_v31, 1  ;;  %v1822_v8 = vrot.slane %v1821_v2, 2 }
 0x37b   : > { %v4398_v60 = vpop.eup %4397  ;;  %v1861_v46 = vmul.f32 %v4396_v34, %v5583_v28  ;;  %v1811_v3 = vadd.f32 %v1810_v56, %v1809_v52 }
 0x37c   : > { %v4400_v41 = vpop.eup %4399  ;;  %v1814_v25 = vadd.f32 %v1813_v6, %v1812_v20  ;;  %3649 = vmatprep.mubr.msk.f32.mxu0 %vm1567_vm1, %v1860_v5  ;;  %v1862_v43 = vmul.f32 %v4398_v60, %v5618_v54  ;;  %v1823_v39 = vadd.f32 %v1822_v8, %v1821_v2  ;;  %v1804_v14 = vadd.f32 %v1803_v7, %v1802_v31  ;;  %v2182_v8 = vld [vmem:[#allocation13] sm:$0xff] }
 0x37d   : > { %v4402_v40 = vpop.eup %4401  ;;  %4409 = vrcp.f32 %v1811_v3  ;;  %v1863_v28 = vmul.f32 %v4400_v41, %v5612_v13  ;;  %v2183_v41 = vld [vmem:[#allocation13 + $0x8] sm:$0xff] }
 0x37e   : > { %v1815_v33 = vrot.slane %v1814_v25, 2  ;;  %3650 = vmatmul.mubr.msk.f32.gmra.mrb[22].mxu0 %vm1567_vm1, %v1861_v46  ;;  %v4404_v24 = vpop.eup %4403  ;;  %v1824_v18 = vrot.slane %v1823_v39, 1  ;;  %4411 = vrcp.f32 %v1804_v14  ;;  %v1865_v48 = vmul.f32 %v4402_v40, %v5636_v16  ;;  %v2185_v46 = vld [vmem:[#allocation13 + $0x18] sm:$0xff]  ;;  %v2187_v3 = vld [vmem:[#allocation13 + $0x28] sm:$0xff]  ;;  %v2188_v14 = vld [vmem:[#allocation13 + $0x30] sm:$0xff] }
 0x37f   : > { %3652 = vmatprep.mubr.msk.f32.mxu0 %vm1567_vm1, %v1862_v43  ;;  %v4406_v57 = vpop.eup %4405  ;;  %v1833_v21 = vsel %vm1567_vm1, %v4404_v24, 0.0  ;;  %v2186_v43 = vld [vmem:[#allocation13 + $0x20] sm:$0xff]  ;;  %v2189_v40 = vld [vmem:[#allocation13 + $0x38] sm:$0xff] }
 0x380   : > { %v1816_v15 = vadd.f32 %v1815_v33, %v1814_v25  ;;  %v4408_v54 = vpop.eup %4407  ;;  %v1834_v49 = vrot.slane %v1833_v21, 4  ;;  %v1826_v53 = vsel %vm1567_vm1, %v4406_v57, 0.0  ;;  %v1825_v50 = vadd.f32 %v1824_v18, %v1823_v39  ;;  %v2191_v18 = vld [vmem:[#allocation13 + $0x48] sm:$0xff] }
 0x381   : > { %v1827_v61 = vrot.slane %v1826_v53, 4  ;;  %v1864_v12 = vmul.f32 %v4408_v54, %v5650_v35  ;;  %v4008_v25 = vpack.c.bf16 %v2183_v41, %v2182_v8  ;;  %v4016_v39 = vpack.c.bf16 %v2187_v3, %v2186_v43  ;;  %v2194_v54 = vld [vmem:[#allocation13 + $0x60] sm:$0xff] }
 0x382   : > { %v1817_v51 = vrot.slane %v1816_v15, 1  ;;  %3653 = vmatmul.mubr.msk.f32.gmra.mrb[24].mxu0 %vm1567_vm1, %v1863_v28  ;;  %v1835_v63 = vadd.f32 %v1834_v49, %v1833_v21  ;;  %4413 = vrcp.f32 %v1825_v50  ;;  %v4020_v33 = vpack.c.bf16 %v2189_v40, %v2188_v14  ;;  %v2193_v21 = vld [vmem:[#allocation13 + $0x58] sm:$0xff]  ;;  %v2195_v49 = vld [vmem:[#allocation13 + $0x68] sm:$0xff] }
 0x383   : > { %v1828_v62 = vadd.f32 %v1827_v61, %v1826_v53  ;;  %3655 = vmatprep.mubr.msk.f32.mxu0 %vm1567_vm1, %v1864_v12  ;;  %4009 = vmatprep.subr.bf16.mxu1 %v4008_v25  ;;  %v2196_v53 = vld [vmem:[#allocation13 + $0x70] sm:$0xff]  ;;  %v4032_v50 = vpack.c.bf16 %v2195_v49, %v2194_v54 }
 0x384   : > { %v1818_v17 = vadd.f32 %v1817_v51, %v1816_v15  ;;  %v1836_v32 = vrot.slane %v1835_v63, 2  ;;  %4011 = vmatpush3.bf16.msra.mxu1 %v4008_v25  ;;  %v2192_v15 = vld [vmem:[#allocation13 + $0x50] sm:$0xff]  ;;  %v2197_v51 = vld [vmem:[#allocation13 + $0x78] sm:$0xff] }
 0x385   : > { %v1829_v13 = vrot.slane %v1828_v62, 2  ;;  %v4028_v28 = vpack.c.bf16 %v2193_v21, %v2192_v15  ;;  %v4036_v61 = vpack.c.bf16 %v2197_v51, %v2196_v53 }
 0x386   : > { %3656 = vmatmul.mubr.msk.f32.gmra.mrb[26].mxu0 %vm1567_vm1, %v1865_v48  ;;  %4415 = vrcp.f32 %v1818_v17  ;;  %v1837_v23 = vadd.f32 %v1836_v32, %v1835_v63 }
 0x387   : > { %v4410_v59 = vpop.eup %4409  ;;  %v1830_v52 = vadd.f32 %v1829_v13, %v1828_v62 }
 0x388   : > { %v4412_v42 = vpop.eup %4411  ;;  %v1838_v37 = vrot.slane %v1837_v23, 1  ;;  %v1867_v2 = vmul.f32 %v4410_v59, %v5663_v30 }
 0x389   : > { %v1831_v31 = vrot.slane %v1830_v52, 1  ;;  %v1866_v35 = vmul.f32 %v4412_v42, %v5665_v22 }
 0x38a   : > { %v1839_v20 = vadd.f32 %v1838_v37, %v1837_v23 }
 0x38b   : > { %3658 = vmatprep.mubr.msk.f32.mxu0 %vm1567_vm1, %v1866_v35  ;;  %v1832_v16 = vadd.f32 %v1831_v31, %v1830_v52 }
 0x38c   : > { %3659 = vmatmul.mubr.msk.f32.gmra.mrb[28].mxu0 %vm1567_vm1, %v1867_v2  ;;  %4417 = vrcp.f32 %v1839_v20  ;;  %v4414_v34 = vpop.eup %4413 }
 0x38d   : > { %4419 = vrcp.f32 %v1832_v16  ;;  %v1869_v5 = vmul.f32 %v4414_v34, %v5676_v9 }
 0x390   : > { %v4416_v56 = vpop.eup %4415 }
 0x391   : > { %v1868_v6 = vmul.f32 %v4416_v56, %v5684_v29  ;;  %v2184_v29 = vld [vmem:[#allocation13 + $0x10] sm:$0xff] }
 0x392   : > { %v4012_v9 = vpack.c.bf16 %v2185_v46, %v2184_v29 }
 0x393   : > { %3661 = vmatprep.mubr.msk.f32.mxu0 %vm1567_vm1, %v1868_v6 }
 0x394   : > { %3662 = vmatmul.mubr.msk.f32.gmra.mrb[30].mxu0 %vm1567_vm1, %v1869_v5  ;;  %4013 = vmatprep.subr.bf16.mxu1 %v4012_v9 }
 0x395   : > { %4015 = vmatpush3.bf16.msra.mxu1 %v4012_v9 }
 0x396   : > { %v4418_v22 = vpop.eup %4417  ;;  %4017 = vmatprep.subr.bf16.mxu1 %v4016_v39 }
 0x397   : > { %v4420_v30 = vpop.eup %4419  ;;  %v1871_v7 = vmul.f32 %v4418_v22, %v4404_v24  ;;  %v2190_v24 = vld [vmem:[#allocation13 + $0x40] sm:$0xff] }
 0x398   : > { %v1870_v60 = vmul.f32 %v4420_v30, %v4406_v57  ;;  %v4024_v57 = vpack.c.bf16 %v2191_v18, %v2190_v24 }
 0x399   : > { %4019 = vmatpush3.bf16.msra.mxu1 %v4016_v39 }
 0x39a   : > { %3664 = vmatprep.mubr.msk.f32.mxu0 %vm1567_vm1, %v1870_v60  ;;  %4021 = vmatprep.subr.bf16.mxu1 %v4020_v33 }
 0x39b   : > { %3665 = vmatmul.mubr.msk.f32.gmra.mrb[32].mxu0 %vm1567_vm1, %v1871_v7 }
 0x39d   : > { %4023 = vmatpush3.bf16.msra.mxu1 %v4020_v33 }
 0x39e   : > { %4025 = vmatprep.subr.bf16.mxu1 %v4024_v57 }
 0x3a1   : > { %4027 = vmatpush3.bf16.msra.mxu1 %v4024_v57 }
 0x3a2   : > { %4029 = vmatprep.subr.bf16.mxu1 %v4028_v28 }
 0x3a5   : > { %4031 = vmatpush3.bf16.msra.mxu1 %v4028_v28 }
 0x3a6   : > { %4033 = vmatprep.subr.bf16.mxu1 %v4032_v50 }
 0x3a9   : > { %4035 = vmatpush3.bf16.msra.mxu1 %v4032_v50 }
 0x3aa   : > { %4037 = vmatprep.subr.bf16.mxu1 %v4036_v61 }
 0x3ad   : > { %4039 = vmatpush3.bf16.msra.mxu1 %v4036_v61 }
 0x449   : > { %v3645_v12 = vpop.f32.mrb[18].mxu0 }
 0x44a   : > { %v2071_v63 = vmul.f32 %v3645_v12, %v5452_v44  ;;  %v1991_v62 = vpop.f32.mrb[19].mxu0 }
 0x44b   : > { %v2070_v48 = vmul.f32 %v1991_v62, %v5444_v36 }
 0x44c   : > { %v2092_v17 = vrot.slane %v2071_v63, 4 }
 0x44d   : > { %v2086_v32 = vrot.slane %v2070_v48, 4  ;;  %v3648_v13 = vpop.f32.mrb[20].mxu0 }
 0x44e   : > { %v2093_v23 = vadd.f32 %v2092_v17, %v2071_v63  ;;  %v2073_v59 = vmul.f32 %v3648_v13, %v5469_v4  ;;  %v2001_v52 = vpop.f32.mrb[21].mxu0 }
 0x44f   : > { %v2087_v42 = vadd.f32 %v2086_v32, %v2070_v48  ;;  %v2072_v37 = vmul.f32 %v2001_v52, %v5463_v58 }
 0x450   : > { %v2094_v31 = vrot.slane %v2093_v23, 2  ;;  %v2104_v35 = vrot.slane %v2073_v59, 4 }
 0x451   : > { %v2088_v2 = vrot.slane %v2087_v42, 2  ;;  %v2098_v20 = vrot.slane %v2072_v37, 4  ;;  %v3651_v16 = vpop.f32.mrb[22].mxu0 }
 0x452   : > { %v2095_v34 = vadd.f32 %v2094_v31, %v2093_v23  ;;  %v2105_v44 = vadd.f32 %v2104_v35, %v2073_v59  ;;  %v2075_v56 = vmul.f32 %v3651_v16, %v5480_v0  ;;  %v2011_v36 = vpop.f32.mrb[23].mxu0 }
 0x453   : > { %v2089_v6 = vadd.f32 %v2088_v2, %v2087_v42  ;;  %v2099_v5 = vadd.f32 %v2098_v20, %v2072_v37  ;;  %v2074_v22 = vmul.f32 %v2011_v36, %v5475_v11 }
 0x454   : > { %v2096_v30 = vrot.slane %v2095_v34, 1  ;;  %v2106_v4 = vrot.slane %v2105_v44, 2  ;;  %v2116_v60 = vrot.slane %v2075_v56, 4 }
 0x455   : > { %v2090_v7 = vrot.slane %v2089_v6, 1  ;;  %v2100_v58 = vrot.slane %v2099_v5, 2  ;;  %v2110_v8 = vrot.slane %v2074_v22, 4  ;;  %v3654_v41 = vpop.f32.mrb[24].mxu0 }
 0x456   : > { %v2097_v25 = vadd.f32 %v2096_v30, %v2095_v34  ;;  %v2107_v29 = vadd.f32 %v2106_v4, %v2105_v44  ;;  %v2117_v46 = vadd.f32 %v2116_v60, %v2075_v56  ;;  %v2077_v9 = vmul.f32 %v3654_v41, %v5492_v38  ;;  %v2021_v43 = vpop.f32.mrb[25].mxu0 }
 0x457   : > { %v2091_v0 = vadd.f32 %v2090_v7, %v2089_v6  ;;  %v2101_v3 = vadd.f32 %v2100_v58, %v2099_v5  ;;  %v2111_v39 = vadd.f32 %v2110_v8, %v2074_v22  ;;  %v2076_v14 = vmul.f32 %v2021_v43, %v5486_v27 }
 0x458   : > { %v2108_v11 = vrot.slane %v2107_v29, 1  ;;  %v2118_v40 = vrot.slane %v2117_v46, 2  ;;  %v2128_v33 = vrot.slane %v2077_v9, 4 }
 0x459   : > { %v2222_v24 = vsel %vm2221_vm2, %v2097_v25, %v2091_v0  ;;  %v2102_v18 = vrot.slane %v2101_v3, 1  ;;  %v2112_v57 = vrot.slane %v2111_v39, 2  ;;  %v2122_v15 = vrot.slane %v2076_v14, 4  ;;  %v3657_v21 = vpop.f32.mrb[26].mxu0 }
 0x45a   : > { %v2119_v28 = vadd.f32 %v2118_v40, %v2117_v46  ;;  %v2129_v54 = vadd.f32 %v2128_v33, %v2077_v9  ;;  %v2079_v38 = vmul.f32 %v3657_v21, %v5503_v55  ;;  %v2031_v49 = vpop.f32.mrb[27].mxu0  ;;  %v2109_v61 = vadd.f32 %v2108_v11, %v2107_v29 }
 0x45b   : > { %v2103_v53 = vadd.f32 %v2102_v18, %v2101_v3  ;;  %v2113_v50 = vadd.f32 %v2112_v57, %v2111_v39  ;;  %v2123_v51 = vadd.f32 %v2122_v15, %v2076_v14  ;;  %v2078_v27 = vmul.f32 %v2031_v49, %v5498_v47 }
 0x45c   : > { %v2120_v12 = vrot.slane %v2119_v28, 1  ;;  %v2130_v63 = vrot.slane %v2129_v54, 2  ;;  %v2140_v62 = vrot.slane %v2079_v38, 4 }
 0x45d   : > { %v2224_v48 = vsel %vm2223_vm3, %v2103_v53, %v2222_v24  ;;  %v2114_v17 = vrot.slane %v2113_v50, 1  ;;  %v2124_v32 = vrot.slane %v2123_v51, 2  ;;  %v2134_v13 = vrot.slane %v2078_v27, 4 }
 0x45e   : > { %v2131_v23 = vadd.f32 %v2130_v63, %v2129_v54  ;;  %v2141_v59 = vadd.f32 %v2140_v62, %v2079_v38  ;;  %v2226_v55 = vsel %vm2225_vm4, %v2109_v61, %v2224_v48  ;;  %v2121_v31 = vadd.f32 %v2120_v12, %v2119_v28  ;;  %v6018_v63 = vld [vmem:[#allocation32_spill] sm:$0xff] }
 0x45f   : > { %v2115_v52 = vadd.f32 %v2114_v17, %v2113_v50  ;;  %v2125_v42 = vadd.f32 %v2124_v32, %v2123_v51  ;;  %v2135_v37 = vadd.f32 %v2134_v13, %v2078_v27  ;;  %v3660_v2 = vpop.f32.mrb[28].mxu0 }
 0x460   : > { %v2132_v47 = vrot.slane %v2131_v23, 1  ;;  %v2142_v35 = vrot.slane %v2141_v59, 2  ;;  %v2081_v34 = vmul.f32 %v3660_v2, %v5515_v10  ;;  %v2041_v44 = vpop.f32.mrb[29].mxu0 }
 0x461   : > { %v2126_v20 = vrot.slane %v2125_v42, 1  ;;  %v2136_v16 = vrot.slane %v2135_v37, 2  ;;  %v2228_v56 = vsel %vm2227_vm5, %v2115_v52, %v2226_v55  ;;  %v2080_v6 = vmul.f32 %v2041_v44, %v5509_v1 }
 0x462   : > { %v2143_v36 = vadd.f32 %v2142_v35, %v2141_v59  ;;  %v2230_v5 = vsel %vm2229_vm6, %v2121_v31, %v2228_v56  ;;  %v2152_v4 = vrot.slane %v2081_v34, 4  ;;  %v2133_v58 = vadd.f32 %v2132_v47, %v2131_v23 }
 0x463   : > { %v2127_v22 = vadd.f32 %v2126_v20, %v2125_v42  ;;  %v2137_v30 = vadd.f32 %v2136_v16, %v2135_v37  ;;  %v2146_v7 = vrot.slane %v2080_v6, 4 }
 0x464   : > { %v2144_v60 = vrot.slane %v2143_v36, 1  ;;  %v2153_v41 = vadd.f32 %v2152_v4, %v2081_v34  ;;  %v5748_v4 = vld [vmem:[%s5260_s20] sm:$0xff] }
 0x465   : > { %v2138_v8 = vrot.slane %v2137_v30, 1  ;;  %v2232_v10 = vsel %vm2231_vm7, %v2127_v22, %v2230_v5  ;;  %v2147_v29 = vadd.f32 %v2146_v7, %v2080_v6  ;;  %v5752_v7 = vld [vmem:[%s5260_s20 + $0x8] sm:$0xff]  ;;  %s6026_s20 = sld [smem:[#allocation51_spill]] }
 0x466   : > { %v2145_v25 = vadd.f32 %v2144_v60, %v2143_v36  ;;  %v2234_v46 = vsel %vm2233_vm8, %v2133_v58, %v2232_v10  ;;  %v2154_v1 = vrot.slane %v2153_v41, 2  ;;  %v3326_v36 = vld [vmem:[%s6019_s22] ss:$0 sm:$0xff]  ;;  %v2364_v10 = vld [vmem:[#allocation14 + $0x10] sm:$0xff] }
 0x467   : > { %v2139_v9 = vadd.f32 %v2138_v8, %v2137_v30  ;;  %3699 = vmatprep.mubr.f32.mxu1 %v2234_v46  ;;  %v3663_v43 = vpop.f32.mrb[30].mxu0  ;;  %v2148_v0 = vrot.slane %v2147_v29, 2  ;;  %v2362_v8 = vld [vmem:[#allocation14] sm:$0xff] }
 0x468   : > { %v2083_v3 = vmul.f32 %v3663_v43, %v5526_v26  ;;  %v2051_v39 = vpop.f32.mrb[31].mxu0  ;;  %v2155_v11 = vadd.f32 %v2154_v1, %v2153_v41  ;;  %v2363_v41 = vld [vmem:[#allocation14 + $0x8] sm:$0xff] }
 0x469   : > { %v2235_v14 = vsel %vm2221_vm2, %v2145_v25, %v2139_v9  ;;  %v2082_v40 = vmul.f32 %v2051_v39, %v5521_v19  ;;  %v2149_v33 = vadd.f32 %v2148_v0, %v2147_v29  ;;  %v4040_v25 = vpack.c.bf16 %v2363_v41, %v2362_v8  ;;  %v2365_v29 = vld [vmem:[#allocation14 + $0x18] sm:$0xff] }
 0x46a   : > { %v2164_v24 = vrot.slane %v2083_v3, 4  ;;  %v2156_v18 = vrot.slane %v2155_v11, 1  ;;  %v4044_v46 = vpack.c.bf16 %v2365_v29, %v2364_v10  ;;  %v3328_v8 = vld [vmem:[%s6022_s3] ss:$0 sm:$0xff] }
 0x46b   : > { %v2158_v57 = vrot.slane %v2082_v40, 4  ;;  %v2150_v15 = vrot.slane %v2149_v33, 1  ;;  %4041 = vmatprep.subr.bf16.mxu0 %v4040_v25 }
 0x46c   : > { %v2165_v21 = vadd.f32 %v2164_v24, %v2083_v3  ;;  %v2157_v49 = vadd.f32 %v2156_v18, %v2155_v11  ;;  %4043 = vmatpush3.bf16.msra.mxu0 %v4040_v25  ;;  %v2368_v18 = vld [vmem:[#allocation14 + $0x30] sm:$0xff] }
 0x46d   : > { %v2159_v28 = vadd.f32 %v2158_v57, %v2082_v40  ;;  %v2151_v54 = vadd.f32 %v2150_v15, %v2149_v33  ;;  %4045 = vmatprep.subr.bf16.mxu0 %v4044_v46  ;;  %v2366_v40 = vld [vmem:[#allocation14 + $0x20] sm:$0xff]  ;;  %v2367_v33 = vld [vmem:[#allocation14 + $0x28] sm:$0xff]  ;;  %v2369_v57 = vld [vmem:[#allocation14 + $0x38] sm:$0xff] }
 0x46e   : > { %v2166_v38 = vrot.slane %v2165_v21, 2  ;;  %v3666_v50 = vpop.f32.mrb[32].mxu0  ;;  %v4048_v24 = vpack.c.bf16 %v2367_v33, %v2366_v40  ;;  %v2370_v15 = vld [vmem:[#allocation14 + $0x40] sm:$0xff] }
 0x46f   : > { %v2160_v53 = vrot.slane %v2159_v28, 2  ;;  %v2236_v26 = vsel %vm2223_vm3, %v2151_v54, %v2235_v14  ;;  %v2085_v27 = vmul.f32 %v3666_v50, %v5536_v45  ;;  %v2061_v61 = vpop.f32.mrb[33].mxu0  ;;  %v2374_v50 = vld [vmem:[#allocation14 + $0x60] sm:$0xff] }
 0x470   : > { %v2167_v51 = vadd.f32 %v2166_v38, %v2165_v21  ;;  %v2237_v19 = vsel %vm2225_vm4, %v2157_v49, %v2236_v26  ;;  %v2084_v62 = vmul.f32 %v2061_v61, %v6018_v63  ;;  %4047 = vmatpush3.bf16.msra.mxu0 %v4044_v46  ;;  %v4052_v21 = vpack.c.bf16 %v2369_v57, %v2368_v18  ;;  %v2372_v38 = vld [vmem:[#allocation14 + $0x50] sm:$0xff]  ;;  %v2373_v49 = vld [vmem:[#allocation14 + $0x58] sm:$0xff]  ;;  %v2375_v26 = vld [vmem:[#allocation14 + $0x68] sm:$0xff] }
 0x471   : > { %v2161_v12 = vadd.f32 %v2160_v53, %v2159_v28  ;;  %v2176_v17 = vrot.slane %v2085_v27, 4  ;;  %4049 = vmatprep.subr.bf16.mxu0 %v4048_v24  ;;  %v2371_v28 = vld [vmem:[#allocation14 + $0x48] sm:$0xff]  ;;  %v4060_v53 = vpack.c.bf16 %v2373_v49, %v2372_v38  ;;  %v2377_v61 = vld [vmem:[#allocation14 + $0x78] sm:$0xff]  ;;  %v2602_v49 = vld [vmem:[#allocation11] sm:$0xff] }
 0x472   : > { %v2168_v48 = vrot.slane %v2167_v51, 1  ;;  %v2170_v13 = vrot.slane %v2084_v62, 4  ;;  %v4056_v54 = vpack.c.bf16 %v2371_v28, %v2370_v15  ;;  %v2463_v63 = vld [vmem:[#allocation16 + $0x8] sm:$0xff]  ;;  %v3330_v18 = vld [vmem:[%s6024_s10] ss:$0 sm:$0xff] }
 0x473   : > { %v2162_v32 = vrot.slane %v2161_v12, 1  ;;  %v2177_v23 = vadd.f32 %v2176_v17, %v2085_v27  ;;  %v2376_v27 = vld [vmem:[#allocation14 + $0x70] sm:$0xff]  ;;  %v2465_v17 = vld [vmem:[#allocation16 + $0x18] sm:$0xff] }
 0x474   : > { %v2171_v55 = vadd.f32 %v2170_v13, %v2084_v62  ;;  %v2169_v52 = vadd.f32 %v2168_v48, %v2167_v51  ;;  %4051 = vmatpush3.bf16.msra.mxu0 %v4048_v24  ;;  %v4064_v51 = vpack.c.bf16 %v2375_v26, %v2374_v50  ;;  %v2464_v62 = vld [vmem:[#allocation16 + $0x10] sm:$0xff]  ;;  %v2466_v13 = vld [vmem:[#allocation16 + $0x20] sm:$0xff] }
 0x475   : > { %v2163_v59 = vadd.f32 %v2162_v32, %v2161_v12  ;;  %v2178_v42 = vrot.slane %v2177_v23, 2  ;;  %4053 = vmatprep.subr.bf16.mxu0 %v4052_v21  ;;  %v4068_v12 = vpack.c.bf16 %v2377_v61, %v2376_v27  ;;  %v4076_v32 = vpack.c.bf16 %v2465_v17, %v2464_v62  ;;  %v2604_v50 = vld [vmem:[#allocation11 + $0x10] sm:$0xff]  ;;  %v2606_v61 = vld [vmem:[#allocation11 + $0x20] sm:$0xff] }
 0x476   : > { %v2172_v31 = vrot.slane %v2171_v55, 2 }
 0x477   : > { %v2238_v37 = vsel %vm2227_vm5, %v2163_v59, %v2237_v19  ;;  %v2179_v45 = vadd.f32 %v2178_v42, %v2177_v23  ;;  %v2462_v19 = vld [vmem:[#allocation16] sm:$0xff]  ;;  %v2467_v23 = vld [vmem:[#allocation16 + $0x28] sm:$0xff] }
 0x478   : > { %v2239_v47 = vsel %vm2229_vm6, %v2169_v52, %v2238_v37  ;;  %v2173_v35 = vadd.f32 %v2172_v31, %v2171_v55  ;;  %4055 = vmatpush3.bf16.msra.mxu0 %v4052_v21  ;;  %v4072_v48 = vpack.c.bf16 %v2463_v63, %v2462_v19  ;;  %v4080_v59 = vpack.c.bf16 %v2467_v23, %v2466_v13  ;;  %v2468_v55 = vld [vmem:[#allocation16 + $0x30] sm:$0xff]  ;;  %v2469_v52 = vld [vmem:[#allocation16 + $0x38] sm:$0xff]  ;;  %v2470_v37 = vld [vmem:[#allocation16 + $0x40] sm:$0xff] }
 0x479   : > { %v2180_v2 = vrot.slane %v2179_v45, 1  ;;  %4057 = vmatprep.subr.bf16.mxu0 %v4056_v54  ;;  %v4084_v42 = vpack.c.bf16 %v2469_v52, %v2468_v55  ;;  %v2471_v31 = vld [vmem:[#allocation16 + $0x48] sm:$0xff]  ;;  %v2608_v55 = vld [vmem:[#allocation11 + $0x30] sm:$0xff]  ;;  %v2609_v52 = vld [vmem:[#allocation11 + $0x38] sm:$0xff] }
 0x47a   : > { %v2174_v20 = vrot.slane %v2173_v35, 1  ;;  %4073 = vmatprep.subr.bf16.mxu1 %v4072_v48 }
 0x47b   : > { %v2181_v34 = vadd.f32 %v2180_v2, %v2179_v45  ;;  %v4088_v45 = vpack.c.bf16 %v2471_v31, %v2470_v37  ;;  %v4116_v37 = vpack.c.bf16 %v2609_v52, %v2608_v55  ;;  %v2611_v31 = vld [vmem:[#allocation11 + $0x48] sm:$0xff] }
 0x47c   : > { %v2175_v16 = vadd.f32 %v2174_v20, %v2173_v35  ;;  %4059 = vmatpush3.bf16.msra.mxu0 %v4056_v54  ;;  %v2473_v35 = vld [vmem:[#allocation16 + $0x58] sm:$0xff]  ;;  %v2474_v20 = vld [vmem:[#allocation16 + $0x60] sm:$0xff] }
 0x47d   : > { %4061 = vmatprep.subr.bf16.mxu0 %v4060_v53 }
 0x47e   : > { %v2240_v44 = vsel %vm2231_vm7, %v2175_v16, %v2239_v47  ;;  %v2472_v47 = vld [vmem:[#allocation16 + $0x50] sm:$0xff]  ;;  %v2475_v16 = vld [vmem:[#allocation16 + $0x68] sm:$0xff] }
 0x47f   : > { %v2241_v56 = vsel %vm2233_vm8, %v2181_v34, %v2240_v44  ;;  %v4092_v2 = vpack.c.bf16 %v2473_v35, %v2472_v47  ;;  %v4096_v34 = vpack.c.bf16 %v2475_v16, %v2474_v20  ;;  %v2612_v47 = vld [vmem:[#allocation11 + $0x50] sm:$0xff]  ;;  %v2613_v35 = vld [vmem:[#allocation11 + $0x58] sm:$0xff]  ;;  %v2614_v20 = vld [vmem:[#allocation11 + $0x60] sm:$0xff] }
 0x480   : > { %3700 = vmatmul.mubr.f32.vlgmr.msra.gmra.mrb[32].mxu1 %v2241_v56  ;;  %4063 = vmatpush3.bf16.msra.mxu0 %v4060_v53  ;;  %v2603_v53 = vld [vmem:[#allocation11 + $0x8] sm:$0xff] }
 0x481   : > { %4065 = vmatprep.subr.bf16.mxu0 %v4064_v51  ;;  %4075 = vmatpush3.bf16.msra.mxu1 %v4072_v48  ;;  %v4104_v26 = vpack.c.bf16 %v2603_v53, %v2602_v49  ;;  %v2615_v16 = vld [vmem:[#allocation11 + $0x68] sm:$0xff] }
 0x482   : > { %4077 = vmatprep.subr.bf16.mxu1 %v4076_v32 }
 0x484   : > { %4067 = vmatpush3.bf16.msra.mxu0 %v4064_v51  ;;  %v2605_v51 = vld [vmem:[#allocation11 + $0x18] sm:$0xff] }
 0x485   : > { %4069 = vmatprep.subr.bf16.mxu0 %v4068_v12  ;;  %4079 = vmatpush3.bf16.msra.mxu1 %v4076_v32  ;;  %v4108_v27 = vpack.c.bf16 %v2605_v51, %v2604_v50  ;;  %v3332_v50 = vld [vmem:[%s6026_s20] ss:$0 sm:$0xff] }
 0x486   : > { %4081 = vmatprep.subr.bf16.mxu1 %v4080_v59 }
 0x488   : > { %4071 = vmatpush3.bf16.msra.mxu0 %v4068_v12  ;;  %v2607_v12 = vld [vmem:[#allocation11 + $0x28] sm:$0xff] }
 0x489   : > { %4083 = vmatpush3.bf16.msra.mxu1 %v4080_v59  ;;  %4105 = vmatprep.subr.bf16.mxu0 %v4104_v26  ;;  %v4112_v19 = vpack.c.bf16 %v2607_v12, %v2606_v61  ;;  %v2715_v12 = vld [vmem:[#allocation13 + $0xf0] sm:$0xff] }
 0x48a   : > { %4085 = vmatprep.subr.bf16.mxu1 %v4084_v42 }
 0x48d   : > { %4087 = vmatpush3.bf16.msra.mxu1 %v4084_v42  ;;  %v2610_v42 = vld [vmem:[#allocation11 + $0x40] sm:$0xff] }
 0x48e   : > { %4089 = vmatprep.subr.bf16.mxu1 %v4088_v45 }
 0x491   : > { %4091 = vmatpush3.bf16.msra.mxu1 %v4088_v45  ;;  %v4120_v45 = vpack.c.bf16 %v2611_v31, %v2610_v42 }
 0x492   : > { %4093 = vmatprep.subr.bf16.mxu1 %v4092_v2 }
 0x495   : > { %4095 = vmatpush3.bf16.msra.mxu1 %v4092_v2  ;;  %v4124_v2 = vpack.c.bf16 %v2613_v35, %v2612_v47  ;;  %v2846_v47 = vld [vmem:[#allocation14 + $0x88] sm:$0xff]  ;;  %v2847_v35 = vld [vmem:[#allocation14 + $0x90] sm:$0xff] }
 0x496   : > { %4097 = vmatprep.subr.bf16.mxu1 %v4096_v34 }
 0x499   : > { %4099 = vmatpush3.bf16.msra.mxu1 %v4096_v34  ;;  %v4128_v34 = vpack.c.bf16 %v2615_v16, %v2614_v20  ;;  %v2848_v20 = vld [vmem:[#allocation14 + $0x98] sm:$0xff] }
 0x49a   : > { %v4172_v16 = vpack.c.bf16 %v2848_v20, %v2847_v35 }
 0x553   : > { %v3701_v6 = vpop.f32.mrb[32].mxu1 }
 0x554   : > { %v2310_v5 = vpop.f32.mrb[33].mxu1  ;;  %v2316_v30 = vadd.f32 %v3701_v6, %v3326_v36 }
 0x555   : > { %v2311_v22 = vadd.f32 %v3326_v36, %v2310_v5 }
 0x556   : > { %v2320_v58 = vadd.f32 %v5752_v7, %v2316_v30 }
 0x557   : > { %v2319_v60 = vadd.f32 %v5748_v4, %v2311_v22 }
 0x559   : > { %2323 = vadd.xlane.f32.xlu0 %v2319_v60 }
 0x55d   : > { %2325 = vadd.xlane.f32.xlu0 %v2320_v58 }
 0x5e6   : > { %v2324_v9 = vpop.xlane.xlu0 %2323 }
 0x5e7   : > { %v2328_v1 = vmul.f32 0.0078125, %v2324_v9 }
 0x5e9   : > { %v5755_v43 = vsub.f32 %v2319_v60, %v2328_v1  ;;  %v3327_v60 = vld [vmem:[%s6020_s2] ss:$0 sm:$0xff]  ;;  %v2476_v1 = vld [vmem:[#allocation16 + $0x70] sm:$0xff]  ;;  %s4697_s2 = scalar_lea.vmem %s5837_s19, 256 }
 0x5ea   : > { %v2326_v0 = vpop.xlane.xlu0 %2325  ;;  %p4698_p5 = scmp.ne.s32.totalorder %s5837_s19, %s4697_s2 }
 0x5eb   : > { %v2329_v3 = vmul.f32 0.0078125, %v2326_v0  ;;  %v2332_v39 = vmul.f32 %v5755_v43, %v5755_v43  ;;  %v2477_v0 = vld [vmem:[#allocation16 + $0x78] sm:$0xff] }
 0x5ec   : > { %p4699_p13 = pnand %p4698_p5, %p6030_p12 }
 0x5ed   : > { %v5759_v14 = vsub.f32 %v2320_v58, %v2329_v3  ;;  %2334 = vadd.xlane.f32.xlu1 %v2332_v39  ;;  %v4100_v3 = vpack.c.bf16 %v2477_v0, %v2476_v1  ;;  %v2710_v1 = vld [vmem:[#allocation13 + $0xc8] sm:$0xff] }
 0x5ee   : > { %p4700_p4 = pneg %p4699_p13 }
 0x5ef   : > { %v2333_v11 = vmul.f32 %v5759_v14, %v5759_v14  ;;  %4101 = vmatprep.subr.bf16.mxu1 %v4100_v3 }
 0x5f0   : > { %4103 = vmatpush3.bf16.msra.mxu1 %v4100_v3  ;;  %v2711_v3 = vld [vmem:[#allocation13 + $0xd0] sm:$0xff] }
 0x5f1   : > { %2336 = vadd.xlane.f32.xlu1 %v2333_v11 }
 0x67a   : > { %v2335_v44 = vpop.xlane.xlu1 %2334 }
 0x67b   : > { %v2338_v56 = vmul.f32 0.0078125, %v2335_v44  ;;  %v2616_v44 = vld [vmem:[#allocation11 + $0x70] sm:$0xff] }
 0x67d   : > { %v2340_v36 = vadd.f32 1e-05, %v2338_v56  ;;  %v2617_v56 = vld [vmem:[#allocation11 + $0x78] sm:$0xff] }
 0x67e   : > { %v2337_v6 = vpop.xlane.xlu1 %2336 }
 0x67f   : > { %4421 = vrsqrt.f32 %v2340_v36  ;;  %v2339_v5 = vmul.f32 0.0078125, %v2337_v6  ;;  %v4132_v36 = vpack.c.bf16 %v2617_v56, %v2616_v44  ;;  %v2701_v6 = vld [vmem:[#allocation13 + $0x80] sm:$0xff]  ;;  %v2850_v44 = vld [vmem:[#allocation14 + $0xa8] sm:$0xff] }
 0x681   : > { %v2341_v22 = vadd.f32 1e-05, %v2339_v5  ;;  %v2702_v5 = vld [vmem:[#allocation13 + $0x88] sm:$0xff] }
 0x683   : > { %4423 = vrsqrt.f32 %v2341_v22  ;;  %v2703_v22 = vld [vmem:[#allocation13 + $0x90] sm:$0xff] }
 0x689   : > { %v4422_v30 = vpop.eup %4421 }
 0x68a   : > { %v2344_v58 = vmul.f32 %v4422_v30, %v5755_v43  ;;  %v3329_v43 = vld [vmem:[%s6023_s30] ss:$0 sm:$0xff]  ;;  %v4136_v30 = vpack.c.bf16 %v2702_v5, %v2701_v6 }
 0x68c   : > { %v2352_v41 = vmul.f32 %v3327_v60, %v2344_v58  ;;  %4137 = vmatprep.subr.bf16.mxu1 %v4136_v30 }
 0x68d   : > { %v4424_v10 = vpop.eup %4423 }
 0x68e   : > { %v2345_v25 = vmul.f32 %v4424_v10, %v5759_v14  ;;  %v2360_v29 = vadd.f32 %v3328_v8, %v2352_v41  ;;  %v2706_v41 = vld [vmem:[#allocation13 + $0xa8] sm:$0xff] }
 0x690   : > { %v2353_v46 = vmul.f32 %v3327_v60, %v2345_v25  ;;  %3734 = vmatprep.mubr.f32.mxu0 %v2360_v29  ;;  %v2704_v60 = vld [vmem:[#allocation13 + $0x98] sm:$0xff]  ;;  %v2707_v25 = vld [vmem:[#allocation13 + $0xb0] sm:$0xff] }
 0x691   : > { %v4140_v58 = vpack.c.bf16 %v2704_v60, %v2703_v22 }
 0x692   : > { %v2361_v9 = vadd.f32 %v3328_v8, %v2353_v46  ;;  %v2705_v8 = vld [vmem:[#allocation13 + $0xa0] sm:$0xff] }
 0x693   : > { %v4144_v10 = vpack.c.bf16 %v2706_v41, %v2705_v8  ;;  %v2852_v8 = vld [vmem:[#allocation14 + $0xb8] sm:$0xff]  ;;  %v2853_v41 = vld [vmem:[#allocation14 + $0xc0] sm:$0xff] }
 0x694   : > { %3735 = vmatmul.mubr.f32.vlgmr.msra.gmra.mrb[34].mxu0 %v2361_v9 }
 0x695   : > { %4107 = vmatpush3.bf16.msra.mxu0 %v4104_v26 }
 0x696   : > { %4109 = vmatprep.subr.bf16.mxu0 %v4108_v27 }
 0x699   : > { %4111 = vmatpush3.bf16.msra.mxu0 %v4108_v27 }
 0x69a   : > { %4113 = vmatprep.subr.bf16.mxu0 %v4112_v19 }
 0x69d   : > { %4115 = vmatpush3.bf16.msra.mxu0 %v4112_v19  ;;  %v2716_v19 = vld [vmem:[#allocation13 + $0xf8] sm:$0xff] }
 0x69e   : > { %4117 = vmatprep.subr.bf16.mxu0 %v4116_v37 }
 0x6a1   : > { %4119 = vmatpush3.bf16.msra.mxu0 %v4116_v37 }
 0x6a2   : > { %4121 = vmatprep.subr.bf16.mxu0 %v4120_v45 }
 0x6a5   : > { %4123 = vmatpush3.bf16.msra.mxu0 %v4120_v45  ;;  %v2845_v45 = vld [vmem:[#allocation14 + $0x80] sm:$0xff] }
 0x6a6   : > { %4125 = vmatprep.subr.bf16.mxu0 %v4124_v2 }
 0x6a9   : > { %4127 = vmatpush3.bf16.msra.mxu0 %v4124_v2  ;;  %v4168_v2 = vpack.c.bf16 %v2846_v47, %v2845_v45  ;;  %v3339_v45 = vld [vmem:[%s6022_s3 + $0x1] ss:$0 sm:$0xff] }
 0x6aa   : > { %4129 = vmatprep.subr.bf16.mxu0 %v4128_v34 }
 0x6ad   : > { %4131 = vmatpush3.bf16.msra.mxu0 %v4128_v34  ;;  %v2849_v34 = vld [vmem:[#allocation14 + $0xa0] sm:$0xff] }
 0x6ae   : > { %4133 = vmatprep.subr.bf16.mxu0 %v4132_v36  ;;  %v4176_v56 = vpack.c.bf16 %v2850_v44, %v2849_v34  ;;  %v2962_v34 = vld [vmem:[#allocation16 + $0xf8] sm:$0xff] }
 0x6b1   : > { %4135 = vmatpush3.bf16.msra.mxu0 %v4132_v36 }
 0x6b2   : > { %4169 = vmatprep.subr.bf16.mxu0 %v4168_v2 }
 0x767   : > { %v3736_v39 = vpop.f32.mrb[34].mxu0 }
 0x768   : > { %v2457_v11 = vadd.f32 %v3736_v39, %v3329_v43  ;;  %v2451_v40 = vpop.f32.mrb[35].mxu0 }
 0x769   : > { %v2452_v33 = vadd.f32 %v3329_v43, %v2451_v40  ;;  %v2712_v43 = vld [vmem:[#allocation13 + $0xd8] sm:$0xff]  ;;  %v2714_v40 = vld [vmem:[#allocation13 + $0xe8] sm:$0xff] }
 0x76a   : > { %v2461_v14 = vmax.f32 %v2457_v11, 0.0  ;;  %v4156_v39 = vpack.c.bf16 %v2712_v43, %v2711_v3  ;;  %v2713_v11 = vld [vmem:[#allocation13 + $0xe0] sm:$0xff]  ;;  %v2858_v3 = vld [vmem:[#allocation14 + $0xe8] sm:$0xff] }
 0x76b   : > { %v2460_v24 = vmax.f32 %v2452_v33, 0.0  ;;  %v4160_v33 = vpack.c.bf16 %v2714_v40, %v2713_v11  ;;  %v2860_v11 = vld [vmem:[#allocation14 + $0xf8] sm:$0xff] }
 0x76d   : > { %3769 = vmatprep.mubr.f32.mxu1 %v2460_v24 }
 0x76e   : > { %3770 = vmatmul.mubr.f32.vlgmr.msra.gmra.mrb[34].mxu1 %v2461_v14 }
 0x76f   : > { %4139 = vmatpush3.bf16.msra.mxu1 %v4136_v30 }
 0x770   : > { %4141 = vmatprep.subr.bf16.mxu1 %v4140_v58 }
 0x773   : > { %4143 = vmatpush3.bf16.msra.mxu1 %v4140_v58  ;;  %v2851_v58 = vld [vmem:[#allocation14 + $0xb0] sm:$0xff] }
 0x774   : > { %4145 = vmatprep.subr.bf16.mxu1 %v4144_v10 }
 0x777   : > { %4147 = vmatpush3.bf16.msra.mxu1 %v4144_v10  ;;  %v4180_v10 = vpack.c.bf16 %v2852_v8, %v2851_v58 }
 0x841   : > { %v3771_v57 = vpop.f32.mrb[34].mxu1 }
 0x842   : > { %v2557_v15 = vadd.f32 %v3771_v57, %v3330_v18  ;;  %v2551_v21 = vpop.f32.mrb[35].mxu1 }
 0x843   : > { %v2552_v28 = vadd.f32 %v3330_v18, %v2551_v21 }
 0x844   : > { %v2561_v54 = vadd.f32 %v2557_v15, %v2361_v9  ;;  %v2709_v9 = vld [vmem:[#allocation13 + $0xc0] sm:$0xff] }
 0x845   : > { %v2560_v38 = vadd.f32 %v2552_v28, %v2360_v29  ;;  %v2708_v29 = vld [vmem:[#allocation13 + $0xb8] sm:$0xff]  ;;  %v4152_v0 = vpack.c.bf16 %v2710_v1, %v2709_v9 }
 0x846   : > { %2566 = vadd.xlane.f32.xlu1 %v2561_v54  ;;  %v4148_v46 = vpack.c.bf16 %v2708_v29, %v2707_v25  ;;  %v2854_v25 = vld [vmem:[#allocation14 + $0xc8] sm:$0xff]  ;;  %v2856_v9 = vld [vmem:[#allocation14 + $0xd8] sm:$0xff] }
 0x847   : > { %2564 = vadd.xlane.f32.xlu0 %v2560_v38  ;;  %v4184_v29 = vpack.c.bf16 %v2854_v25, %v2853_v41 }
 0x848   : > { %4149 = vmatprep.subr.bf16.mxu1 %v4148_v46 }
 0x849   : > { %4151 = vmatpush3.bf16.msra.mxu1 %v4148_v46  ;;  %v2855_v46 = vld [vmem:[#allocation14 + $0xd0] sm:$0xff] }
 0x84a   : > { %4153 = vmatprep.subr.bf16.mxu1 %v4152_v0  ;;  %v4188_v1 = vpack.c.bf16 %v2856_v9, %v2855_v46 }
 0x84d   : > { %4155 = vmatpush3.bf16.msra.mxu1 %v4152_v0  ;;  %v2857_v0 = vld [vmem:[#allocation14 + $0xe0] sm:$0xff] }
 0x84e   : > { %4157 = vmatprep.subr.bf16.mxu1 %v4156_v39  ;;  %v4192_v43 = vpack.c.bf16 %v2858_v3, %v2857_v0 }
 0x851   : > { %4159 = vmatpush3.bf16.msra.mxu1 %v4156_v39  ;;  %v2859_v39 = vld [vmem:[#allocation14 + $0xf0] sm:$0xff] }
 0x852   : > { %4161 = vmatprep.subr.bf16.mxu1 %v4160_v33  ;;  %v4196_v40 = vpack.c.bf16 %v2860_v11, %v2859_v39 }
 0x855   : > { %4163 = vmatpush3.bf16.msra.mxu1 %v4160_v33  ;;  %v2947_v33 = vld [vmem:[#allocation16 + $0x80] sm:$0xff] }
 0x8d3   : > { %v2567_v63 = vpop.xlane.xlu1 %2566 }
 0x8d4   : > { %v2569_v62 = vmul.f32 0.0078125, %v2567_v63  ;;  %v2565_v48 = vpop.xlane.xlu0 %2564  ;;  %v4164_v63 = vpack.c.bf16 %v2716_v19, %v2715_v12  ;;  %v2959_v19 = vld [vmem:[#allocation16 + $0xe0] sm:$0xff] }
 0x8d5   : > { %v2568_v17 = vmul.f32 0.0078125, %v2565_v48 }
 0x8d6   : > { %v5777_v32 = vsub.f32 %v2561_v54, %v2569_v62  ;;  %v3331_v54 = vld [vmem:[%s6025_s12] ss:$0 sm:$0xff]  ;;  %4165 = vmatprep.subr.bf16.mxu1 %v4164_v63 }
 0x8d7   : > { %v5779_v13 = vsub.f32 %v2560_v38, %v2568_v17  ;;  %4167 = vmatpush3.bf16.msra.mxu1 %v4164_v63  ;;  %v3333_v62 = vld [vmem:[%s6027_s29] ss:$0 sm:$0xff]  ;;  %v2960_v63 = vld [vmem:[#allocation16 + $0xe8] sm:$0xff]  ;;  %s4701_s29 = sshll.u32 %s4796_s14, 4  ;;  %s4702_s29 = int_to_ptr.vmem [resolvable:$false] %s4701_s29 }
 0x8d8   : > { %v2573_v23 = vmul.f32 %v5777_v32, %v5777_v32  ;;  %s4703_s21 = scalar_lea.vmem %s4702_s29, 512  ;;  %p4704_p0 = scmp.lt.s32.totalorder %s5837_s19, %s4702_s29 }
 0x8d9   : > { %v2572_v59 = vmul.f32 %v5779_v13, %v5779_v13  ;;  %p4705_p2 = scmp.lt.s32.totalorder %s4703_s21, %s4697_s2 }
 0x8da   : > { %2576 = vadd.xlane.f32.xlu1 %v2573_v23  ;;  %v3335_v23 = vld [vmem:[%s6019_s22 + $0x1] ss:$0 sm:$0xff] }
 0x8db   : > { %2574 = vadd.xlane.f32.xlu0 %v2572_v59  ;;  %p4706_p8 = por %p4705_p2, %p4704_p0 }
 0x8dd   : > { %p4707_p3 = pnand %p4706_p8, %p4700_p4 }
 0x967   : > { %v2577_v24 = vpop.xlane.xlu1 %2576 }
 0x968   : > { %v2579_v14 = vmul.f32 0.0078125, %v2577_v24  ;;  %v2575_v18 = vpop.xlane.xlu0 %2574  ;;  %v2948_v24 = vld [vmem:[#allocation16 + $0x88] sm:$0xff] }
 0x969   : > { %v2578_v57 = vmul.f32 0.0078125, %v2575_v18  ;;  %v4200_v18 = vpack.c.bf16 %v2948_v24, %v2947_v33 }
 0x96a   : > { %v2581_v15 = vadd.f32 1e-05, %v2579_v14  ;;  %v2949_v14 = vld [vmem:[#allocation16 + $0x90] sm:$0xff] }
 0x96b   : > { %v2580_v21 = vadd.f32 1e-05, %v2578_v57  ;;  %v2950_v57 = vld [vmem:[#allocation16 + $0x98] sm:$0xff]  ;;  %4201 = vmatprep.subr.bf16.mxu1 %v4200_v18 }
 0x96c   : > { %4425 = vrsqrt.f32 %v2581_v15  ;;  %v4204_v15 = vpack.c.bf16 %v2950_v57, %v2949_v14 }
 0x96d   : > { %4427 = vrsqrt.f32 %v2580_v21  ;;  %v2951_v21 = vld [vmem:[#allocation16 + $0xa0] sm:$0xff] }
 0x976   : > { %v4426_v28 = vpop.eup %4425 }
 0x977   : > { %v4428_v38 = vpop.eup %4427  ;;  %v2585_v49 = vmul.f32 %v4426_v28, %v5777_v32  ;;  %v2952_v28 = vld [vmem:[#allocation16 + $0xa8] sm:$0xff] }
 0x978   : > { %v2584_v53 = vmul.f32 %v4428_v38, %v5779_v13  ;;  %v2953_v38 = vld [vmem:[#allocation16 + $0xb0] sm:$0xff] }
 0x979   : > { %v2593_v26 = vmul.f32 %v3331_v54, %v2585_v49  ;;  %v2954_v49 = vld [vmem:[#allocation16 + $0xb8] sm:$0xff] }
 0x97a   : > { %v2592_v51 = vmul.f32 %v3331_v54, %v2584_v53  ;;  %v4208_v54 = vpack.c.bf16 %v2952_v28, %v2951_v21  ;;  %v4212_v53 = vpack.c.bf16 %v2954_v49, %v2953_v38 }
 0x97b   : > { %v2601_v61 = vadd.f32 %v3332_v50, %v2593_v26  ;;  %v2956_v26 = vld [vmem:[#allocation16 + $0xc8] sm:$0xff] }
 0x97c   : > { %v2600_v27 = vadd.f32 %v3332_v50, %v2592_v51  ;;  %v2955_v50 = vld [vmem:[#allocation16 + $0xc0] sm:$0xff] }
 0x97d   : > { %v4216_v51 = vpack.c.bf16 %v2956_v26, %v2955_v50 }
 0x97e   : > { %3804 = vmatprep.mubr.f32.mxu0 %v2600_v27  ;;  %v2957_v27 = vld [vmem:[#allocation16 + $0xd0] sm:$0xff] }
 0x97f   : > { %3805 = vmatmul.mubr.f32.vlgmr.msra.gmra.mrb[36].mxu0 %v2601_v61  ;;  %v2958_v61 = vld [vmem:[#allocation16 + $0xd8] sm:$0xff] }
 0x980   : > { %4171 = vmatpush3.bf16.msra.mxu0 %v4168_v2  ;;  %v4220_v12 = vpack.c.bf16 %v2958_v61, %v2957_v27 }
 0x981   : > { %4173 = vmatprep.subr.bf16.mxu0 %v4172_v16 }
 0x984   : > { %4175 = vmatpush3.bf16.msra.mxu0 %v4172_v16  ;;  %v2961_v16 = vld [vmem:[#allocation16 + $0xf0] sm:$0xff] }
 0x985   : > { %4177 = vmatprep.subr.bf16.mxu0 %v4176_v56  ;;  %v4228_v44 = vpack.c.bf16 %v2962_v34, %v2961_v16 }
 0x988   : > { %4179 = vmatpush3.bf16.msra.mxu0 %v4176_v56  ;;  %v3341_v56 = vld [vmem:[%s6023_s30 + $0x1] ss:$0 sm:$0xff] }
 0x989   : > { %4181 = vmatprep.subr.bf16.mxu0 %v4180_v10 }
 0x98c   : > { %4183 = vmatpush3.bf16.msra.mxu0 %v4180_v10 }
 0x98d   : > { %4185 = vmatprep.subr.bf16.mxu0 %v4184_v29 }
 0x990   : > { %4187 = vmatpush3.bf16.msra.mxu0 %v4184_v29 }
 0x991   : > { %4189 = vmatprep.subr.bf16.mxu0 %v4188_v1 }
 0x994   : > { %4191 = vmatpush3.bf16.msra.mxu0 %v4188_v1 }
 0x995   : > { %4193 = vmatprep.subr.bf16.mxu0 %v4192_v43 }
 0x998   : > { %4195 = vmatpush3.bf16.msra.mxu0 %v4192_v43 }
 0x999   : > { %4197 = vmatprep.subr.bf16.mxu0 %v4196_v40 }
 0x99c   : > { %4199 = vmatpush3.bf16.msra.mxu0 %v4196_v40 }
 0xa52   : > { %v3806_v48 = vpop.f32.mrb[36].mxu0 }
 0xa53   : > { %v2691_v17 = vpop.f32.mrb[37].mxu0  ;;  %v2697_v13 = vadd.f32 %v3806_v48, %v3333_v62 }
 0xa54   : > { %v2692_v32 = vadd.f32 %v3333_v62, %v2691_v17  ;;  %v4224_v62 = vpack.c.bf16 %v2960_v63, %v2959_v19 }
 0xa56   : > { %3839 = vmatprep.mubr.f32.mxu1 %v2692_v32 }
 0xa57   : > { %3840 = vmatmul.mubr.f32.vlgmr.msra.gmra.mrb[36].mxu1 %v2697_v13 }
 0xa58   : > { %4203 = vmatpush3.bf16.msra.mxu1 %v4200_v18 }
 0xa59   : > { %4205 = vmatprep.subr.bf16.mxu1 %v4204_v15 }
 0xa5c   : > { %4207 = vmatpush3.bf16.msra.mxu1 %v4204_v15  ;;  %v3346_v15 = vld [vmem:[%s6025_s12 + $0x1] ss:$0 sm:$0xff] }
 0xa5d   : > { %4209 = vmatprep.subr.bf16.mxu1 %v4208_v54 }
 0xa60   : > { %4211 = vmatpush3.bf16.msra.mxu1 %v4208_v54  ;;  %v3347_v54 = vld [vmem:[%s6026_s20 + $0x1] ss:$0 sm:$0xff] }
 0xa61   : > { %4213 = vmatprep.subr.bf16.mxu1 %v4212_v53 }
 0xa64   : > { %4215 = vmatpush3.bf16.msra.mxu1 %v4212_v53 }
 0xa65   : > { %4217 = vmatprep.subr.bf16.mxu1 %v4216_v51 }
 0xa68   : > { %4219 = vmatpush3.bf16.msra.mxu1 %v4216_v51 }
 0xa69   : > { %4221 = vmatprep.subr.bf16.mxu1 %v4220_v12 }
 0xa6c   : > { %4223 = vmatpush3.bf16.msra.mxu1 %v4220_v12 }
 0xa6d   : > { %4225 = vmatprep.subr.bf16.mxu1 %v4224_v62 }
 0xa70   : > { %4227 = vmatpush3.bf16.msra.mxu1 %v4224_v62 }
 0xa71   : > { %4229 = vmatprep.subr.bf16.mxu1 %v4228_v44 }
 0xa74   : > { %4231 = vmatpush3.bf16.msra.mxu1 %v4228_v44 }
 0xb2a   : > { %v3841_v59 = vpop.f32.mrb[36].mxu1 }
 0xb2b   : > { %v2797_v55 = vadd.f32 %v3841_v59, %v3335_v23  ;;  %v2791_v52 = vpop.f32.mrb[37].mxu1 }
 0xb2c   : > { %v2792_v42 = vadd.f32 %v3335_v23, %v2791_v52  ;;  %v3338_v52 = vld [vmem:[%s6021_s28 + $0x1] ss:$0 sm:$0xff] }
 0xb2d   : > { %v2801_v37 = vadd.f32 %v5752_v7, %v2797_v55 }
 0xb2e   : > { %v2800_v31 = vadd.f32 %v5748_v4, %v2792_v42 }
 0xb2f   : > { %2808 = vadd.xlane.f32.xlu1 %v2801_v37 }
 0xb30   : > { %2806 = vadd.xlane.f32.xlu0 %v2800_v31 }
 0xbbc   : > { %v2809_v7 = vpop.xlane.xlu1 %2808 }
 0xbbd   : > { %v2811_v36 = vmul.f32 0.0078125, %v2809_v7  ;;  %v2807_v4 = vpop.xlane.xlu0 %2806 }
 0xbbe   : > { %v2810_v6 = vmul.f32 0.0078125, %v2807_v4 }
 0xbbf   : > { %v5801_v5 = vsub.f32 %v2801_v37, %v2811_v36 }
 0xbc0   : > { %v5803_v22 = vsub.f32 %v2800_v31, %v2810_v6 }
 0xbc1   : > { %v2815_v30 = vmul.f32 %v5801_v5, %v5801_v5 }
 0xbc2   : > { %v2814_v60 = vmul.f32 %v5803_v22, %v5803_v22 }
 0xbc3   : > { %2818 = vadd.xlane.f32.xlu1 %v2815_v30  ;;  %v3343_v30 = vld [vmem:[%s6024_s10 + $0x1] ss:$0 sm:$0xff] }
 0xbc4   : > { %2816 = vadd.xlane.f32.xlu0 %v2814_v60 }
 0xc50   : > { %v2819_v48 = vpop.xlane.xlu1 %2818 }
 0xc51   : > { %v2821_v17 = vmul.f32 0.0078125, %v2819_v48  ;;  %v2817_v32 = vpop.xlane.xlu0 %2816 }
 0xc52   : > { %v2820_v13 = vmul.f32 0.0078125, %v2817_v32 }
 0xc53   : > { %v2823_v23 = vadd.f32 1e-05, %v2821_v17 }
 0xc54   : > { %v2822_v59 = vadd.f32 1e-05, %v2820_v13 }
 0xc55   : > { %4429 = vrsqrt.f32 %v2823_v23 }
 0xc56   : > { %4431 = vrsqrt.f32 %v2822_v59 }
 0xc5f   : > { %v4430_v55 = vpop.eup %4429 }
 0xc60   : > { %v4432_v42 = vpop.eup %4431  ;;  %v2827_v37 = vmul.f32 %v4430_v55, %v5801_v5 }
 0xc61   : > { %v2826_v31 = vmul.f32 %v4432_v42, %v5803_v22 }
 0xc62   : > { %v2835_v47 = vmul.f32 %v3338_v52, %v2827_v37 }
 0xc63   : > { %v2834_v35 = vmul.f32 %v3338_v52, %v2826_v31 }
 0xc64   : > { %v2843_v20 = vadd.f32 %v3339_v45, %v2835_v47 }
 0xc65   : > { %v2842_v2 = vadd.f32 %v3339_v45, %v2834_v35 }
 0xc67   : > { %3874 = vmatprep.mubr.f32.mxu0 %v2842_v2 }
 0xc68   : > { %3875 = vmatmul.mubr.f32.vlgmr.msra.gmra.mrb[38].mxu0 %v2843_v20 }
 0xd3b   : > { %v3876_v7 = vpop.f32.mrb[38].mxu0 }
 0xd3c   : > { %v2941_v36 = vadd.f32 %v3876_v7, %v3341_v56  ;;  %v2935_v4 = vpop.f32.mrb[39].mxu0 }
 0xd3d   : > { %v2936_v6 = vadd.f32 %v3341_v56, %v2935_v4 }
 0xd3e   : > { %v2945_v22 = vmax.f32 %v2941_v36, 0.0 }
 0xd3f   : > { %v2944_v5 = vmax.f32 %v2936_v6, 0.0 }
 0xd41   : > { %3909 = vmatprep.mubr.f32.mxu1 %v2944_v5 }
 0xd42   : > { %3910 = vmatmul.mubr.f32.vlgmr.msra.gmra.mrb[38].mxu1 %v2945_v22 }
 0xe15   : > { %v3911_v60 = vpop.f32.mrb[38].mxu1 }
 0xe16   : > { %v3043_v58 = vadd.f32 %v3911_v60, %v3343_v30  ;;  %v3037_v8 = vpop.f32.mrb[39].mxu1 }
 0xe17   : > { %v3038_v41 = vadd.f32 %v3343_v30, %v3037_v8 }
 0xe18   : > { %v3047_v10 = vadd.f32 %v3043_v58, %v2843_v20 }
 0xe19   : > { %v3046_v25 = vadd.f32 %v3038_v41, %v2842_v2 }
 0xe1a   : > { %3054 = vadd.xlane.f32.xlu1 %v3047_v10 }
 0xe1b   : > { %3052 = vadd.xlane.f32.xlu0 %v3046_v25 }
 0xea7   : > { %v3055_v29 = vpop.xlane.xlu1 %3054 }
 0xea8   : > { %v3057_v46 = vmul.f32 0.0078125, %v3055_v29  ;;  %v3053_v9 = vpop.xlane.xlu0 %3052 }
 0xea9   : > { %v3056_v1 = vmul.f32 0.0078125, %v3053_v9 }
 0xeaa   : > { %v3059_v0 = vsub.f32 %v3047_v10, %v3057_v46 }
 0xeab   : > { %v3058_v3 = vsub.f32 %v3046_v25, %v3056_v1 }
 0xeac   : > { %v3061_v43 = vmul.f32 %v3059_v0, %v3059_v0 }
 0xead   : > { %v3060_v39 = vmul.f32 %v3058_v3, %v3058_v3 }
 0xeae   : > { %3064 = vadd.xlane.f32.xlu1 %v3061_v43 }
 0xeaf   : > { %3062 = vadd.xlane.f32.xlu0 %v3060_v39 }
 0xf3b   : > { %v3065_v11 = vpop.xlane.xlu1 %3064 }
 0xf3c   : > { %v3067_v40 = vmul.f32 0.0078125, %v3065_v11  ;;  %v3063_v33 = vpop.xlane.xlu0 %3062 }
 0xf3d   : > { %v3066_v24 = vmul.f32 0.0078125, %v3063_v33 }
 0xf3e   : > { %v3069_v14 = vadd.f32 1e-05, %v3067_v40 }
 0xf3f   : > { %v3068_v18 = vadd.f32 1e-05, %v3066_v24 }
 0xf40   : > { %4433 = vrsqrt.f32 %v3069_v14 }
 0xf41   : > { %4435 = vrsqrt.f32 %v3068_v18 }
 0xf4a   : > { %v4434_v57 = vpop.eup %4433 }
 0xf4b   : > { %v4436_v21 = vpop.eup %4435  ;;  %v3073_v28 = vmul.f32 %v4434_v57, %v3059_v0 }
 0xf4c   : > { %v3072_v38 = vmul.f32 %v4436_v21, %v3058_v3 }
 0xf4d   : > { %v3081_v49 = vmul.f32 %v3346_v15, %v3073_v28 }
 0xf4e   : > { %v3080_v53 = vmul.f32 %v3346_v15, %v3072_v38 }
 0xf4f   : > { %v3089_v50 = vadd.f32 %v3347_v54, %v3081_v49 }
 0xf50   : > { %v3088_v26 = vadd.f32 %v3347_v54, %v3080_v53 }
 0xf51   : > { %3091 = vst [vmem:[%s836_s0 + $0x8] sm:$0xff] %v3089_v50 }
 0xf52   : > { %3090 = vst [vmem:[%s836_s0] sm:$0xff] %v3088_v26 }
 0xf53   : > { %4710 = shalt.err (!%p4707_p3)
}
 0xf54   : > { %s4711_s16 = scalar_lea.hbm %s5835_s1, 256  ;;  %s4715_s8 = scalar_lea.hbm %s6029_s18, 1024 }
 0xf55   : > { %p4712_p9 = scmp.ne.s32.totalorder %s5835_s1, %s4711_s16  ;;  %p4716_p10 = scmp.lt.u32.totalorder %s5835_s1, %s6029_s18 }
 0xf56   : > { %p4717_p11 = scmp.lt.u32.totalorder %s4715_s8, %s4711_s16  ;;  %p4719_p5 = scmp.lt.u32.totalorder %s4711_s16, %s5835_s1 }
 0xf57   : > { %p4713_p6 = pnand %p4712_p9, %p6030_p12 }
 0xf58   : > { %p4718_p7 = por %p4717_p11, %p4716_p10 }
 0xf59   : > { %p4714_p1 = pneg %p4713_p6 }
 0xf5a   : > { %p4720_p13 = por %p4719_p5, %p4718_p7 }
 0xf5c   : > { %p4721_p4 = pnand %p4720_p13, %p4714_p1 }
 0xf5e   : > { %4724 = shalt.err (!%p4721_p4)
}
 0xf5f   : > { %s4797_s2 = smov 128   ;;  %s4798_s29 = smov 8  }
 0xf60   : > { %4262 = dma.vmem_to_hbm [thread:$0]  (%p6030_p12), %s5837_s19, 256, %s5835_s1, %s3093_s26, %s4797_s2, %s4797_s2, %s4798_s29  }
 0xf61 PF: > { %s6031_s21 = sld [smem:[#allocation24_spill]]  ;;  %s6032_s13 = sld [smem:[#allocation31_spill]] }
 0xf62   : > { %p4310_p0 = scmp.ge.s32.totalorder %s4779_s27, 2 }
 0xf67   : > { %s3121_s0 = sand.u32 1, %s6031_s21   ;;  %p6033_p2 = scmp.ne.s32.totalorder %s6032_s13, 0 }
 0xf68   : > { %s3122_s16 = scalar_lea.sflag [#allocation4], %s3121_s0 }
 0xf69   : > { %p4294_p8 = pnand %p4310_p0, %p6033_p2 }
 0xf6b   : > { %4762 = dma.done.wait (!%p4294_p8), %s3122_s16, 256  }
 0xf6c   : > { %4764 = vsyncadd (!%p4294_p8), %s3122_s16, 4294967040  ;;  %s6034_s27 = sld [smem:[#allocation27_spill]]  ;;  %s6035_s8 = sld [smem:[#allocation25_spill]] }
 0xf6d   : > { %s6036_s26 = sld [smem:[#allocation28_spill]]  ;;  %s6037_s2 = smov %s4771_s25 }
 0xf72   : > { %p40_p3 = scmp.ge.s32.totalorder %s6034_s27, 6   ;;  %s6038_s25 = smov %s6035_s8 }
 0xf74   :  { %42 = sbr.rel (!%p40_p3) target bundleno = 31 (0x1f), region = 207 }
 0xf7b   :  { %3127 = vsyncpa [#allocation3], 1 }
 0xf7c   :  { %3129 = vsyncpa [#allocation3 + $0x1], 1 }
 0xf7d   :  { %3130 = vsyncpa [#allocation6], 1 }
 0xf7e   :  { %3132 = vsyncpa [#allocation6 + $0x1], 1 }
 0xf7f   :  { %3133 = vsyncpa [#allocation9], 1 }
 0xf80   :  { %3134 = vsyncpa [#allocation12], 1 }
 0xf81   :  { %3135 = vsyncpa [#allocation15], 1 }
 0xf82   :  { %3136 = vsyncpa [#allocation4], 1 }
 0xf83   :  { %3138 = vsyncpa [#allocation4 + $0x1], 1 }

</bundles_post_ra>
